<compile_context>
chip_gen: v6e
topology: v6e:2x2x1
jax: 0.10.0
libtpu: 0.0.40
codegen_flags: <defaults>
</compile_context>

<pallas_src>
import jax
import jax.numpy as jnp
from jax import lax
from jax.experimental import pallas as pl
from jax.experimental.pallas import tpu as pltpu

# constants.epsilon / constants.train_fdr (deterministic, in-script)
EPSILON = 1e-7
TRAIN_FDR = 0.01
EULER_GAMMA = 0.5772156649015329


def _spectral_product_kernel(pred_ref, true_ref, prod_ref):
    # pred_ref / true_ref: (TB, C*L) VMEM tiles (TB batch rows per step).
    # prod_ref: (1, 1, TB) lane-dense row of per-sample normalized dot products.
    p = pred_ref[...].astype(jnp.float32)
    t = true_ref[...].astype(jnp.float32)

    # ion_mask = (true + 1) / (true + 1 + eps)  -> ~0 where true == -1.
    # Exact divide (not approx reciprocal) for numerical parity with the
    # reference; the f32 kernel is HBM-bound so the extra VALU work is hidden.
    tp1 = t + 1.0
    mask = tp1 / (tp1 + EPSILON)
    m2 = mask * mask

    # Per-sample reductions over the fused (C*L) lane axis.
    dot = jnp.sum((p * t) * m2, axis=1)   # (TB,)
    psq = jnp.sum((p * p) * m2, axis=1)
    tsq = jnp.sum((t * t) * m2, axis=1)

    # Normalized dot product == sum(pred_norm * true_norm) of the reference
    # (l2_norm divides by sqrt(clamp(sum_sq, eps))).  rsqrt lives on the EUP.
    inv = lax.rsqrt(jnp.maximum(psq, EPSILON)) * lax.rsqrt(jnp.maximum(tsq, EPSILON))
    prod_ref[...] = (dot * inv).reshape(1, 1, -1)


def _choose_batch_tile(B, row_bytes_f32, target_bytes=4 << 20):
    """Pick the batch tile TB.

    * Sized on the f32 working set (the kernel upcasts bf16 to f32), so bf16
      inputs do not double the in-flight footprint.
    * Multiple of 128 so the per-sample output row is lane-dense and bf16
      batch rows pack dense sublanes.
    * Keeps the grid-step count >= 2 and even when there is more than one
      tile's worth of rows (v7x megacore balance)."""
    tb = max(128, (target_bytes // max(1, row_bytes_f32)) // 128 * 128)
    b_ceil = ((B + 127) // 128) * 128
    tb = min(tb, b_ceil)
    if b_ceil >= 256:
        nb = max(2, pl.cdiv(B, tb))
        if nb % 2:
            nb += 1
        tb = min(tb, max(128, ((pl.cdiv(B, nb) + 127) // 128) * 128))
    return tb


def _spectral_products(pred, true):
    """Per-sample normalized masked dot products, shape (B,)."""
    B, C, L = pred.shape
    CL = C * L
    # Free, contiguous reshape: batch rows on sublanes, fused ion axis on lanes.
    pred2 = pred.reshape(B, CL)
    true2 = true.reshape(B, CL)

    tb = _choose_batch_tile(B, CL * 4)

    if B < tb:
        # Tiny batch: pad only this cheap head so the single block is fully
        # in-bounds.  (Padded "true" rows get -1 => fully ion-masked; they are
        # sliced off below anyway.)
        pad = tb - B
        pred2 = jnp.pad(pred2, ((0, pad), (0, 0)))
        true2 = jnp.pad(true2, ((0, pad), (0, 0)), constant_values=-1.0)
    # else: do NOT pad.  The final partial block reads out-of-bounds rows whose
    # (garbage) per-sample products are independent of the valid rows and are
    # discarded by the [:B] slice -- this avoids an extra HBM read+write of
    # both input arrays that jnp.pad would incur.

    nb = pl.cdiv(pred2.shape[0], tb)

    in_spec = pl.BlockSpec((tb, CL), lambda i: (i, 0))
    out_spec = pl.BlockSpec((1, 1, tb), lambda i: (i, 0, 0))

    prod = pl.pallas_call(
        _spectral_product_kernel,
        grid=(nb,),
        in_specs=[in_spec, in_spec],
        out_specs=out_spec,
        out_shape=jax.ShapeDtypeStruct((nb, 1, tb), jnp.float32),
        compiler_params=pltpu.CompilerParams(
            dimension_semantics=("parallel",),
            # 2 inputs x 2 pipeline buffers x ~4 MiB + f32 temporaries stays
            # well under this on every generation (v7x physical VMEM = 64 MiB).
            vmem_limit_bytes=48 << 20,
        ),
    )(pred2, true2)

    return prod.reshape(-1)[:B]


def _reference_products(pred, true, eps=EPSILON):
    """Plain-JAX reference of the per-sample product (for self-check only)."""
    mask = (true + 1.0) / (true + 1.0 + eps)
    pm = pred * mask
    tm = true * mask

    def l2n(v):
        ss = jnp.sum(v * v, axis=(1, 2), keepdims=True)
        return v / jnp.sqrt(jnp.maximum(ss, eps))

    return jnp.sum(l2n(pm) * l2n(tm), axis=(1, 2))


def masked_spectral_angle_loss(pred, true, weights=None,
                               eps=EPSILON, fdr=TRAIN_FDR):
    """Forward pass of Masked_spectral_angle_loss.  `weights` is accepted for
    signature parity with the PyTorch module but (like in the original
    forward) is unused."""
    product = _spectral_products(pred, true)

    # Clamp to the arccos domain: the normalized dot product can exceed 1.0
    # by a few ULPs, which would produce NaN and poison the statistics below.
    product = jnp.clip(product, -1.0, 1.0)
    score = 2.0 * jnp.arccos(product) / jnp.pi          # (B,)

    # generate_outlier_mask(score, 'gumbel', fdr):
    # TODO(synk): return_distribution_dict() was not provided; Gumbel (right)
    # fit via method of moments (unbiased std, matching torch.std default),
    # then ppf(1 - fdr) threshold and mask = score < threshold.
    mean = jnp.mean(score)
    std = jnp.std(score, ddof=1)
    beta = std * jnp.sqrt(6.0) / jnp.pi
    mu = mean - beta * EULER_GAMMA
    threshold = mu - beta * jnp.log(-jnp.log(1.0 - fdr))
    outlier_mask = (score < threshold).astype(score.dtype)

    mean_neg_logit = (jnp.sum(score * outlier_mask) + eps) / \
                     (jnp.sum(outlier_mask) + eps)
    return mean_neg_logit


if __name__ == "__main__":
    key = jax.random.PRNGKey(0)
    k1, k2, k3, k4 = jax.random.split(key, 4)

    # Small synthetic batch; B=10 < batch tile so the small-pad path runs.
    B, C, L = 10, 8, 128
    pred = jax.random.uniform(k1, (B, C, L), dtype=jnp.float32)
    true = jax.random.uniform(k2, (B, C, L), dtype=jnp.float32)
    invalid = jax.random.uniform(k3, (B, C, L)) < 0.3   # ~30% masked ions
    true = jnp.where(invalid, -1.0, true)
    weights = jax.random.uniform(k4, (B,), dtype=jnp.float32)  # unused, parity

    loss_fn = jax.jit(masked_spectral_angle_loss)

    loss = loss_fn(pred, true, weights)
    jax.block_until_ready(loss)
    assert loss.shape == () and bool(jnp.isfinite(loss))

    # Per-sample products vs. plain-JAX reference.
    prods = _spectral_products(pred, true)
    assert bool(jnp.allclose(prods, _reference_products(pred, true),
                             rtol=1e-4, atol=1e-5))

    # Ragged multi-block case (B > tile, B % tile != 0): exercises the
    # no-pad partial final block whose OOB rows are sliced off.
    B2 = 200
    kk = jax.random.split(jax.random.PRNGKey(1), 3)
    pred2 = jax.random.uniform(kk[0], (B2, C, L), dtype=jnp.float32)
    true2 = jax.random.uniform(kk[1], (B2, C, L), dtype=jnp.float32)
    true2 = jnp.where(jax.random.uniform(kk[2], (B2, C, L)) < 0.3, -1.0, true2)
    prods2 = _spectral_products(pred2, true2)
    assert bool(jnp.allclose(prods2, _reference_products(pred2, true2),
                             rtol=1e-4, atol=1e-5))
    loss2 = loss_fn(pred2, true2, jnp.ones((B2,), jnp.float32))
    jax.block_until_ready(loss2)
    assert loss2.shape == () and bool(jnp.isfinite(loss2))

    # bf16 activations stay bf16 in HBM; the kernel upcasts to f32 in VMEM.
    loss_bf16 = loss_fn(pred.astype(jnp.bfloat16),
                        true.astype(jnp.bfloat16), weights)
    jax.block_until_ready(loss_bf16)
    assert loss_bf16.shape == () and bool(jnp.isfinite(loss_bf16))

    print("KERNEL_OK")
</pallas_src>

<mosaic_0001>
module attributes {stable_mosaic.version = 11 : i64} {
  func.func @_spectral_product_kernel(%arg0: i32, %arg1: memref<128x1024xf32, #tpu.memory_space<vmem>>, %arg2: memref<128x1024xf32, #tpu.memory_space<vmem>>, %arg3: memref<1x1x128xf32, #tpu.memory_space<vmem>>) attributes {dimension_semantics = [#tpu.dimension_semantics<parallel>], iteration_bounds = array<i64: 1>, scalar_prefetch = 0 : i64, scratch_operands = 0 : i64, tpu.core_type = #tpu.core_type<tc>, window_params = [{transform_indices = @transform_0, window_bounds = array<i64: 128, 1024>}, {transform_indices = @transform_1, window_bounds = array<i64: 128, 1024>}, {transform_indices = @transform_2, window_bounds = array<i64: 1, 1, 128>}]} {
    %c0 = arith.constant 0 : index
    %c0_0 = arith.constant 0 : index
    %0 = vector.load %arg1[%c0, %c0_0] : memref<128x1024xf32, #tpu.memory_space<vmem>>, vector<128x1024xf32>
    %c0_1 = arith.constant 0 : index
    %c0_2 = arith.constant 0 : index
    %1 = vector.load %arg2[%c0_1, %c0_2] : memref<128x1024xf32, #tpu.memory_space<vmem>>, vector<128x1024xf32>
    %cst = arith.constant 1.000000e+00 : f32
    %2 = vector.broadcast %cst : f32 to vector<128x1024xf32>
    %3 = arith.addf %1, %2 : vector<128x1024xf32>
    %cst_3 = arith.constant 1.000000e-07 : f32
    %4 = vector.broadcast %cst_3 : f32 to vector<128x1024xf32>
    %5 = arith.addf %3, %4 : vector<128x1024xf32>
    %6 = arith.divf %3, %5 : vector<128x1024xf32>
    %7 = arith.mulf %6, %6 : vector<128x1024xf32>
    %8 = arith.mulf %0, %1 : vector<128x1024xf32>
    %9 = arith.mulf %8, %7 : vector<128x1024xf32>
    %cst_4 = arith.constant dense<0.000000e+00> : vector<128xf32>
    %10 = vector.multi_reduction <add>, %9, %cst_4 [1] : vector<128x1024xf32> to vector<128xf32>
    %11 = arith.mulf %0, %0 : vector<128x1024xf32>
    %12 = arith.mulf %11, %7 : vector<128x1024xf32>
    %cst_5 = arith.constant dense<0.000000e+00> : vector<128xf32>
    %13 = vector.multi_reduction <add>, %12, %cst_5 [1] : vector<128x1024xf32> to vector<128xf32>
    %14 = arith.mulf %1, %1 : vector<128x1024xf32>
    %15 = arith.mulf %14, %7 : vector<128x1024xf32>
    %cst_6 = arith.constant dense<0.000000e+00> : vector<128xf32>
    %16 = vector.multi_reduction <add>, %15, %cst_6 [1] : vector<128x1024xf32> to vector<128xf32>
    %cst_7 = arith.constant 1.000000e-07 : f32
    %17 = vector.broadcast %cst_7 : f32 to vector<128xf32>
    %18 = arith.maximumf %13, %17 : vector<128xf32>
    %19 = math.rsqrt %18 : vector<128xf32>
    %cst_8 = arith.constant 1.000000e-07 : f32
    %20 = vector.broadcast %cst_8 : f32 to vector<128xf32>
    %21 = arith.maximumf %16, %20 : vector<128xf32>
    %22 = math.rsqrt %21 : vector<128xf32>
    %23 = arith.mulf %19, %22 : vector<128xf32>
    %24 = arith.mulf %10, %23 : vector<128xf32>
    %25 = vector.shape_cast %24 : vector<128xf32> to vector<1x1x128xf32>
    %c0_9 = arith.constant 0 : index
    %c0_10 = arith.constant 0 : index
    %c0_11 = arith.constant 0 : index
    %26 = vector.load %arg3[%c0_9, %c0_10, %c0_11] : memref<1x1x128xf32, #tpu.memory_space<vmem>>, vector<1x1x128xf32>
    tpu.vector_store %arg3[%c0_9, %c0_10, %c0_11], %25 {strides = array<i32>} : memref<1x1x128xf32, #tpu.memory_space<vmem>>, vector<1x1x128xf32>,
    return
  }
  func.func @transform_0(%arg0: i32) -> (i32, i32) {
    %c0_i32 = arith.constant 0 : i32
    %c0_i32_0 = arith.constant 0 : i32
    return %arg0, %c0_i32 : i32, i32
  }
  func.func @transform_1(%arg0: i32) -> (i32, i32) {
    %c0_i32 = arith.constant 0 : i32
    %c0_i32_0 = arith.constant 0 : i32
    return %arg0, %c0_i32 : i32, i32
  }
  func.func @transform_2(%arg0: i32) -> (i32, i32, i32) {
    %c0_i32 = arith.constant 0 : i32
    %c0_i32_0 = arith.constant 0 : i32
    %c0_i32_1 = arith.constant 0 : i32
    return %arg0, %c0_i32, %c0_i32_0 : i32, i32, i32
  }
}

</mosaic_0001>

<bundles_post_ra>
// kernel: masked_spectral_angle_loss.1
= control target key start
LH: loop header
LB: loop body
LE: loop exit
PB: predicated region body
PF: predicated region fallthrough
CT: control target
= control target key end

     0   :  { %vm2230_vm0 = vcmask 130112   ;;  %vm2237_vm1 = vcmask 195712   ;;  %vm2244_vm2 = vcmask 261312   ;;  %vm2251_vm3 = vcmask 326912   ;;  %s6490_s1 = inlined_call_operand.vmem [shape: f32[128,1024], index: 1, kind: input, shape index: {}]   ;;  %s6491_s0 = inlined_call_operand.vmem [shape: f32[128,1024], index: 0, kind: input, shape index: {}]   ;;  %s6492_s2 = inlined_call_operand.vmem [shape: f32[1,1,128], index: 2, kind: output, shape index: {}]  }
   0x1   :  { %v139_v0 = vld [vmem:[%s6490_s1] sm:$0xff]  ;;  %v140_v1 = vld [vmem:[%s6490_s1 + $0x8] sm:$0xff]  ;;  %v141_v2 = vld [vmem:[%s6490_s1 + $0x10] sm:$0xff]  ;;  %vm2258_vm4 = vcmask 392512   ;;  %vm2265_vm5 = vcmask 458112   ;;  %vm2272_vm6 = vcmask 523712  }
   0x2   :  { %v142_v3 = vld [vmem:[%s6490_s1 + $0x18] sm:$0xff]  ;;  %v143_v4 = vld [vmem:[%s6490_s1 + $0x20] sm:$0xff]  ;;  %v144_v5 = vld [vmem:[%s6490_s1 + $0x28] sm:$0xff]  ;;  %v2934_v6 = vadd.f32 1.0, %v139_v0  ;;  %v2936_v7 = vadd.f32 1.0, %v140_v1  ;;  %v2938_v8 = vadd.f32 1.0, %v141_v2  ;;  %v2960_v20 = vmul.f32 %v139_v0, %v139_v0 }
   0x3   :  { %v145_v9 = vld [vmem:[%s6490_s1 + $0x30] sm:$0xff]  ;;  %v146_v10 = vld [vmem:[%s6490_s1 + $0x38] sm:$0xff]  ;;  %v2946_v11 = vadd.f32 1.0, %v142_v3  ;;  %v2948_v12 = vadd.f32 1.0, %v143_v4  ;;  %v2950_v13 = vadd.f32 1.0, %v144_v5  ;;  %v11_v21 = vld [vmem:[%s6491_s0] sm:$0xff]  ;;  %v2969_v26 = vmul.f32 %v140_v1, %v140_v1 }
   0x4   :  { %v2952_v14 = vadd.f32 1.0, %v145_v9  ;;  %v2954_v15 = vadd.f32 1.0, %v146_v10  ;;  %v395_v16 = vadd.f32 1e-07, %v2934_v6  ;;  %v396_v17 = vadd.f32 1e-07, %v2936_v7 }
   0x5   :  { %v397_v18 = vadd.f32 1e-07, %v2938_v8  ;;  %v398_v19 = vadd.f32 1e-07, %v2946_v11  ;;  %v399_v22 = vadd.f32 1e-07, %v2948_v12  ;;  %v2971_v27 = vmul.f32 %v141_v2, %v141_v2 }
   0x6   :  { %v400_v23 = vadd.f32 1e-07, %v2950_v13  ;;  %v401_v24 = vadd.f32 1e-07, %v2952_v14  ;;  %2336 = vrcp.f32 %v395_v16  ;;  %v402_v25 = vadd.f32 1e-07, %v2954_v15 }
   0x7   :  { %2338 = vrcp.f32 %v396_v17  ;;  %v12_v28 = vld [vmem:[%s6491_s0 + $0x8] sm:$0xff]  ;;  %v13_v29 = vld [vmem:[%s6491_s0 + $0x10] sm:$0xff]  ;;  %v14_v30 = vld [vmem:[%s6491_s0 + $0x18] sm:$0xff]  ;;  %v2982_v31 = vmul.f32 %v142_v3, %v142_v3  ;;  %v2984_v32 = vmul.f32 %v143_v4, %v143_v4  ;;  %v2986_v33 = vmul.f32 %v144_v5, %v144_v5 }
   0x8   :  { %2340 = vrcp.f32 %v397_v18  ;;  %v15_v34 = vld [vmem:[%s6491_s0 + $0x20] sm:$0xff]  ;;  %v2991_v35 = vmul.f32 %v145_v9, %v145_v9  ;;  %v2993_v36 = vmul.f32 %v146_v10, %v146_v10  ;;  %v16_v37 = vld [vmem:[%s6491_s0 + $0x28] sm:$0xff]  ;;  %v2998_v38 = vmul.f32 %v11_v21, %v11_v21  ;;  %v149_v44 = vld [vmem:[%s6490_s1 + $0x50] sm:$0xff] }
   0x9   :  { %2342 = vrcp.f32 %v398_v19  ;;  %v147_v39 = vld [vmem:[%s6490_s1 + $0x40] sm:$0xff]  ;;  %v148_v40 = vld [vmem:[%s6490_s1 + $0x48] sm:$0xff]  ;;  %v3006_v41 = vmul.f32 %v12_v28, %v12_v28  ;;  %v3008_v42 = vmul.f32 %v13_v29, %v13_v29  ;;  %v3010_v43 = vmul.f32 %v14_v30, %v14_v30  ;;  %v150_v45 = vld [vmem:[%s6490_s1 + $0x58] sm:$0xff] }
   0xa   :  { %2344 = vrcp.f32 %v399_v22  ;;  %v151_v46 = vld [vmem:[%s6490_s1 + $0x60] sm:$0xff]  ;;  %v3021_v47 = vmul.f32 %v15_v34, %v15_v34  ;;  %v152_v48 = vld [vmem:[%s6490_s1 + $0x68] sm:$0xff]  ;;  %v153_v49 = vld [vmem:[%s6490_s1 + $0x70] sm:$0xff]  ;;  %v3032_v51 = vadd.f32 1.0, %v147_v39  ;;  %v3034_v52 = vadd.f32 1.0, %v148_v40 }
   0xb   :  { %2346 = vrcp.f32 %v400_v23  ;;  %v154_v50 = vld [vmem:[%s6490_s1 + $0x78] sm:$0xff]  ;;  %v17_v53 = vld [vmem:[%s6491_s0 + $0x30] sm:$0xff]  ;;  %v3042_v55 = vadd.f32 1.0, %v149_v44  ;;  %v3044_v56 = vadd.f32 1.0, %v150_v45  ;;  %v3046_v57 = vadd.f32 1.0, %v151_v46  ;;  %v19_v16 = vld [vmem:[%s6491_s0 + $0x40] sm:$0xff] }
   0xc   :  { %2348 = vrcp.f32 %v401_v24  ;;  %v18_v54 = vld [vmem:[%s6491_s0 + $0x38] sm:$0xff]  ;;  %v3048_v58 = vadd.f32 1.0, %v152_v48  ;;  %v3050_v59 = vadd.f32 1.0, %v153_v49  ;;  %v3052_v60 = vadd.f32 1.0, %v154_v50  ;;  %v20_v21 = vld [vmem:[%s6491_s0 + $0x48] sm:$0xff]  ;;  %v21_v22 = vld [vmem:[%s6491_s0 + $0x50] sm:$0xff] }
   0xd   :  { %2350 = vrcp.f32 %v402_v25  ;;  %v3054_v61 = vmul.f32 %v16_v37, %v16_v37  ;;  %v403_v62 = vadd.f32 1e-07, %v3032_v51  ;;  %v404_v63 = vadd.f32 1e-07, %v3034_v52  ;;  %v22_v28 = vld [vmem:[%s6491_s0 + $0x58] sm:$0xff]  ;;  %v23_v29 = vld [vmem:[%s6491_s0 + $0x60] sm:$0xff] }
   0xe   :  { %v405_v0 = vadd.f32 1e-07, %v3042_v55  ;;  %v3059_v1 = vmul.f32 %v17_v53, %v17_v53  ;;  %v3061_v2 = vmul.f32 %v18_v54, %v18_v54  ;;  %v406_v3 = vadd.f32 1e-07, %v3044_v56  ;;  %v26_v54 = vld [vmem:[%s6491_s0 + $0x78] sm:$0xff] }
   0xf   :  { %v3064_v4 = vmul.f32 %v147_v39, %v147_v39  ;;  %v407_v5 = vadd.f32 1e-07, %v3046_v57  ;;  %v408_v9 = vadd.f32 1e-07, %v3048_v58  ;;  %2352 = vrcp.f32 %v403_v62  ;;  %v24_v39 = vld [vmem:[%s6491_s0 + $0x68] sm:$0xff] }
  0x10   :  { %v3068_v10 = vmul.f32 %v148_v40, %v148_v40  ;;  %v409_v17 = vadd.f32 1e-07, %v3050_v59  ;;  %v410_v18 = vadd.f32 1e-07, %v3052_v60  ;;  %2354 = vrcp.f32 %v404_v63 }
  0x11   :  { %v3075_v19 = vmul.f32 %v149_v44, %v149_v44  ;;  %2356 = vrcp.f32 %v405_v0  ;;  %v3083_v23 = vmul.f32 %v150_v45, %v150_v45  ;;  %v3085_v24 = vmul.f32 %v151_v46, %v151_v46  ;;  %v25_v46 = vld [vmem:[%s6491_s0 + $0x70] sm:$0xff] }
  0x12   :  { %v3087_v25 = vmul.f32 %v152_v48, %v152_v48  ;;  %2358 = vrcp.f32 %v406_v3  ;;  %v3095_v34 = vmul.f32 %v153_v49, %v153_v49  ;;  %v3097_v37 = vmul.f32 %v154_v50, %v154_v50 }
  0x13   :  { %v2337_v30 = vpop.eup %2336  ;;  %v3102_v40 = vmul.f32 %v19_v16, %v19_v16  ;;  %2360 = vrcp.f32 %v407_v5  ;;  %v3108_v48 = vmul.f32 %v20_v21, %v20_v21  ;;  %v3110_v49 = vmul.f32 %v21_v22, %v21_v22 }
  0x14   :  { %v2339_v44 = vpop.eup %2338  ;;  %v524_v45 = vmul.f32 %v2337_v30, %v2934_v6  ;;  %2362 = vrcp.f32 %v408_v9  ;;  %v3116_v62 = vmul.f32 %v22_v28, %v22_v28  ;;  %v3118_v6 = vmul.f32 %v23_v29, %v23_v29 }
  0x15   :  { %v2341_v50 = vpop.eup %2340  ;;  %v526_v53 = vmul.f32 %v2339_v44, %v2936_v7  ;;  %2364 = vrcp.f32 %v409_v17  ;;  %v3123_v5 = vmul.f32 %v24_v39, %v24_v39  ;;  %v3128_v21 = vmul.f32 %v25_v46, %v25_v46 }
  0x16   :  { %v2343_v63 = vpop.eup %2342  ;;  %v528_v0 = vmul.f32 %v2341_v50, %v2938_v8  ;;  %v3121_v3 = vmul.f32 %v524_v45, %v524_v45  ;;  %2366 = vrcp.f32 %v410_v18  ;;  %v3135_v30 = vmul.f32 %v26_v54, %v26_v54 }
  0x17   :  { %v2345_v16 = vpop.eup %2344  ;;  %v530_v7 = vmul.f32 %v2343_v63, %v2946_v11  ;;  %v3126_v9 = vmul.f32 %v526_v53, %v526_v53  ;;  %vm2279_vm7 = vcmask 589312   ;;  %vm2286_vm8 = vcmask 654912  }
  0x18   :  { %6603 = vst [vmem:[#allocation2_spill] sm:$0xff] %v3121_v3  ;;  %v2347_v22 = vpop.eup %2346  ;;  %v532_v28 = vmul.f32 %v2345_v16, %v2948_v12  ;;  %v3131_v29 = vmul.f32 %v528_v0, %v528_v0  ;;  %v1835_v8 = vmul.f32 %v2960_v20, %v3121_v3  ;;  %v1435_v18 = vmul.f32 %v2998_v38, %v3121_v3  ;;  %v3147_v12 = vld [vmem:[%s6490_s1 + $0x80] sm:$0xff]  ;;  %v3152_v20 = vld [vmem:[%s6490_s1 + $0x88] sm:$0xff] }
  0x19   :  { %6604 = vst [vmem:[#allocation3_spill] sm:$0xff] %v3126_v9  ;;  %v2349_v17 = vpop.eup %2348  ;;  %v534_v39 = vmul.f32 %v2347_v22, %v2950_v13  ;;  %v3138_v44 = vmul.f32 %v530_v7, %v530_v7  ;;  %v1836_v11 = vmul.f32 %v2969_v26, %v3126_v9  ;;  %v1436_v38 = vmul.f32 %v3006_v41, %v3126_v9 }
  0x1a   :  { %6605 = vst [vmem:[#allocation4_spill] sm:$0xff] %v3131_v29  ;;  %v2351_v45 = vpop.eup %2350  ;;  %v536_v13 = vmul.f32 %v2349_v17, %v2952_v14  ;;  %v3155_v46 = vmul.f32 %v532_v28, %v532_v28  ;;  %v1837_v26 = vmul.f32 %v2971_v27, %v3131_v29  ;;  %v1437_v14 = vmul.f32 %v3008_v42, %v3131_v29 }
  0x1b   :  { %6606 = vst [vmem:[#allocation5_spill] sm:$0xff] %v3138_v44  ;;  %v538_v50 = vmul.f32 %v2351_v45, %v2954_v15  ;;  %v3162_v53 = vmul.f32 %v534_v39, %v534_v39  ;;  %v1838_v54 = vmul.f32 %v2982_v31, %v3138_v44  ;;  %v1963_v63 = vadd.f32 %v1836_v11, %v1835_v8 }
  0x1c   :  { %6607 = vst [vmem:[#allocation6_spill] sm:$0xff] %v3155_v46  ;;  %v3166_v0 = vmul.f32 %v536_v13, %v536_v13  ;;  %v3171_v16 = vadd.f32 1.0, %v3147_v12  ;;  %v3174_v27 = vadd.f32 1.0, %v3152_v20  ;;  %v2353_v41 = vpop.eup %2352  ;;  %v1839_v15 = vmul.f32 %v2984_v32, %v3155_v46 }
  0x1d   :  { %6608 = vst [vmem:[#allocation7_spill] sm:$0xff] %v3162_v53  ;;  %v3176_v7 = vmul.f32 %v538_v50, %v538_v50  ;;  %v1964_v22 = vadd.f32 %v1963_v63, %v1837_v26  ;;  %v1438_v31 = vmul.f32 %v3010_v43, %v3138_v44  ;;  %v2355_v28 = vpop.eup %2354  ;;  %v1840_v42 = vmul.f32 %v2986_v33, %v3162_v53 }
  0x1e   :  { %6609 = vst [vmem:[#allocation8_spill] sm:$0xff] %v3166_v0  ;;  %v1439_v8 = vmul.f32 %v3021_v47, %v3155_v46  ;;  %v1563_v17 = vadd.f32 %v1436_v38, %v1435_v18  ;;  %v540_v39 = vmul.f32 %v2353_v41, %v3032_v51  ;;  %v2357_v11 = vpop.eup %2356  ;;  %v1841_v45 = vmul.f32 %v2991_v35, %v3166_v0 }
  0x1f   :  { %6610 = vst [vmem:[#allocation9_spill] sm:$0xff] %v3176_v7  ;;  %v1965_v13 = vadd.f32 %v1964_v22, %v1838_v54  ;;  %v1440_v32 = vmul.f32 %v3054_v61, %v3162_v53  ;;  %v542_v43 = vmul.f32 %v2355_v28, %v3034_v52  ;;  %v2359_v26 = vpop.eup %2358  ;;  %v1441_v33 = vmul.f32 %v3059_v1, %v3166_v0 }
  0x20   :  { %v1564_v50 = vadd.f32 %v1563_v17, %v1437_v14  ;;  %v544_v47 = vmul.f32 %v2357_v11, %v3042_v55  ;;  %v3195_v18 = vmul.f32 %v540_v39, %v540_v39  ;;  %v2361_v51 = vpop.eup %2360  ;;  %v1842_v38 = vmul.f32 %v2993_v36, %v3176_v7 }
  0x21   :  { %v1966_v35 = vadd.f32 %v1965_v13, %v1839_v15  ;;  %v546_v54 = vmul.f32 %v2359_v26, %v3044_v56  ;;  %v3200_v63 = vmul.f32 %v542_v43, %v542_v43  ;;  %v2363_v61 = vpop.eup %2362  ;;  %v548_v41 = vmul.f32 %v2361_v51, %v3046_v57  ;;  %v159_v51 = vld [vmem:[%s6490_s1 + $0xa0] sm:$0xff] }
  0x22   :  { %v1565_v52 = vadd.f32 %v1564_v50, %v1438_v31  ;;  %v3203_v22 = vmul.f32 %v544_v47, %v544_v47  ;;  %v1843_v55 = vmul.f32 %v3064_v4, %v3195_v18  ;;  %v2365_v1 = vpop.eup %2364  ;;  %v550_v28 = vmul.f32 %v2363_v61, %v3048_v58  ;;  %v157_v4 = vld [vmem:[%s6490_s1 + $0x90] sm:$0xff] }
  0x23   :  { %v1967_v14 = vadd.f32 %v1966_v35, %v1840_v42  ;;  %v3208_v17 = vmul.f32 %v546_v54, %v546_v54  ;;  %v1844_v36 = vmul.f32 %v3068_v10, %v3200_v63  ;;  %v2367_v56 = vpop.eup %2366  ;;  %v552_v31 = vmul.f32 %v2365_v1, %v3050_v59  ;;  %v162_v35 = vld [vmem:[%s6490_s1 + $0xb8] sm:$0xff] }
  0x24   :  { %v1566_v15 = vadd.f32 %v1565_v52, %v1439_v8  ;;  %v3213_v39 = vmul.f32 %v548_v41, %v548_v41  ;;  %v1845_v57 = vmul.f32 %v3075_v19, %v3203_v22  ;;  %v1442_v58 = vmul.f32 %v3061_v2, %v3176_v7  ;;  %v158_v19 = vld [vmem:[%s6490_s1 + $0x98] sm:$0xff] }
  0x25   :  { %v1968_v42 = vadd.f32 %v1967_v14, %v1841_v45  ;;  %v554_v11 = vmul.f32 %v2367_v56, %v3052_v60  ;;  %v3223_v10 = vmul.f32 %v550_v28, %v550_v28  ;;  %v3225_v13 = vmul.f32 %v552_v31, %v552_v31 }
  0x26   :  { %v1567_v8 = vadd.f32 %v1566_v15, %v1440_v32  ;;  %v1846_v59 = vmul.f32 %v3083_v23, %v3208_v17  ;;  %v1972_v43 = vadd.f32 %v1844_v36, %v1843_v55  ;;  %v1443_v2 = vmul.f32 %v3102_v40, %v3195_v18 }
  0x27   :  { %6611 = vst [vmem:[#allocation10_spill] sm:$0xff] %v3225_v13  ;;  %v1969_v26 = vadd.f32 %v1968_v42, %v1842_v38  ;;  %v3232_v45 = vmul.f32 %v554_v11, %v554_v11  ;;  %v3236_v60 = vadd.f32 1.0, %v157_v4  ;;  %v1847_v32 = vmul.f32 %v3085_v24, %v3213_v39  ;;  %v160_v38 = vld [vmem:[%s6490_s1 + $0xa8] sm:$0xff] }
  0x28   :  { %v1568_v50 = vadd.f32 %v1567_v8, %v1441_v33  ;;  %v1973_v47 = vadd.f32 %v1972_v43, %v1845_v57  ;;  %v1444_v23 = vmul.f32 %v3108_v48, %v3200_v63  ;;  %v1848_v40 = vmul.f32 %v3087_v25, %v3223_v10  ;;  %v161_v48 = vld [vmem:[%s6490_s1 + $0xb0] sm:$0xff] }
  0x29   :  { %6612 = vst [vmem:[#allocation11_spill] sm:$0xff] %v3232_v45  ;;  %1970 = vadd.xlane.f32.xlu1 %v1969_v26  ;;  %v1849_v33 = vmul.f32 %v3095_v34, %v3225_v13  ;;  %v1445_v24 = vmul.f32 %v3110_v49, %v3203_v22  ;;  %v3260_v54 = vadd.f32 1.0, %v158_v19  ;;  %v1850_v25 = vmul.f32 %v3097_v37, %v3232_v45 }
  0x2a   :  { %v1569_v61 = vadd.f32 %v1568_v50, %v1442_v58  ;;  %v1974_v52 = vadd.f32 %v1973_v47, %v1846_v59  ;;  %v1446_v34 = vmul.f32 %v3116_v62, %v3208_v17  ;;  %v1447_v49 = vmul.f32 %v3118_v6, %v3213_v39  ;;  %v27_v50 = vld [vmem:[%s6491_s0 + $0x80] sm:$0xff] }
  0x2b   :  { %v1572_v41 = vadd.f32 %v1444_v23, %v1443_v2  ;;  %v3268_v55 = vadd.f32 1.0, %v159_v51  ;;  %v3270_v1 = vadd.f32 1.0, %v160_v38  ;;  %v3272_v28 = vadd.f32 1.0, %v161_v48 }
  0x2c   :  { %1570 = vadd.xlane.f32.xlu0 %v1569_v61  ;;  %v1975_v14 = vadd.f32 %v1974_v52, %v1847_v32  ;;  %v3274_v36 = vadd.f32 1.0, %v162_v35  ;;  %v411_v37 = vadd.f32 1e-07, %v3171_v16  ;;  %v1448_v56 = vmul.f32 %v3123_v5, %v3223_v10  ;;  %v163_v61 = vld [vmem:[%s6490_s1 + $0xc0] sm:$0xff] }
  0x2d   :  { %v1573_v62 = vadd.f32 %v1572_v41, %v1445_v24  ;;  %v412_v15 = vadd.f32 1e-07, %v3174_v27  ;;  %v413_v6 = vadd.f32 1e-07, %v3236_v60  ;;  %v1449_v57 = vmul.f32 %v3128_v21, %v3225_v13  ;;  %v167_v41 = vld [vmem:[%s6490_s1 + $0xe0] sm:$0xff] }
  0x2e   :  { %v1976_v31 = vadd.f32 %v1975_v14, %v1848_v40  ;;  %v1450_v42 = vmul.f32 %v3135_v30, %v3232_v45  ;;  %v414_v58 = vadd.f32 1e-07, %v3260_v54  ;;  %v415_v8 = vadd.f32 1e-07, %v3268_v55  ;;  %v28_v40 = vld [vmem:[%s6491_s0 + $0x88] sm:$0xff] }
  0x2f   :  { %v1574_v11 = vadd.f32 %v1573_v62, %v1446_v34  ;;  %v416_v59 = vadd.f32 1e-07, %v3270_v1  ;;  %2368 = vrcp.f32 %v411_v37  ;;  %v417_v43 = vadd.f32 1e-07, %v3272_v28  ;;  %v165_v34 = vld [vmem:[%s6490_s1 + $0xd0] sm:$0xff]  ;;  %v168_v37 = vld [vmem:[%s6490_s1 + $0xe8] sm:$0xff] }
  0x30   :  { %v1977_v5 = vadd.f32 %v1976_v31, %v1849_v33  ;;  %v418_v26 = vadd.f32 1e-07, %v3274_v36  ;;  %2370 = vrcp.f32 %v412_v15  ;;  %v3292_v21 = vmul.f32 %v3147_v12, %v3147_v12  ;;  %v29_v12 = vld [vmem:[%s6491_s0 + $0x90] sm:$0xff]  ;;  %v170_v62 = vld [vmem:[%s6490_s1 + $0xf8] sm:$0xff]  ;;  %v32_v15 = vld [vmem:[%s6491_s0 + $0xa8] sm:$0xff] }
  0x31   :  { %v1575_v2 = vadd.f32 %v1574_v11, %v1447_v49  ;;  %2372 = vrcp.f32 %v413_v6  ;;  %v3296_v30 = vmul.f32 %v3152_v20, %v3152_v20  ;;  %v3301_v47 = vmul.f32 %v157_v4, %v157_v4  ;;  %v30_v20 = vld [vmem:[%s6491_s0 + $0x98] sm:$0xff]  ;;  %v33_v11 = vld [vmem:[%s6491_s0 + $0xb0] sm:$0xff] }
  0x32   :  { %v1978_v32 = vadd.f32 %v1977_v5, %v1850_v25  ;;  %2374 = vrcp.f32 %v414_v58  ;;  %v3303_v23 = vmul.f32 %v158_v19, %v158_v19  ;;  %v3314_v24 = vmul.f32 %v159_v51, %v159_v51  ;;  %v31_v19 = vld [vmem:[%s6491_s0 + $0xa0] sm:$0xff]  ;;  %v164_v25 = vld [vmem:[%s6490_s1 + $0xc8] sm:$0xff]  ;;  %v166_v49 = vld [vmem:[%s6490_s1 + $0xd8] sm:$0xff] }
  0x33   :  { %v1576_v33 = vadd.f32 %v1575_v2, %v1448_v56  ;;  %2376 = vrcp.f32 %v415_v8  ;;  %v3316_v4 = vmul.f32 %v160_v38, %v160_v38  ;;  %v3327_v52 = vmul.f32 %v161_v48, %v161_v48  ;;  %v169_v56 = vld [vmem:[%s6490_s1 + $0xf0] sm:$0xff]  ;;  %v34_v8 = vld [vmem:[%s6491_s0 + $0xb8] sm:$0xff] }
  0x34   :  { %1979 = vadd.xlane.f32.xlu1 %v1978_v32  ;;  %2378 = vrcp.f32 %v416_v59  ;;  %v3329_v51 = vmul.f32 %v162_v35, %v162_v35  ;;  %v3331_v38 = vmul.f32 %v27_v50, %v27_v50  ;;  %v3342_v48 = vmul.f32 %v28_v40, %v28_v40 }
  0x35   :  { %v1577_v14 = vadd.f32 %v1576_v33, %v1449_v57  ;;  %2380 = vrcp.f32 %v417_v43  ;;  %v3344_v35 = vmul.f32 %v29_v12, %v29_v12  ;;  %v3358_v6 = vmul.f32 %v30_v20, %v30_v20 }
  0x36   :  { %2382 = vrcp.f32 %v418_v26  ;;  %v3360_v31 = vmul.f32 %v31_v19, %v31_v19  ;;  %v3362_v57 = vadd.f32 1.0, %v163_v61  ;;  %v3370_v59 = vadd.f32 1.0, %v164_v25 }
  0x37   :  { %v1578_v58 = vadd.f32 %v1577_v14, %v1450_v42  ;;  %v3372_v5 = vadd.f32 1.0, %v165_v34  ;;  %v3374_v43 = vadd.f32 1.0, %v166_v49  ;;  %v3376_v26 = vadd.f32 1.0, %v167_v41 }
  0x38   :  { %v3378_v2 = vadd.f32 1.0, %v168_v37  ;;  %v3380_v50 = vadd.f32 1.0, %v169_v56  ;;  %v3382_v42 = vadd.f32 1.0, %v170_v62  ;;  %v3384_v32 = vmul.f32 %v32_v15, %v32_v15 }
  0x39   :  { %1579 = vadd.xlane.f32.xlu0 %v1578_v58  ;;  %v419_v40 = vadd.f32 1e-07, %v3362_v57  ;;  %v420_v12 = vadd.f32 1e-07, %v3370_v59  ;;  %v421_v20 = vadd.f32 1e-07, %v3372_v5  ;;  %v3389_v33 = vmul.f32 %v33_v11, %v33_v11 }
  0x3a   :  { %v3391_v19 = vmul.f32 %v34_v8, %v34_v8  ;;  %v422_v14 = vadd.f32 1e-07, %v3374_v43  ;;  %v3394_v7 = vmul.f32 %v163_v61, %v163_v61  ;;  %v423_v0 = vadd.f32 1e-07, %v3376_v26 }
  0x3b   :  { %v424_v58 = vadd.f32 1e-07, %v3378_v2  ;;  %2384 = vrcp.f32 %v419_v40  ;;  %v3398_v15 = vmul.f32 %v164_v25, %v164_v25  ;;  %v425_v46 = vadd.f32 1e-07, %v3380_v50  ;;  %v35_v25 = vld [vmem:[%s6491_s0 + $0xc0] sm:$0xff] }
  0x3c   :  { %v2369_v53 = vpop.eup %2368  ;;  %v3402_v44 = vadd.f32 1e-07, %v3382_v42  ;;  %2386 = vrcp.f32 %v420_v12  ;;  %v3404_v11 = vmul.f32 %v165_v34, %v165_v34  ;;  %v3407_v29 = vmul.f32 %v166_v49, %v166_v49 }
  0x3d   :  { %v2371_v8 = vpop.eup %2370  ;;  %v556_v61 = vmul.f32 %v2369_v53, %v3171_v16  ;;  %2388 = vrcp.f32 %v421_v20  ;;  %v3409_v45 = vmul.f32 %v167_v41, %v167_v41  ;;  %v3415_v9 = vmul.f32 %v168_v37, %v168_v37  ;;  %v36_v53 = vld [vmem:[%s6491_s0 + $0xc8] sm:$0xff] }
  0x3e   :  { %v2373_v40 = vpop.eup %2372  ;;  %v558_v13 = vmul.f32 %v2371_v8, %v3174_v27  ;;  %2390 = vrcp.f32 %v422_v14  ;;  %v3417_v34 = vmul.f32 %v169_v56, %v169_v56  ;;  %v3425_v12 = vmul.f32 %v170_v62, %v170_v62 }
  0x3f   :  { %v2375_v16 = vpop.eup %2374  ;;  %v560_v49 = vmul.f32 %v2373_v40, %v3236_v60  ;;  %v3423_v41 = vmul.f32 %v556_v61, %v556_v61  ;;  %2392 = vrcp.f32 %v423_v0  ;;  %v3430_v37 = vmul.f32 %v35_v25, %v35_v25 }
  0x40   :  { %v2377_v20 = vpop.eup %2376  ;;  %v562_v27 = vmul.f32 %v2375_v16, %v3260_v54  ;;  %v3428_v14 = vmul.f32 %v558_v13, %v558_v13  ;;  %2394 = vrcp.f32 %v424_v58  ;;  %v3437_v61 = vmul.f32 %v36_v53, %v36_v53 }
  0x41   :  { %6613 = vst [vmem:[#allocation12_spill] sm:$0xff] %v3423_v41  ;;  %v2379_v56 = vpop.eup %2378  ;;  %v564_v8 = vmul.f32 %v2377_v20, %v3268_v55  ;;  %v3433_v3 = vmul.f32 %v560_v49, %v560_v49  ;;  %v1851_v60 = vmul.f32 %v3292_v21, %v3423_v41  ;;  %v1451_v54 = vmul.f32 %v3331_v38, %v3423_v41  ;;  %v37_v55 = vld [vmem:[%s6491_s0 + $0xd0] sm:$0xff]  ;;  %v38_v21 = vld [vmem:[%s6491_s0 + $0xd8] sm:$0xff] }
  0x42   :  { %6614 = vst [vmem:[#allocation13_spill] sm:$0xff] %v3428_v14  ;;  %v2381_v0 = vpop.eup %2380  ;;  %v566_v62 = vmul.f32 %v2379_v56, %v3270_v1  ;;  %v3440_v40 = vmul.f32 %v562_v27, %v562_v27  ;;  %v1852_v13 = vmul.f32 %v3296_v30, %v3428_v14  ;;  %v1452_v30 = vmul.f32 %v3342_v48, %v3428_v14 }
  0x43   :  { %6615 = vst [vmem:[#allocation14_spill] sm:$0xff] %v3433_v3  ;;  %v2383_v58 = vpop.eup %2382  ;;  %v568_v25 = vmul.f32 %v2381_v0, %v3272_v28  ;;  %v3453_v1 = vmul.f32 %v564_v8, %v564_v8  ;;  %v1853_v53 = vmul.f32 %v3301_v47, %v3433_v3  ;;  %v1453_v28 = vmul.f32 %v3344_v35, %v3433_v3  ;;  %v39_v35 = vld [vmem:[%s6491_s0 + $0xe0] sm:$0xff] }
  0x44   :  { %6616 = vst [vmem:[#allocation15_spill] sm:$0xff] %v3440_v40  ;;  %v570_v38 = vmul.f32 %v2383_v58, %v3274_v36  ;;  %v3460_v16 = vmul.f32 %v566_v62, %v566_v62  ;;  %v1854_v49 = vmul.f32 %v3303_v23, %v3440_v40  ;;  %v1981_v20 = vadd.f32 %v1852_v13, %v1851_v60 }
  0x45   :  { %6617 = vst [vmem:[#allocation16_spill] sm:$0xff] %v3453_v1  ;;  %v3464_v27 = vmul.f32 %v568_v25, %v568_v25  ;;  %v1333_v56 = vmul.f32 %v37_v55, %v37_v55  ;;  %v3468_v8 = vmul.f32 %v38_v21, %v38_v21  ;;  %v1855_v48 = vmul.f32 %v3314_v24, %v3453_v1 }
  0x46   :  { %6618 = vst [vmem:[#allocation17_spill] sm:$0xff] %v3460_v16  ;;  %v3470_v47 = vmul.f32 %v570_v38, %v570_v38  ;;  %v1982_v36 = vadd.f32 %v1981_v20, %v1853_v53  ;;  %v1454_v0 = vmul.f32 %v3358_v6, %v3440_v40  ;;  %v1856_v23 = vmul.f32 %v3316_v4, %v3460_v16  ;;  %v40_v4 = vld [vmem:[%s6491_s0 + $0xe8] sm:$0xff] }
  0x47   :  { %6619 = vst [vmem:[#allocation18_spill] sm:$0xff] %v3464_v27  ;;  %v1455_v60 = vmul.f32 %v3360_v31, %v3453_v1  ;;  %v1581_v62 = vadd.f32 %v1452_v30, %v1451_v54  ;;  %2396 = vrcp.f32 %v425_v46  ;;  %v1857_v24 = vmul.f32 %v3327_v52, %v3464_v27 }
  0x48   :  { %6620 = vst [vmem:[#allocation19_spill] sm:$0xff] %v3470_v47  ;;  %v2385_v13 = vpop.eup %2384  ;;  %v1983_v55 = vadd.f32 %v1982_v36, %v1854_v49  ;;  %v1456_v6 = vmul.f32 %v3384_v32, %v3460_v16  ;;  %2398 = vrcp.f32 %v3402_v44  ;;  %v1858_v46 = vmul.f32 %v3329_v51, %v3470_v47  ;;  %v41_v32 = vld [vmem:[%s6491_s0 + $0xf0] sm:$0xff] }
  0x49   :  { %v2387_v31 = vpop.eup %2386  ;;  %v1457_v54 = vmul.f32 %v3389_v33, %v3464_v27  ;;  %v1582_v21 = vadd.f32 %v1581_v62, %v1453_v28  ;;  %v572_v52 = vmul.f32 %v2385_v13, %v3362_v57  ;;  %v1458_v25 = vmul.f32 %v3391_v19, %v3470_v47 }
  0x4a   :  { %v2389_v58 = vpop.eup %2388  ;;  %v1984_v44 = vadd.f32 %v1983_v55, %v1855_v48  ;;  %v574_v53 = vmul.f32 %v2387_v31, %v3370_v59  ;;  %v1335_v30 = vmul.f32 %v39_v35, %v39_v35  ;;  %v1336_v20 = vmul.f32 %v40_v4, %v40_v4 }
  0x4b   :  { %v2391_v38 = vpop.eup %2390  ;;  %v1583_v51 = vadd.f32 %v1582_v21, %v1454_v0  ;;  %v576_v49 = vmul.f32 %v2389_v58, %v3372_v5  ;;  %v3503_v33 = vmul.f32 %v572_v52, %v572_v52  ;;  %v3508_v48 = vmul.f32 %v41_v32, %v41_v32 }
  0x4c   :  { %v2393_v57 = vpop.eup %2392  ;;  %v1985_v28 = vadd.f32 %v1984_v44, %v1856_v23  ;;  %v578_v36 = vmul.f32 %v2391_v38, %v3374_v43  ;;  %v3506_v62 = vmul.f32 %v574_v53, %v574_v53  ;;  %v42_v23 = vld [vmem:[%s6491_s0 + $0xf8] sm:$0xff]  ;;  %v173_v44 = vld [vmem:[%s6490_s1 + $0x110] sm:$0xff]  ;;  %vm2293_vm9 = vcmask 720512  }
  0x4d   :  { %6621 = vst [vmem:[#allocation20_spill] sm:$0xff] %v3503_v33  ;;  %v2395_v13 = vpop.eup %2394  ;;  %v1584_v19 = vadd.f32 %v1583_v51, %v1455_v60  ;;  %v580_v59 = vmul.f32 %v2393_v57, %v3376_v26  ;;  %v3511_v35 = vmul.f32 %v576_v49, %v576_v49  ;;  %v1859_v5 = vmul.f32 %v3394_v7, %v3503_v33  ;;  %v176_v57 = vld [vmem:[%s6490_s1 + $0x128] sm:$0xff] }
  0x4e   :  { %6622 = vst [vmem:[#allocation21_spill] sm:$0xff] %v3506_v62  ;;  %v1986_v0 = vadd.f32 %v1985_v28, %v1857_v24  ;;  %v582_v55 = vmul.f32 %v2395_v13, %v3378_v2  ;;  %v3516_v4 = vmul.f32 %v578_v36, %v578_v36  ;;  %v1860_v43 = vmul.f32 %v3398_v15, %v3506_v62  ;;  %v171_v2 = vld [vmem:[%s6490_s1 + $0x100] sm:$0xff]  ;;  %v3535_v15 = vld [vmem:[%s6490_s1 + $0x108] sm:$0xff] }
  0x4f   :  { %6623 = vst [vmem:[#allocation22_spill] sm:$0xff] %v3511_v35  ;;  %v1585_v60 = vadd.f32 %v1584_v19, %v1456_v6  ;;  %v3523_v31 = vmul.f32 %v580_v59, %v580_v59  ;;  %v1861_v26 = vmul.f32 %v3404_v11, %v3511_v35  ;;  %v1459_v7 = vmul.f32 %v3430_v37, %v3503_v33 }
  0x50   :  { %6624 = vst [vmem:[#allocation23_spill] sm:$0xff] %v3516_v4  ;;  %v1987_v24 = vadd.f32 %v1986_v0, %v1858_v46  ;;  %v3537_v21 = vmul.f32 %v582_v55, %v582_v55  ;;  %v1862_v6 = vmul.f32 %v3407_v29, %v3516_v4  ;;  %v1990_v52 = vadd.f32 %v1860_v43, %v1859_v5  ;;  %v174_v29 = vld [vmem:[%s6490_s1 + $0x118] sm:$0xff] }
  0x51   :  { %6625 = vst [vmem:[#allocation24_spill] sm:$0xff] %v3523_v31  ;;  %v1586_v11 = vadd.f32 %v1585_v60, %v1457_v54  ;;  %v1338_v32 = vmul.f32 %v42_v23, %v42_v23  ;;  %v1460_v37 = vmul.f32 %v3437_v61, %v3506_v62  ;;  %v1461_v58 = vmul.f32 %v1333_v56, %v3511_v35  ;;  %v175_v54 = vld [vmem:[%s6490_s1 + $0x120] sm:$0xff]  ;;  %v178_v0 = vld [vmem:[%s6490_s1 + $0x138] sm:$0xff] }
  0x52   :  { %6626 = vst [vmem:[#allocation25_spill] sm:$0xff] %v3537_v21  ;;  %1988 = vadd.xlane.f32.xlu1 %v1987_v24  ;;  %v1863_v46 = vmul.f32 %v3409_v45, %v3523_v31  ;;  %v1991_v53 = vadd.f32 %v1990_v52, %v1861_v26  ;;  %v3555_v61 = vadd.f32 1.0, %v171_v2  ;;  %v3558_v56 = vadd.f32 1.0, %v3535_v15 }
  0x53   :  { %v1587_v38 = vadd.f32 %v1586_v11, %v1458_v25  ;;  %v1864_v51 = vmul.f32 %v3415_v9, %v3537_v21  ;;  %v1462_v45 = vmul.f32 %v3468_v8, %v3516_v4  ;;  %v1590_v49 = vadd.f32 %v1460_v37, %v1459_v7  ;;  %v177_v25 = vld [vmem:[%s6490_s1 + $0x130] sm:$0xff] }
  0x54   :  { %v2397_v28 = vpop.eup %2396  ;;  %v1992_v36 = vadd.f32 %v1991_v53, %v1862_v6  ;;  %v1463_v13 = vmul.f32 %v1335_v30, %v3523_v31  ;;  %v1464_v19 = vmul.f32 %v1336_v20, %v3537_v21  ;;  %v3572_v59 = vadd.f32 1.0, %v173_v44 }
  0x55   :  { %v2399_v9 = vpop.eup %2398  ;;  %1588 = vadd.xlane.f32.xlu0 %v1587_v38  ;;  %v584_v8 = vmul.f32 %v2397_v28, %v3380_v50  ;;  %v1591_v5 = vadd.f32 %v1590_v49, %v1461_v58  ;;  %v3578_v55 = vadd.f32 1.0, %v174_v29  ;;  %v3580_v30 = vadd.f32 1.0, %v175_v54 }
  0x56   :  { %v586_v20 = vmul.f32 %v2399_v9, %v3382_v42  ;;  %v1993_v43 = vadd.f32 %v1992_v36, %v1863_v46  ;;  %v3583_v23 = vadd.f32 1.0, %v176_v57  ;;  %v427_v60 = vadd.f32 1e-07, %v3555_v61 }
  0x57   :  { %v3586_v26 = vmul.f32 %v584_v8, %v584_v8  ;;  %v1592_v7 = vadd.f32 %v1591_v5, %v1462_v45  ;;  %v3588_v50 = vadd.f32 1.0, %v177_v25  ;;  %v428_v24 = vadd.f32 1e-07, %v3558_v56 }
  0x58   :  { %v3591_v6 = vmul.f32 %v586_v20, %v586_v20  ;;  %v1994_v52 = vadd.f32 %v1993_v43, %v1864_v51  ;;  %v3593_v11 = vadd.f32 1.0, %v178_v0  ;;  %v429_v37 = vadd.f32 1e-07, %v3572_v59 }
  0x59   :  { %6627 = vst [vmem:[#allocation26_spill] sm:$0xff] %v3586_v26  ;;  %v1865_v42 = vmul.f32 %v3417_v34, %v3586_v26  ;;  %v1465_v58 = vmul.f32 %v3508_v48, %v3586_v26  ;;  %v1593_v46 = vadd.f32 %v1592_v7, %v1463_v13  ;;  %v430_v53 = vadd.f32 1e-07, %v3578_v55  ;;  %v179_v7 = vld [vmem:[%s6490_s1 + $0x140] sm:$0xff] }
  0x5a   :  { %6628 = vst [vmem:[#allocation27_spill] sm:$0xff] %v3591_v6  ;;  %v1866_v38 = vmul.f32 %v3425_v12, %v3591_v6  ;;  %v431_v45 = vadd.f32 1e-07, %v3580_v30  ;;  %v432_v51 = vadd.f32 1e-07, %v3583_v23  ;;  %2400 = vrcp.f32 %v427_v60  ;;  %v43_v12 = vld [vmem:[%s6491_s0 + $0x100] sm:$0xff] }
  0x5b   :  { %v1995_v49 = vadd.f32 %v1994_v52, %v1865_v42  ;;  %v1466_v28 = vmul.f32 %v1338_v32, %v3591_v6  ;;  %v1594_v36 = vadd.f32 %v1593_v46, %v1464_v19  ;;  %2402 = vrcp.f32 %v428_v24  ;;  %v44_v32 = vld [vmem:[%s6491_s0 + $0x108] sm:$0xff]  ;;  %v46_v19 = vld [vmem:[%s6491_s0 + $0x118] sm:$0xff]  ;;  %v183_v42 = vld [vmem:[%s6490_s1 + $0x160] sm:$0xff] }
  0x5c   :  { %v433_v34 = vadd.f32 1e-07, %v3588_v50  ;;  %v434_v48 = vadd.f32 1e-07, %v3593_v11  ;;  %2404 = vrcp.f32 %v429_v37  ;;  %v3608_v13 = vmul.f32 %v171_v2, %v171_v2  ;;  %v45_v2 = vld [vmem:[%s6491_s0 + $0x110] sm:$0xff]  ;;  %v180_v24 = vld [vmem:[%s6490_s1 + $0x148] sm:$0xff] }
  0x5d   :  { %v1996_v9 = vadd.f32 %v1995_v49, %v1866_v38  ;;  %v1595_v8 = vadd.f32 %v1594_v36, %v1465_v58  ;;  %2406 = vrcp.f32 %v430_v53  ;;  %v3615_v5 = vmul.f32 %v3535_v15, %v3535_v15  ;;  %v47_v15 = vld [vmem:[%s6491_s0 + $0x120] sm:$0xff]  ;;  %v182_v37 = vld [vmem:[%s6490_s1 + $0x158] sm:$0xff]  ;;  %v185_v53 = vld [vmem:[%s6490_s1 + $0x170] sm:$0xff] }
  0x5e   :  { %2408 = vrcp.f32 %v431_v45  ;;  %v3626_v20 = vmul.f32 %v173_v44, %v173_v44  ;;  %v3628_v43 = vmul.f32 %v174_v29, %v174_v29  ;;  %v3630_v60 = vmul.f32 %v175_v54, %v175_v54  ;;  %v181_v54 = vld [vmem:[%s6490_s1 + $0x150] sm:$0xff]  ;;  %v186_v38 = vld [vmem:[%s6490_s1 + $0x178] sm:$0xff] }
  0x5f   :  { %1997 = vadd.xlane.f32.xlu1 %v1996_v9  ;;  %v1596_v52 = vadd.f32 %v1595_v8, %v1466_v28  ;;  %2410 = vrcp.f32 %v432_v51  ;;  %v3641_v44 = vmul.f32 %v176_v57, %v176_v57  ;;  %v3643_v29 = vmul.f32 %v177_v25, %v177_v25  ;;  %v184_v25 = vld [vmem:[%s6490_s1 + $0x168] sm:$0xff]  ;;  %v49_v28 = vld [vmem:[%s6491_s0 + $0x130] sm:$0xff]  ;;  %v50_v36 = vld [vmem:[%s6491_s0 + $0x138] sm:$0xff] }
  0x60   :  { %2412 = vrcp.f32 %v433_v34  ;;  %v3654_v58 = vmul.f32 %v178_v0, %v178_v0  ;;  %v3656_v46 = vmul.f32 %v43_v12, %v43_v12  ;;  %v3658_v57 = vmul.f32 %v44_v32, %v44_v32  ;;  %v48_v0 = vld [vmem:[%s6491_s0 + $0x128] sm:$0xff] }
  0x61   :  { %1597 = vadd.xlane.f32.xlu0 %v1596_v52  ;;  %2414 = vrcp.f32 %v434_v48  ;;  %v3672_v45 = vmul.f32 %v45_v2, %v45_v2  ;;  %v3674_v51 = vmul.f32 %v46_v19, %v46_v19  ;;  %v3676_v49 = vmul.f32 %v47_v15, %v47_v15 }
  0x62   :  { %v3684_v34 = vadd.f32 1.0, %v179_v7  ;;  %v3686_v48 = vadd.f32 1.0, %v180_v24  ;;  %v3688_v12 = vadd.f32 1.0, %v181_v54  ;;  %v3690_v9 = vadd.f32 1.0, %v182_v37 }
  0x63   :  { %v3692_v8 = vadd.f32 1.0, %v183_v42  ;;  %v3694_v32 = vadd.f32 1.0, %v184_v25  ;;  %v3696_v2 = vadd.f32 1.0, %v185_v53  ;;  %v3698_v19 = vadd.f32 1.0, %v186_v38 }
  0x64   :  { %v3700_v15 = vmul.f32 %v48_v0, %v48_v0  ;;  %v435_v52 = vadd.f32 1e-07, %v3684_v34  ;;  %v436_v47 = vadd.f32 1e-07, %v3686_v48  ;;  %v437_v27 = vadd.f32 1e-07, %v3688_v12 }
  0x65   :  { %v3705_v16 = vmul.f32 %v49_v28, %v49_v28  ;;  %v3707_v1 = vmul.f32 %v50_v36, %v50_v36  ;;  %v438_v40 = vadd.f32 1e-07, %v3690_v9  ;;  %v3710_v6 = vmul.f32 %v179_v7, %v179_v7 }
  0x66   :  { %v439_v3 = vadd.f32 1e-07, %v3692_v8  ;;  %v440_v14 = vadd.f32 1e-07, %v3694_v32  ;;  %2416 = vrcp.f32 %v435_v52  ;;  %v3714_v0 = vmul.f32 %v180_v24, %v180_v24  ;;  %v51_v24 = vld [vmem:[%s6491_s0 + $0x140] sm:$0xff] }
  0x67   :  { %v2401_v41 = vpop.eup %2400  ;;  %v441_v26 = vadd.f32 1e-07, %v3696_v2  ;;  %v3718_v21 = vadd.f32 1e-07, %v3698_v19  ;;  %2418 = vrcp.f32 %v436_v47  ;;  %v3720_v28 = vmul.f32 %v181_v54, %v181_v54 }
  0x68   :  { %v2403_v36 = vpop.eup %2402  ;;  %v588_v7 = vmul.f32 %v2401_v41, %v3555_v61  ;;  %2420 = vrcp.f32 %v437_v27  ;;  %v3723_v31 = vmul.f32 %v182_v37, %v182_v37  ;;  %v3725_v4 = vmul.f32 %v183_v42, %v183_v42  ;;  %v52_v41 = vld [vmem:[%s6491_s0 + $0x148] sm:$0xff] }
  0x69   :  { %v2405_v52 = vpop.eup %2404  ;;  %v590_v35 = vmul.f32 %v2403_v36, %v3558_v56  ;;  %2422 = vrcp.f32 %v438_v40  ;;  %v3731_v62 = vmul.f32 %v184_v25, %v184_v25  ;;  %v3733_v47 = vmul.f32 %v185_v53, %v185_v53 }
  0x6a   :  { %v2407_v27 = vpop.eup %2406  ;;  %v592_v61 = vmul.f32 %v2405_v52, %v3572_v59  ;;  %v3739_v54 = vmul.f32 %v588_v7, %v588_v7  ;;  %2424 = vrcp.f32 %v439_v3  ;;  %v3741_v37 = vmul.f32 %v186_v38, %v186_v38 }
  0x6b   :  { %v2409_v42 = vpop.eup %2408  ;;  %v594_v56 = vmul.f32 %v2407_v27, %v3578_v55  ;;  %v3744_v40 = vmul.f32 %v590_v35, %v590_v35  ;;  %2426 = vrcp.f32 %v440_v14  ;;  %v3746_v25 = vmul.f32 %v51_v24, %v51_v24  ;;  %v53_v55 = vld [vmem:[%s6491_s0 + $0x150] sm:$0xff] }
  0x6c   :  { %6629 = vst [vmem:[#allocation28_spill] sm:$0xff] %v3739_v54  ;;  %v2411_v53 = vpop.eup %2410  ;;  %v596_v36 = vmul.f32 %v2409_v42, %v3580_v30  ;;  %v3749_v33 = vmul.f32 %v592_v61, %v592_v61  ;;  %v1867_v59 = vmul.f32 %v3608_v13, %v3739_v54  ;;  %v3753_v7 = vmul.f32 %v52_v41, %v52_v41  ;;  %v54_v30 = vld [vmem:[%s6491_s0 + $0x158] sm:$0xff] }
  0x6d   :  { %6630 = vst [vmem:[#allocation29_spill] sm:$0xff] %v3744_v40  ;;  %v2413_v3 = vpop.eup %2412  ;;  %v598_v38 = vmul.f32 %v2411_v53, %v3583_v23  ;;  %v3756_v52 = vmul.f32 %v594_v56, %v594_v56  ;;  %v1868_v14 = vmul.f32 %v3615_v5, %v3744_v40  ;;  %v1467_v35 = vmul.f32 %v3656_v46, %v3739_v54 }
  0x6e   :  { %6631 = vst [vmem:[#allocation30_spill] sm:$0xff] %v3749_v33  ;;  %v2415_v13 = vpop.eup %2414  ;;  %v600_v24 = vmul.f32 %v2413_v3, %v3588_v50  ;;  %v3769_v23 = vmul.f32 %v596_v36, %v596_v36  ;;  %v1869_v41 = vmul.f32 %v3626_v20, %v3749_v33  ;;  %v1468_v5 = vmul.f32 %v3658_v57, %v3744_v40 }
  0x6f   :  { %6632 = vst [vmem:[#allocation31_spill] sm:$0xff] %v3756_v52  ;;  %v602_v46 = vmul.f32 %v2415_v13, %v3593_v11  ;;  %v3776_v27 = vmul.f32 %v598_v38, %v598_v38  ;;  %v1870_v61 = vmul.f32 %v3628_v43, %v3756_v52  ;;  %v1999_v42 = vadd.f32 %v1868_v14, %v1867_v59 }
  0x70   :  { %6633 = vst [vmem:[#allocation32_spill] sm:$0xff] %v3769_v23  ;;  %v3780_v56 = vmul.f32 %v600_v24, %v600_v24  ;;  %v1469_v50 = vmul.f32 %v3672_v45, %v3749_v33  ;;  %v1349_v53 = vmul.f32 %v53_v55, %v53_v55  ;;  %v3784_v36 = vmul.f32 %v54_v30, %v54_v30  ;;  %v55_v45 = vld [vmem:[%s6491_s0 + $0x160] sm:$0xff] }
  0x71   :  { %6634 = vst [vmem:[#allocation33_spill] sm:$0xff] %v3776_v27  ;;  %v3786_v20 = vmul.f32 %v602_v46, %v602_v46  ;;  %v1871_v57 = vmul.f32 %v3630_v60, %v3769_v23  ;;  %v2000_v11 = vadd.f32 %v1999_v42, %v1869_v41  ;;  %v1470_v3 = vmul.f32 %v3674_v51, %v3756_v52 }
  0x72   :  { %6635 = vst [vmem:[#allocation34_spill] sm:$0xff] %v3780_v56  ;;  %v1872_v43 = vmul.f32 %v3641_v44, %v3776_v27  ;;  %v1471_v59 = vmul.f32 %v3676_v49, %v3769_v23  ;;  %v1599_v38 = vadd.f32 %v1468_v5, %v1467_v35  ;;  %2428 = vrcp.f32 %v441_v26  ;;  %v56_v44 = vld [vmem:[%s6491_s0 + $0x168] sm:$0xff] }
  0x73   :  { %6636 = vst [vmem:[#allocation35_spill] sm:$0xff] %v3786_v20  ;;  %v2417_v14 = vpop.eup %2416  ;;  %v1873_v60 = vmul.f32 %v3643_v29, %v3780_v56  ;;  %v2001_v55 = vadd.f32 %v2000_v11, %v1870_v61  ;;  %v1472_v51 = vmul.f32 %v3700_v15, %v3776_v27  ;;  %2430 = vrcp.f32 %v3718_v21  ;;  %v57_v15 = vld [vmem:[%s6491_s0 + $0x170] sm:$0xff] }
  0x74   :  { %v2419_v49 = vpop.eup %2418  ;;  %v1874_v26 = vmul.f32 %v3654_v58, %v3786_v20  ;;  %v1473_v35 = vmul.f32 %v3705_v16, %v3780_v56  ;;  %v1600_v30 = vadd.f32 %v1599_v38, %v1469_v50  ;;  %v604_v29 = vmul.f32 %v2417_v14, %v3684_v34 }
  0x75   :  { %v2421_v13 = vpop.eup %2420  ;;  %v2002_v21 = vadd.f32 %v2001_v55, %v1871_v57  ;;  %v1474_v24 = vmul.f32 %v3707_v1, %v3786_v20  ;;  %v606_v41 = vmul.f32 %v2419_v49, %v3686_v48  ;;  %v1351_v5 = vmul.f32 %v55_v45, %v55_v45 }
  0x76   :  { %v2423_v46 = vpop.eup %2422  ;;  %v1601_v58 = vadd.f32 %v1600_v30, %v1470_v3  ;;  %v608_v61 = vmul.f32 %v2421_v13, %v3688_v12  ;;  %v3819_v16 = vmul.f32 %v604_v29, %v604_v29  ;;  %v1352_v42 = vmul.f32 %v56_v44, %v56_v44 }
  0x77   :  { %v2425_v34 = vpop.eup %2424  ;;  %v2003_v50 = vadd.f32 %v2002_v21, %v1872_v43  ;;  %v610_v11 = vmul.f32 %v2423_v46, %v3690_v9  ;;  %v3822_v38 = vmul.f32 %v606_v41, %v606_v41  ;;  %v3824_v57 = vmul.f32 %v57_v15, %v57_v15  ;;  %v58_v43 = vld [vmem:[%s6491_s0 + $0x178] sm:$0xff]  ;;  %v189_v21 = vld [vmem:[%s6490_s1 + $0x190] sm:$0xff] }
  0x78   :  { %6637 = vst [vmem:[#allocation36_spill] sm:$0xff] %v3819_v16  ;;  %v2427_v14 = vpop.eup %2426  ;;  %v1602_v1 = vadd.f32 %v1601_v58, %v1471_v59  ;;  %v612_v48 = vmul.f32 %v2425_v34, %v3692_v8  ;;  %v3827_v45 = vmul.f32 %v608_v61, %v608_v61  ;;  %v1875_v12 = vmul.f32 %v3710_v6, %v3819_v16  ;;  %v192_v34 = vld [vmem:[%s6490_s1 + $0x1a8] sm:$0xff] }
  0x79   :  { %6638 = vst [vmem:[#allocation37_spill] sm:$0xff] %v3822_v38  ;;  %v2004_v3 = vadd.f32 %v2003_v50, %v1873_v60  ;;  %v614_v55 = vmul.f32 %v2427_v14, %v3694_v32  ;;  %v3832_v44 = vmul.f32 %v610_v11, %v610_v11  ;;  %v1876_v9 = vmul.f32 %v3714_v0, %v3822_v38  ;;  %v187_v32 = vld [vmem:[%s6490_s1 + $0x180] sm:$0xff]  ;;  %v3851_v0 = vld [vmem:[%s6490_s1 + $0x188] sm:$0xff] }
  0x7a   :  { %6639 = vst [vmem:[#allocation38_spill] sm:$0xff] %v3827_v45  ;;  %v1603_v59 = vadd.f32 %v1602_v1, %v1472_v51  ;;  %v3839_v49 = vmul.f32 %v612_v48, %v612_v48  ;;  %v1877_v8 = vmul.f32 %v3720_v28, %v3827_v45  ;;  %v1475_v6 = vmul.f32 %v3746_v25, %v3819_v16 }
  0x7b   :  { %6640 = vst [vmem:[#allocation39_spill] sm:$0xff] %v3832_v44  ;;  %v2005_v60 = vadd.f32 %v2004_v3, %v1874_v26  ;;  %v3853_v30 = vmul.f32 %v614_v55, %v614_v55  ;;  %v1878_v51 = vmul.f32 %v3723_v31, %v3832_v44  ;;  %v2008_v29 = vadd.f32 %v1876_v9, %v1875_v12  ;;  %v190_v31 = vld [vmem:[%s6490_s1 + $0x198] sm:$0xff] }
  0x7c   :  { %6641 = vst [vmem:[#allocation40_spill] sm:$0xff] %v3839_v49  ;;  %v1604_v28 = vadd.f32 %v1603_v59, %v1473_v35  ;;  %v1354_v15 = vmul.f32 %v58_v43, %v58_v43  ;;  %v1476_v25 = vmul.f32 %v3753_v7, %v3822_v38  ;;  %v1477_v13 = vmul.f32 %v1349_v53, %v3827_v45  ;;  %v191_v35 = vld [vmem:[%s6490_s1 + $0x1a0] sm:$0xff]  ;;  %v194_v3 = vld [vmem:[%s6490_s1 + $0x1b8] sm:$0xff] }
  0x7d   :  { %6642 = vst [vmem:[#allocation41_spill] sm:$0xff] %v3853_v30  ;;  %2006 = vadd.xlane.f32.xlu1 %v2005_v60  ;;  %v1879_v26 = vmul.f32 %v3725_v4, %v3839_v49  ;;  %v2009_v41 = vadd.f32 %v2008_v29, %v1877_v8  ;;  %v3871_v7 = vadd.f32 1.0, %v187_v32  ;;  %v3874_v53 = vadd.f32 1.0, %v3851_v0 }
  0x7e   :  { %v1605_v46 = vadd.f32 %v1604_v28, %v1474_v24  ;;  %v1880_v58 = vmul.f32 %v3731_v62, %v3853_v30  ;;  %v1478_v4 = vmul.f32 %v3784_v36, %v3832_v44  ;;  %v1608_v61 = vadd.f32 %v1476_v25, %v1475_v6  ;;  %v193_v24 = vld [vmem:[%s6490_s1 + $0x1b0] sm:$0xff] }
  0x7f   :  { %v2429_v50 = vpop.eup %2428  ;;  %v2010_v11 = vadd.f32 %v2009_v41, %v1878_v51  ;;  %v1479_v14 = vmul.f32 %v1351_v5, %v3839_v49  ;;  %v1480_v1 = vmul.f32 %v1352_v42, %v3853_v30  ;;  %v3888_v48 = vadd.f32 1.0, %v189_v21 }
  0x80   :  { %v2431_v62 = vpop.eup %2430  ;;  %1606 = vadd.xlane.f32.xlu0 %v1605_v46  ;;  %v616_v36 = vmul.f32 %v2429_v50, %v3696_v2  ;;  %v1609_v12 = vadd.f32 %v1608_v61, %v1477_v13  ;;  %v3894_v55 = vadd.f32 1.0, %v190_v31  ;;  %v3896_v5 = vadd.f32 1.0, %v191_v35 }
  0x81   :  { %v618_v42 = vmul.f32 %v2431_v62, %v3698_v19  ;;  %v2011_v9 = vadd.f32 %v2010_v11, %v1879_v26  ;;  %v3899_v43 = vadd.f32 1.0, %v192_v34  ;;  %v443_v59 = vadd.f32 1e-07, %v3871_v7 }
  0x82   :  { %v3902_v8 = vmul.f32 %v616_v36, %v616_v36  ;;  %v1610_v6 = vadd.f32 %v1609_v12, %v1478_v4  ;;  %v3904_v2 = vadd.f32 1.0, %v193_v24  ;;  %v444_v60 = vadd.f32 1e-07, %v3874_v53 }
  0x83   :  { %v3907_v51 = vmul.f32 %v618_v42, %v618_v42  ;;  %v2012_v29 = vadd.f32 %v2011_v9, %v1880_v58  ;;  %v3909_v28 = vadd.f32 1.0, %v194_v3  ;;  %v445_v25 = vadd.f32 1e-07, %v3888_v48 }
  0x84   :  { %6643 = vst [vmem:[#allocation42_spill] sm:$0xff] %v3902_v8  ;;  %v1881_v19 = vmul.f32 %v3733_v47, %v3902_v8  ;;  %v1481_v13 = vmul.f32 %v3824_v57, %v3902_v8  ;;  %v1611_v26 = vadd.f32 %v1610_v6, %v1479_v14  ;;  %v446_v41 = vadd.f32 1e-07, %v3894_v55  ;;  %v195_v6 = vld [vmem:[%s6490_s1 + $0x1c0] sm:$0xff] }
  0x85   :  { %6644 = vst [vmem:[#allocation43_spill] sm:$0xff] %v3907_v51  ;;  %v1882_v46 = vmul.f32 %v3741_v37, %v3907_v51  ;;  %v447_v4 = vadd.f32 1e-07, %v3896_v5  ;;  %v448_v58 = vadd.f32 1e-07, %v3899_v43  ;;  %2432 = vrcp.f32 %v443_v59  ;;  %v59_v37 = vld [vmem:[%s6491_s0 + $0x180] sm:$0xff] }
  0x86   :  { %v2013_v61 = vadd.f32 %v2012_v29, %v1881_v19  ;;  %v1482_v50 = vmul.f32 %v1354_v15, %v3907_v51  ;;  %v1612_v11 = vadd.f32 %v1611_v26, %v1480_v1  ;;  %2434 = vrcp.f32 %v444_v60  ;;  %v60_v15 = vld [vmem:[%s6491_s0 + $0x188] sm:$0xff]  ;;  %v62_v1 = vld [vmem:[%s6491_s0 + $0x198] sm:$0xff]  ;;  %v199_v19 = vld [vmem:[%s6490_s1 + $0x1e0] sm:$0xff] }
  0x87   :  { %v449_v47 = vadd.f32 1e-07, %v3904_v2  ;;  %v450_v57 = vadd.f32 1e-07, %v3909_v28  ;;  %2436 = vrcp.f32 %v445_v25  ;;  %v3924_v14 = vmul.f32 %v187_v32, %v187_v32  ;;  %v61_v32 = vld [vmem:[%s6491_s0 + $0x190] sm:$0xff]  ;;  %v196_v60 = vld [vmem:[%s6490_s1 + $0x1c8] sm:$0xff] }
  0x88   :  { %v2014_v62 = vadd.f32 %v2013_v61, %v1882_v46  ;;  %v1613_v36 = vadd.f32 %v1612_v11, %v1481_v13  ;;  %2438 = vrcp.f32 %v446_v41  ;;  %v3931_v12 = vmul.f32 %v3851_v0, %v3851_v0  ;;  %v63_v0 = vld [vmem:[%s6491_s0 + $0x1a0] sm:$0xff]  ;;  %v198_v25 = vld [vmem:[%s6490_s1 + $0x1d8] sm:$0xff]  ;;  %v201_v41 = vld [vmem:[%s6490_s1 + $0x1f0] sm:$0xff] }
  0x89   :  { %2440 = vrcp.f32 %v447_v4  ;;  %v3942_v42 = vmul.f32 %v189_v21, %v189_v21  ;;  %v3944_v9 = vmul.f32 %v190_v31, %v190_v31  ;;  %v3946_v59 = vmul.f32 %v191_v35, %v191_v35  ;;  %v197_v35 = vld [vmem:[%s6490_s1 + $0x1d0] sm:$0xff]  ;;  %v202_v46 = vld [vmem:[%s6490_s1 + $0x1f8] sm:$0xff] }
  0x8a   :  { %2015 = vadd.xlane.f32.xlu1 %v2014_v62  ;;  %v1614_v29 = vadd.f32 %v1613_v36, %v1482_v50  ;;  %2442 = vrcp.f32 %v448_v58  ;;  %v3957_v21 = vmul.f32 %v192_v34, %v192_v34  ;;  %v3959_v31 = vmul.f32 %v193_v24, %v193_v24  ;;  %v200_v24 = vld [vmem:[%s6490_s1 + $0x1e8] sm:$0xff]  ;;  %v65_v50 = vld [vmem:[%s6491_s0 + $0x1b0] sm:$0xff]  ;;  %v66_v11 = vld [vmem:[%s6491_s0 + $0x1b8] sm:$0xff] }
  0x8b   :  { %2444 = vrcp.f32 %v449_v47  ;;  %v3970_v13 = vmul.f32 %v194_v3, %v194_v3  ;;  %v3972_v26 = vmul.f32 %v59_v37, %v59_v37  ;;  %v3974_v34 = vmul.f32 %v60_v15, %v60_v15  ;;  %v64_v3 = vld [vmem:[%s6491_s0 + $0x1a8] sm:$0xff] }
  0x8c   :  { %1615 = vadd.xlane.f32.xlu0 %v1614_v29  ;;  %2446 = vrcp.f32 %v450_v57  ;;  %v3988_v4 = vmul.f32 %v61_v32, %v61_v32  ;;  %v3990_v58 = vmul.f32 %v62_v1, %v62_v1  ;;  %v3992_v61 = vmul.f32 %v63_v0, %v63_v0 }
  0x8d   :  { %v4000_v47 = vadd.f32 1.0, %v195_v6  ;;  %v4002_v57 = vadd.f32 1.0, %v196_v60  ;;  %v4004_v37 = vadd.f32 1.0, %v197_v35  ;;  %v4006_v62 = vadd.f32 1.0, %v198_v25 }
  0x8e   :  { %v4008_v36 = vadd.f32 1.0, %v199_v19  ;;  %v4010_v15 = vadd.f32 1.0, %v200_v24  ;;  %v4012_v32 = vadd.f32 1.0, %v201_v41  ;;  %v4014_v1 = vadd.f32 1.0, %v202_v46 }
  0x8f   :  { %v4016_v0 = vmul.f32 %v64_v3, %v64_v3  ;;  %v451_v29 = vadd.f32 1e-07, %v4000_v47  ;;  %v452_v20 = vadd.f32 1e-07, %v4002_v57  ;;  %v453_v56 = vadd.f32 1e-07, %v4004_v37 }
  0x90   :  { %v4021_v27 = vmul.f32 %v65_v50, %v65_v50  ;;  %v4023_v23 = vmul.f32 %v66_v11, %v66_v11  ;;  %v454_v52 = vadd.f32 1e-07, %v4006_v62  ;;  %v4026_v51 = vmul.f32 %v195_v6, %v195_v6 }
  0x91   :  { %v455_v33 = vadd.f32 1e-07, %v4008_v36  ;;  %v456_v40 = vadd.f32 1e-07, %v4010_v15  ;;  %2448 = vrcp.f32 %v451_v29  ;;  %v4030_v3 = vmul.f32 %v196_v60, %v196_v60  ;;  %v67_v60 = vld [vmem:[%s6491_s0 + $0x1c0] sm:$0xff] }
  0x92   :  { %v2433_v54 = vpop.eup %2432  ;;  %v457_v8 = vadd.f32 1e-07, %v4012_v32  ;;  %v4034_v30 = vadd.f32 1e-07, %v4014_v1  ;;  %2450 = vrcp.f32 %v452_v20  ;;  %v4036_v50 = vmul.f32 %v197_v35, %v197_v35 }
  0x93   :  { %v2435_v11 = vpop.eup %2434  ;;  %v620_v6 = vmul.f32 %v2433_v54, %v3871_v7  ;;  %2452 = vrcp.f32 %v453_v56  ;;  %v4039_v49 = vmul.f32 %v198_v25, %v198_v25  ;;  %v4041_v44 = vmul.f32 %v199_v19, %v199_v19  ;;  %v68_v54 = vld [vmem:[%s6491_s0 + $0x1c8] sm:$0xff] }
  0x94   :  { %v2437_v29 = vpop.eup %2436  ;;  %v622_v45 = vmul.f32 %v2435_v11, %v3874_v53  ;;  %2454 = vrcp.f32 %v454_v52  ;;  %v4047_v38 = vmul.f32 %v200_v24, %v200_v24  ;;  %v4049_v20 = vmul.f32 %v201_v41, %v201_v41 }
  0x95   :  { %v2439_v56 = vpop.eup %2438  ;;  %v624_v7 = vmul.f32 %v2437_v29, %v3888_v48  ;;  %v4055_v35 = vmul.f32 %v620_v6, %v620_v6  ;;  %2456 = vrcp.f32 %v455_v33  ;;  %v4057_v25 = vmul.f32 %v202_v46, %v202_v46 }
  0x96   :  { %v2441_v19 = vpop.eup %2440  ;;  %v626_v53 = vmul.f32 %v2439_v56, %v3894_v55  ;;  %v4060_v52 = vmul.f32 %v622_v45, %v622_v45  ;;  %2458 = vrcp.f32 %v456_v40  ;;  %v4062_v24 = vmul.f32 %v67_v60, %v67_v60  ;;  %v69_v55 = vld [vmem:[%s6491_s0 + $0x1d0] sm:$0xff] }
  0x97   :  { %6645 = vst [vmem:[#allocation44_spill] sm:$0xff] %v4055_v35  ;;  %v2443_v41 = vpop.eup %2442  ;;  %v628_v11 = vmul.f32 %v2441_v19, %v3896_v5  ;;  %v4065_v16 = vmul.f32 %v624_v7, %v624_v7  ;;  %v1883_v48 = vmul.f32 %v3924_v14, %v4055_v35  ;;  %v4069_v6 = vmul.f32 %v68_v54, %v68_v54  ;;  %v70_v5 = vld [vmem:[%s6491_s0 + $0x1d8] sm:$0xff] }
  0x98   :  { %6646 = vst [vmem:[#allocation45_spill] sm:$0xff] %v4060_v52  ;;  %v2445_v33 = vpop.eup %2444  ;;  %v630_v46 = vmul.f32 %v2443_v41, %v3899_v43  ;;  %v4072_v29 = vmul.f32 %v626_v53, %v626_v53  ;;  %v1884_v40 = vmul.f32 %v3931_v12, %v4060_v52  ;;  %v1483_v45 = vmul.f32 %v3972_v26, %v4055_v35 }
  0x99   :  { %6647 = vst [vmem:[#allocation46_spill] sm:$0xff] %v4065_v16  ;;  %v2447_v14 = vpop.eup %2446  ;;  %v632_v60 = vmul.f32 %v2445_v33, %v3904_v2  ;;  %v4085_v43 = vmul.f32 %v628_v11, %v628_v11  ;;  %v1885_v54 = vmul.f32 %v3942_v42, %v4065_v16  ;;  %v1484_v12 = vmul.f32 %v3974_v34, %v4060_v52 }
  0x9a   :  { %6648 = vst [vmem:[#allocation47_spill] sm:$0xff] %v4072_v29  ;;  %v634_v26 = vmul.f32 %v2447_v14, %v3909_v28  ;;  %v4092_v56 = vmul.f32 %v630_v46, %v630_v46  ;;  %v1886_v7 = vmul.f32 %v3944_v9, %v4072_v29  ;;  %v2017_v19 = vadd.f32 %v1884_v40, %v1883_v48 }
  0x9b   :  { %6649 = vst [vmem:[#allocation48_spill] sm:$0xff] %v4085_v43  ;;  %v4096_v53 = vmul.f32 %v632_v60, %v632_v60  ;;  %v1485_v2 = vmul.f32 %v3988_v4, %v4065_v16  ;;  %v1365_v41 = vmul.f32 %v69_v55, %v69_v55  ;;  %v4100_v11 = vmul.f32 %v70_v5, %v70_v5  ;;  %v71_v4 = vld [vmem:[%s6491_s0 + $0x1e0] sm:$0xff] }
  0x9c   :  { %6650 = vst [vmem:[#allocation49_spill] sm:$0xff] %v4092_v56  ;;  %v4102_v42 = vmul.f32 %v634_v26, %v634_v26  ;;  %v1887_v34 = vmul.f32 %v3946_v59, %v4085_v43  ;;  %v2018_v28 = vadd.f32 %v2017_v19, %v1885_v54  ;;  %v1486_v33 = vmul.f32 %v3990_v58, %v4072_v29 }
  0x9d   :  { %6651 = vst [vmem:[#allocation50_spill] sm:$0xff] %v4096_v53  ;;  %v1888_v9 = vmul.f32 %v3957_v21, %v4092_v56  ;;  %v1487_v48 = vmul.f32 %v3992_v61, %v4085_v43  ;;  %v1617_v46 = vadd.f32 %v1484_v12, %v1483_v45  ;;  %2460 = vrcp.f32 %v457_v8  ;;  %v72_v21 = vld [vmem:[%s6491_s0 + $0x1e8] sm:$0xff] }
  0x9e   :  { %6652 = vst [vmem:[#allocation51_spill] sm:$0xff] %v4102_v42  ;;  %v2449_v40 = vpop.eup %2448  ;;  %v1889_v59 = vmul.f32 %v3959_v31, %v4096_v53  ;;  %v2019_v55 = vadd.f32 %v2018_v28, %v1886_v7  ;;  %v1488_v58 = vmul.f32 %v4016_v0, %v4092_v56  ;;  %2462 = vrcp.f32 %v4034_v30  ;;  %v73_v0 = vld [vmem:[%s6491_s0 + $0x1f0] sm:$0xff] }
  0x9f   :  { %v2451_v61 = vpop.eup %2450  ;;  %v1890_v8 = vmul.f32 %v3970_v13, %v4102_v42  ;;  %v1489_v45 = vmul.f32 %v4021_v27, %v4096_v53  ;;  %v1618_v5 = vadd.f32 %v1617_v46, %v1485_v2  ;;  %v636_v31 = vmul.f32 %v2449_v40, %v4000_v47 }
  0xa0   :  { %v2453_v14 = vpop.eup %2452  ;;  %v2020_v30 = vadd.f32 %v2019_v55, %v1887_v34  ;;  %v1490_v60 = vmul.f32 %v4023_v23, %v4102_v42  ;;  %v638_v54 = vmul.f32 %v2451_v61, %v4002_v57  ;;  %v1367_v12 = vmul.f32 %v71_v4, %v71_v4 }
  0xa1   :  { %v2455_v26 = vpop.eup %2454  ;;  %v1619_v13 = vadd.f32 %v1618_v5, %v1486_v33  ;;  %v640_v7 = vmul.f32 %v2453_v14, %v4004_v37  ;;  %v4135_v27 = vmul.f32 %v636_v31, %v636_v31  ;;  %v1368_v19 = vmul.f32 %v72_v21, %v72_v21 }
  0xa2   :  { %v2457_v47 = vpop.eup %2456  ;;  %v2021_v2 = vadd.f32 %v2020_v30, %v1888_v9  ;;  %v642_v28 = vmul.f32 %v2455_v26, %v4006_v62  ;;  %v4138_v46 = vmul.f32 %v638_v54, %v638_v54  ;;  %v4140_v34 = vmul.f32 %v73_v0, %v73_v0  ;;  %v74_v9 = vld [vmem:[%s6491_s0 + $0x1f8] sm:$0xff]  ;;  %v205_v30 = vld [vmem:[%s6490_s1 + $0x210] sm:$0xff] }
  0xa3   :  { %6653 = vst [vmem:[#allocation52_spill] sm:$0xff] %v4135_v27  ;;  %v2459_v40 = vpop.eup %2458  ;;  %v1620_v23 = vadd.f32 %v1619_v13, %v1487_v48  ;;  %v644_v57 = vmul.f32 %v2457_v47, %v4008_v36  ;;  %v4143_v4 = vmul.f32 %v640_v7, %v640_v7  ;;  %v1891_v37 = vmul.f32 %v4026_v51, %v4135_v27  ;;  %v208_v47 = vld [vmem:[%s6490_s1 + $0x228] sm:$0xff] }
  0xa4   :  { %6654 = vst [vmem:[#allocation53_spill] sm:$0xff] %v4138_v46  ;;  %v2022_v33 = vadd.f32 %v2021_v2, %v1889_v59  ;;  %v646_v55 = vmul.f32 %v2459_v40, %v4010_v15  ;;  %v4148_v21 = vmul.f32 %v642_v28, %v642_v28  ;;  %v1892_v62 = vmul.f32 %v4030_v3, %v4138_v46  ;;  %v203_v15 = vld [vmem:[%s6490_s1 + $0x200] sm:$0xff]  ;;  %v4167_v3 = vld [vmem:[%s6490_s1 + $0x208] sm:$0xff] }
  0xa5   :  { %6655 = vst [vmem:[#allocation54_spill] sm:$0xff] %v4143_v4  ;;  %v1621_v48 = vadd.f32 %v1620_v23, %v1488_v58  ;;  %v4155_v61 = vmul.f32 %v644_v57, %v644_v57  ;;  %v1893_v36 = vmul.f32 %v4036_v50, %v4143_v4  ;;  %v1491_v51 = vmul.f32 %v4062_v24, %v4135_v27 }
  0xa6   :  { %6656 = vst [vmem:[#allocation55_spill] sm:$0xff] %v4148_v21  ;;  %v2023_v59 = vadd.f32 %v2022_v33, %v1890_v8  ;;  %v4169_v5 = vmul.f32 %v646_v55, %v646_v55  ;;  %v1894_v58 = vmul.f32 %v4039_v49, %v4148_v21  ;;  %v2026_v31 = vadd.f32 %v1892_v62, %v1891_v37  ;;  %v206_v49 = vld [vmem:[%s6490_s1 + $0x218] sm:$0xff] }
  0xa7   :  { %6657 = vst [vmem:[#allocation56_spill] sm:$0xff] %v4155_v61  ;;  %v1622_v50 = vadd.f32 %v1621_v48, %v1489_v45  ;;  %v1370_v0 = vmul.f32 %v74_v9, %v74_v9  ;;  %v1492_v24 = vmul.f32 %v4069_v6, %v4138_v46  ;;  %v1493_v14 = vmul.f32 %v1365_v41, %v4143_v4  ;;  %v207_v45 = vld [vmem:[%s6490_s1 + $0x220] sm:$0xff]  ;;  %v210_v33 = vld [vmem:[%s6490_s1 + $0x238] sm:$0xff] }
  0xa8   :  { %6658 = vst [vmem:[#allocation57_spill] sm:$0xff] %v4169_v5  ;;  %2024 = vadd.xlane.f32.xlu1 %v2023_v59  ;;  %v1895_v8 = vmul.f32 %v4041_v44, %v4155_v61  ;;  %v2027_v54 = vadd.f32 %v2026_v31, %v1893_v36  ;;  %v4187_v6 = vadd.f32 1.0, %v203_v15  ;;  %v4190_v41 = vadd.f32 1.0, %v4167_v3 }
  0xa9   :  { %v1623_v26 = vadd.f32 %v1622_v50, %v1490_v60  ;;  %v1896_v13 = vmul.f32 %v4047_v38, %v4169_v5  ;;  %v1494_v44 = vmul.f32 %v4100_v11, %v4148_v21  ;;  %v1626_v7 = vadd.f32 %v1492_v24, %v1491_v51  ;;  %v209_v60 = vld [vmem:[%s6490_s1 + $0x230] sm:$0xff] }
  0xaa   :  { %v2461_v2 = vpop.eup %2460  ;;  %v2028_v28 = vadd.f32 %v2027_v54, %v1894_v58  ;;  %v1495_v40 = vmul.f32 %v1367_v12, %v4155_v61  ;;  %v1496_v23 = vmul.f32 %v1368_v19, %v4169_v5  ;;  %v4204_v57 = vadd.f32 1.0, %v205_v30 }
  0xab   :  { %v2463_v38 = vpop.eup %2462  ;;  %1624 = vadd.xlane.f32.xlu0 %v1623_v26  ;;  %v648_v11 = vmul.f32 %v2461_v2, %v4012_v32  ;;  %v1627_v37 = vadd.f32 %v1626_v7, %v1493_v14  ;;  %v4210_v55 = vadd.f32 1.0, %v206_v49  ;;  %v4212_v12 = vadd.f32 1.0, %v207_v45 }
  0xac   :  { %v650_v19 = vmul.f32 %v2463_v38, %v4014_v1  ;;  %v2029_v62 = vadd.f32 %v2028_v28, %v1895_v8  ;;  %v4215_v9 = vadd.f32 1.0, %v208_v47  ;;  %v459_v48 = vadd.f32 1e-07, %v4187_v6 }
  0xad   :  { %v4218_v36 = vmul.f32 %v648_v11, %v648_v11  ;;  %v1628_v51 = vadd.f32 %v1627_v37, %v1494_v44  ;;  %v4220_v32 = vadd.f32 1.0, %v209_v60  ;;  %v460_v59 = vadd.f32 1e-07, %v4190_v41  ;;  %v212_v37 = vld [vmem:[%s6490_s1 + $0x248] sm:$0xff] }
  0xae   :  { %v4223_v58 = vmul.f32 %v650_v19, %v650_v19  ;;  %v2030_v31 = vadd.f32 %v2029_v62, %v1896_v13  ;;  %v4225_v50 = vadd.f32 1.0, %v210_v33  ;;  %v461_v24 = vadd.f32 1e-07, %v4204_v57 }
  0xaf   :  { %6659 = vst [vmem:[#allocation58_spill] sm:$0xff] %v4218_v36  ;;  %v1897_v1 = vmul.f32 %v4049_v20, %v4218_v36  ;;  %v1497_v14 = vmul.f32 %v4140_v34, %v4218_v36  ;;  %v1629_v8 = vadd.f32 %v1628_v51, %v1495_v40  ;;  %v462_v54 = vadd.f32 1e-07, %v4210_v55  ;;  %v78_v51 = vld [vmem:[%s6491_s0 + $0x218] sm:$0xff] }
  0xb0   :  { %6660 = vst [vmem:[#allocation59_spill] sm:$0xff] %v4223_v58  ;;  %v1898_v26 = vmul.f32 %v4057_v25, %v4223_v58  ;;  %v463_v44 = vadd.f32 1e-07, %v4212_v12  ;;  %v464_v13 = vadd.f32 1e-07, %v4215_v9  ;;  %2464 = vrcp.f32 %v459_v48  ;;  %v77_v48 = vld [vmem:[%s6491_s0 + $0x210] sm:$0xff] }
  0xb1   :  { %v2031_v7 = vadd.f32 %v2030_v31, %v1897_v1  ;;  %v1498_v2 = vmul.f32 %v1370_v0, %v4223_v58  ;;  %v1630_v28 = vadd.f32 %v1629_v8, %v1496_v23  ;;  %2466 = vrcp.f32 %v460_v59  ;;  %v75_v0 = vld [vmem:[%s6491_s0 + $0x200] sm:$0xff]  ;;  %v76_v23 = vld [vmem:[%s6491_s0 + $0x208] sm:$0xff] }
  0xb2   :  { %v465_v20 = vadd.f32 1e-07, %v4220_v32  ;;  %v466_v34 = vadd.f32 1e-07, %v4225_v50  ;;  %2468 = vrcp.f32 %v461_v24  ;;  %v4240_v40 = vmul.f32 %v203_v15, %v203_v15  ;;  %v211_v15 = vld [vmem:[%s6490_s1 + $0x240] sm:$0xff]  ;;  %v214_v24 = vld [vmem:[%s6490_s1 + $0x258] sm:$0xff] }
  0xb3   :  { %v2032_v38 = vadd.f32 %v2031_v7, %v1898_v26  ;;  %v1631_v11 = vadd.f32 %v1630_v28, %v1497_v14  ;;  %2470 = vrcp.f32 %v462_v54  ;;  %v4244_v25 = vmul.f32 %v4167_v3, %v4167_v3  ;;  %v79_v59 = vld [vmem:[%s6491_s0 + $0x220] sm:$0xff]  ;;  %v217_v54 = vld [vmem:[%s6490_s1 + $0x270] sm:$0xff]  ;;  %v218_v26 = vld [vmem:[%s6490_s1 + $0x278] sm:$0xff] }
  0xb4   :  { %2472 = vrcp.f32 %v463_v44  ;;  %v4258_v19 = vmul.f32 %v205_v30, %v205_v30  ;;  %v4260_v3 = vmul.f32 %v206_v49, %v206_v49  ;;  %v4262_v62 = vmul.f32 %v207_v45, %v207_v45  ;;  %v213_v45 = vld [vmem:[%s6490_s1 + $0x250] sm:$0xff]  ;;  %v215_v1 = vld [vmem:[%s6490_s1 + $0x260] sm:$0xff]  ;;  %v82_v28 = vld [vmem:[%s6491_s0 + $0x238] sm:$0xff] }
  0xb5   :  { %2033 = vadd.xlane.f32.xlu1 %v2032_v38  ;;  %v1632_v31 = vadd.f32 %v1631_v11, %v1498_v2  ;;  %2474 = vrcp.f32 %v464_v13  ;;  %v4273_v30 = vmul.f32 %v208_v47, %v208_v47  ;;  %v4275_v49 = vmul.f32 %v209_v60, %v209_v60  ;;  %v216_v60 = vld [vmem:[%s6490_s1 + $0x268] sm:$0xff]  ;;  %v81_v2 = vld [vmem:[%s6491_s0 + $0x230] sm:$0xff] }
  0xb6   :  { %2476 = vrcp.f32 %v465_v20  ;;  %v4286_v14 = vmul.f32 %v210_v33, %v210_v33  ;;  %v4288_v8 = vmul.f32 %v75_v0, %v75_v0  ;;  %v4290_v47 = vmul.f32 %v76_v23, %v76_v23  ;;  %v80_v33 = vld [vmem:[%s6491_s0 + $0x228] sm:$0xff] }
  0xb7   :  { %1633 = vadd.xlane.f32.xlu0 %v1632_v31  ;;  %2478 = vrcp.f32 %v466_v34  ;;  %v4304_v44 = vmul.f32 %v77_v48, %v77_v48  ;;  %v4306_v13 = vmul.f32 %v78_v51, %v78_v51  ;;  %v4308_v7 = vmul.f32 %v79_v59, %v79_v59 }
  0xb8   :  { %v4316_v20 = vadd.f32 1.0, %v211_v15  ;;  %v4318_v34 = vadd.f32 1.0, %v212_v37  ;;  %v4320_v38 = vadd.f32 1.0, %v213_v45  ;;  %v4322_v11 = vadd.f32 1.0, %v214_v24 }
  0xb9   :  { %v4324_v0 = vadd.f32 1.0, %v215_v1  ;;  %v4326_v23 = vadd.f32 1.0, %v216_v60  ;;  %v4328_v48 = vadd.f32 1.0, %v217_v54  ;;  %v4330_v51 = vadd.f32 1.0, %v218_v26 }
  0xba   :  { %v4332_v59 = vmul.f32 %v80_v33, %v80_v33  ;;  %v467_v31 = vadd.f32 1e-07, %v4316_v20  ;;  %v468_v42 = vadd.f32 1e-07, %v4318_v34  ;;  %v469_v53 = vadd.f32 1e-07, %v4320_v38 }
  0xbb   :  { %v4337_v56 = vmul.f32 %v81_v2, %v81_v2  ;;  %v4339_v43 = vmul.f32 %v82_v28, %v82_v28  ;;  %v470_v29 = vadd.f32 1e-07, %v4322_v11  ;;  %v4342_v58 = vmul.f32 %v211_v15, %v211_v15 }
  0xbc   :  { %v471_v36 = vadd.f32 1e-07, %v4324_v0  ;;  %v472_v16 = vadd.f32 1e-07, %v4326_v23  ;;  %2480 = vrcp.f32 %v467_v31  ;;  %v4346_v33 = vmul.f32 %v212_v37, %v212_v37  ;;  %v83_v37 = vld [vmem:[%s6491_s0 + $0x240] sm:$0xff] }
  0xbd   :  { %v2465_v52 = vpop.eup %2464  ;;  %v473_v35 = vadd.f32 1e-07, %v4328_v48  ;;  %v4350_v5 = vadd.f32 1e-07, %v4330_v51  ;;  %2482 = vrcp.f32 %v468_v42  ;;  %v4352_v2 = vmul.f32 %v213_v45, %v213_v45 }
  0xbe   :  { %v2467_v28 = vpop.eup %2466  ;;  %v652_v15 = vmul.f32 %v2465_v52, %v4187_v6  ;;  %2484 = vrcp.f32 %v469_v53  ;;  %v4355_v61 = vmul.f32 %v214_v24, %v214_v24  ;;  %v4357_v21 = vmul.f32 %v215_v1, %v215_v1  ;;  %v84_v52 = vld [vmem:[%s6491_s0 + $0x248] sm:$0xff] }
  0xbf   :  { %v2469_v31 = vpop.eup %2468  ;;  %v654_v4 = vmul.f32 %v2467_v28, %v4190_v41  ;;  %2486 = vrcp.f32 %v470_v29  ;;  %v4363_v46 = vmul.f32 %v216_v60, %v216_v60  ;;  %v4365_v42 = vmul.f32 %v217_v54, %v217_v54 }
  0xc0   :  { %v2471_v53 = vpop.eup %2470  ;;  %v656_v6 = vmul.f32 %v2469_v31, %v4204_v57  ;;  %v4371_v45 = vmul.f32 %v652_v15, %v652_v15  ;;  %2488 = vrcp.f32 %v471_v36  ;;  %v4373_v24 = vmul.f32 %v218_v26, %v218_v26 }
  0xc1   :  { %v2473_v1 = vpop.eup %2472  ;;  %v658_v41 = vmul.f32 %v2471_v53, %v4210_v55  ;;  %v4376_v29 = vmul.f32 %v654_v4, %v654_v4  ;;  %2490 = vrcp.f32 %v472_v16  ;;  %v4378_v60 = vmul.f32 %v83_v37, %v83_v37  ;;  %v85_v55 = vld [vmem:[%s6491_s0 + $0x250] sm:$0xff] }
  0xc2   :  { %6661 = vst [vmem:[#allocation60_spill] sm:$0xff] %v4371_v45  ;;  %v2475_v54 = vpop.eup %2474  ;;  %v660_v28 = vmul.f32 %v2473_v1, %v4212_v12  ;;  %v4381_v27 = vmul.f32 %v656_v6, %v656_v6  ;;  %v1899_v57 = vmul.f32 %v4240_v40, %v4371_v45  ;;  %v4385_v15 = vmul.f32 %v84_v52, %v84_v52  ;;  %v86_v12 = vld [vmem:[%s6491_s0 + $0x258] sm:$0xff] }
  0xc3   :  { %6662 = vst [vmem:[#allocation61_spill] sm:$0xff] %v4376_v29  ;;  %v2477_v36 = vpop.eup %2476  ;;  %v662_v26 = vmul.f32 %v2475_v54, %v4215_v9  ;;  %v4388_v31 = vmul.f32 %v658_v41, %v658_v41  ;;  %v1900_v16 = vmul.f32 %v4244_v25, %v4376_v29  ;;  %v1499_v4 = vmul.f32 %v4288_v8, %v4371_v45 }
  0xc4   :  { %6663 = vst [vmem:[#allocation62_spill] sm:$0xff] %v4381_v27  ;;  %v2479_v40 = vpop.eup %2478  ;;  %v664_v37 = vmul.f32 %v2477_v36, %v4220_v32  ;;  %v4401_v9 = vmul.f32 %v660_v28, %v660_v28  ;;  %v1901_v52 = vmul.f32 %v4258_v19, %v4381_v27  ;;  %v1500_v25 = vmul.f32 %v4290_v47, %v4376_v29 }
  0xc5   :  { %6664 = vst [vmem:[#allocation63_spill] sm:$0xff] %v4388_v31  ;;  %v666_v8 = vmul.f32 %v2479_v40, %v4225_v50  ;;  %v4408_v53 = vmul.f32 %v662_v26, %v662_v26  ;;  %v1902_v6 = vmul.f32 %v4260_v3, %v4388_v31  ;;  %v2035_v1 = vadd.f32 %v1900_v16, %v1899_v57 }
  0xc6   :  { %6665 = vst [vmem:[#allocation64_spill] sm:$0xff] %v4401_v9  ;;  %v4412_v41 = vmul.f32 %v664_v37, %v664_v37  ;;  %v1501_v32 = vmul.f32 %v4304_v44, %v4381_v27  ;;  %v1381_v54 = vmul.f32 %v85_v55, %v85_v55  ;;  %v4416_v28 = vmul.f32 %v86_v12, %v86_v12  ;;  %v87_v44 = vld [vmem:[%s6491_s0 + $0x260] sm:$0xff] }
  0xc7   :  { %6666 = vst [vmem:[#allocation65_spill] sm:$0xff] %v4408_v53  ;;  %v4418_v19 = vmul.f32 %v666_v8, %v666_v8  ;;  %v1903_v47 = vmul.f32 %v4262_v62, %v4401_v9  ;;  %v2036_v50 = vadd.f32 %v2035_v1, %v1901_v52  ;;  %v1502_v36 = vmul.f32 %v4306_v13, %v4388_v31 }
  0xc8   :  { %6667 = vst [vmem:[#allocation66_spill] sm:$0xff] %v4412_v41  ;;  %v1904_v3 = vmul.f32 %v4273_v30, %v4408_v53  ;;  %v1503_v57 = vmul.f32 %v4308_v7, %v4401_v9  ;;  %v1635_v26 = vadd.f32 %v1500_v25, %v1499_v4  ;;  %2492 = vrcp.f32 %v473_v35  ;;  %v88_v30 = vld [vmem:[%s6491_s0 + $0x268] sm:$0xff] }
  0xc9   :  { %6668 = vst [vmem:[#allocation67_spill] sm:$0xff] %v4418_v19  ;;  %v2481_v16 = vpop.eup %2480  ;;  %v1905_v62 = vmul.f32 %v4275_v49, %v4412_v41  ;;  %v2037_v55 = vadd.f32 %v2036_v50, %v1902_v6  ;;  %v1504_v13 = vmul.f32 %v4332_v59, %v4408_v53  ;;  %2494 = vrcp.f32 %v4350_v5  ;;  %v89_v59 = vld [vmem:[%s6491_s0 + $0x270] sm:$0xff] }
  0xca   :  { %v2483_v7 = vpop.eup %2482  ;;  %v1906_v35 = vmul.f32 %v4286_v14, %v4418_v19  ;;  %v1505_v4 = vmul.f32 %v4337_v56, %v4412_v41  ;;  %v1636_v12 = vadd.f32 %v1635_v26, %v1501_v32  ;;  %v668_v49 = vmul.f32 %v2481_v16, %v4316_v20 }
  0xcb   :  { %v2485_v40 = vpop.eup %2484  ;;  %v2038_v5 = vadd.f32 %v2037_v55, %v1903_v47  ;;  %v1506_v37 = vmul.f32 %v4339_v43, %v4418_v19  ;;  %v670_v52 = vmul.f32 %v2483_v7, %v4318_v34  ;;  %v1383_v25 = vmul.f32 %v87_v44, %v87_v44 }
  0xcc   :  { %v2487_v8 = vpop.eup %2486  ;;  %v1637_v14 = vadd.f32 %v1636_v12, %v1502_v36  ;;  %v672_v6 = vmul.f32 %v2485_v40, %v4320_v38  ;;  %v4451_v56 = vmul.f32 %v668_v49, %v668_v49  ;;  %v1384_v1 = vmul.f32 %v88_v30, %v88_v30 }
  0xcd   :  { %v2489_v20 = vpop.eup %2488  ;;  %v2039_v32 = vadd.f32 %v2038_v5, %v1904_v3  ;;  %v674_v50 = vmul.f32 %v2487_v8, %v4322_v11  ;;  %v4454_v26 = vmul.f32 %v670_v52, %v670_v52  ;;  %v4456_v47 = vmul.f32 %v89_v59, %v89_v59  ;;  %v90_v3 = vld [vmem:[%s6491_s0 + $0x278] sm:$0xff]  ;;  %v221_v5 = vld [vmem:[%s6490_s1 + $0x290] sm:$0xff] }
  0xce   :  { %6669 = vst [vmem:[#allocation68_spill] sm:$0xff] %v4451_v56  ;;  %v2491_v16 = vpop.eup %2490  ;;  %v1638_v43 = vadd.f32 %v1637_v14, %v1503_v57  ;;  %v676_v34 = vmul.f32 %v2489_v20, %v4324_v0  ;;  %v4459_v44 = vmul.f32 %v672_v6, %v672_v6  ;;  %v1907_v38 = vmul.f32 %v4342_v58, %v4451_v56  ;;  %v224_v20 = vld [vmem:[%s6490_s1 + $0x2a8] sm:$0xff] }
  0xcf   :  { %6670 = vst [vmem:[#allocation69_spill] sm:$0xff] %v4454_v26  ;;  %v2040_v36 = vadd.f32 %v2039_v32, %v1905_v62  ;;  %v678_v55 = vmul.f32 %v2491_v16, %v4326_v23  ;;  %v4464_v30 = vmul.f32 %v674_v50, %v674_v50  ;;  %v1908_v11 = vmul.f32 %v4346_v33, %v4454_v26  ;;  %v219_v23 = vld [vmem:[%s6490_s1 + $0x280] sm:$0xff]  ;;  %v4483_v33 = vld [vmem:[%s6490_s1 + $0x288] sm:$0xff] }
  0xd0   :  { %6671 = vst [vmem:[#allocation70_spill] sm:$0xff] %v4459_v44  ;;  %v1639_v57 = vadd.f32 %v1638_v43, %v1504_v13  ;;  %v4471_v7 = vmul.f32 %v676_v34, %v676_v34  ;;  %v1909_v0 = vmul.f32 %v4352_v2, %v4459_v44  ;;  %v1507_v58 = vmul.f32 %v4378_v60, %v4451_v56 }
  0xd1   :  { %6672 = vst [vmem:[#allocation71_spill] sm:$0xff] %v4464_v30  ;;  %v2041_v62 = vadd.f32 %v2040_v36, %v1906_v35  ;;  %v4485_v12 = vmul.f32 %v678_v55, %v678_v55  ;;  %v1910_v13 = vmul.f32 %v4355_v61, %v4464_v30  ;;  %v2044_v49 = vadd.f32 %v1908_v11, %v1907_v38  ;;  %v222_v61 = vld [vmem:[%s6490_s1 + $0x298] sm:$0xff] }
  0xd2   :  { %6673 = vst [vmem:[#allocation72_spill] sm:$0xff] %v4471_v7  ;;  %v1640_v2 = vadd.f32 %v1639_v57, %v1505_v4  ;;  %v1386_v59 = vmul.f32 %v90_v3, %v90_v3  ;;  %v1508_v60 = vmul.f32 %v4385_v15, %v4454_v26  ;;  %v1509_v40 = vmul.f32 %v1381_v54, %v4459_v44  ;;  %v223_v4 = vld [vmem:[%s6490_s1 + $0x2a0] sm:$0xff]  ;;  %v226_v36 = vld [vmem:[%s6490_s1 + $0x2b8] sm:$0xff] }
  0xd3   :  { %6674 = vst [vmem:[#allocation73_spill] sm:$0xff] %v4485_v12  ;;  %2042 = vadd.xlane.f32.xlu1 %v2041_v62  ;;  %v1911_v35 = vmul.f32 %v4357_v21, %v4471_v7  ;;  %v2045_v52 = vadd.f32 %v2044_v49, %v1909_v0  ;;  %v4503_v15 = vadd.f32 1.0, %v219_v23  ;;  %v4506_v54 = vadd.f32 1.0, %v4483_v33 }
  0xd4   :  { %v1641_v8 = vadd.f32 %v1640_v2, %v1506_v37  ;;  %v1912_v14 = vmul.f32 %v4363_v46, %v4485_v12  ;;  %v1510_v21 = vmul.f32 %v4416_v28, %v4464_v30  ;;  %v1644_v6 = vadd.f32 %v1508_v60, %v1507_v58  ;;  %v225_v37 = vld [vmem:[%s6490_s1 + $0x2b0] sm:$0xff] }
  0xd5   :  { %v2493_v32 = vpop.eup %2492  ;;  %v2046_v50 = vadd.f32 %v2045_v52, %v1910_v13  ;;  %v1511_v16 = vmul.f32 %v1383_v25, %v4471_v7  ;;  %v1512_v43 = vmul.f32 %v1384_v1, %v4485_v12  ;;  %v4520_v34 = vadd.f32 1.0, %v221_v5 }
  0xd6   :  { %v2495_v46 = vpop.eup %2494  ;;  %1642 = vadd.xlane.f32.xlu0 %v1641_v8  ;;  %v680_v28 = vmul.f32 %v2493_v32, %v4328_v48  ;;  %v1645_v38 = vadd.f32 %v1644_v6, %v1509_v40  ;;  %v4526_v55 = vadd.f32 1.0, %v222_v61  ;;  %v4528_v25 = vadd.f32 1.0, %v223_v4 }
  0xd7   :  { %v682_v1 = vmul.f32 %v2495_v46, %v4330_v51  ;;  %v2047_v11 = vadd.f32 %v2046_v50, %v1911_v35  ;;  %v4531_v3 = vadd.f32 1.0, %v224_v20  ;;  %v475_v57 = vadd.f32 1e-07, %v4503_v15 }
  0xd8   :  { %v4534_v0 = vmul.f32 %v680_v28, %v680_v28  ;;  %v1646_v58 = vadd.f32 %v1645_v38, %v1510_v21  ;;  %v4536_v48 = vadd.f32 1.0, %v225_v37  ;;  %v476_v62 = vadd.f32 1e-07, %v4506_v54  ;;  %v228_v38 = vld [vmem:[%s6490_s1 + $0x2c8] sm:$0xff] }
  0xd9   :  { %v4539_v13 = vmul.f32 %v682_v1, %v682_v1  ;;  %v2048_v49 = vadd.f32 %v2047_v11, %v1912_v14  ;;  %v4541_v2 = vadd.f32 1.0, %v226_v36  ;;  %v477_v60 = vadd.f32 1e-07, %v4520_v34 }
  0xda   :  { %6675 = vst [vmem:[#allocation74_spill] sm:$0xff] %v4534_v0  ;;  %v1913_v51 = vmul.f32 %v4365_v42, %v4534_v0  ;;  %v1513_v40 = vmul.f32 %v4456_v47, %v4534_v0  ;;  %v1647_v35 = vadd.f32 %v1646_v58, %v1511_v16  ;;  %v478_v52 = vadd.f32 1e-07, %v4526_v55  ;;  %v94_v58 = vld [vmem:[%s6491_s0 + $0x298] sm:$0xff] }
  0xdb   :  { %6676 = vst [vmem:[#allocation75_spill] sm:$0xff] %v4539_v13  ;;  %v1914_v8 = vmul.f32 %v4373_v24, %v4539_v13  ;;  %v479_v21 = vadd.f32 1e-07, %v4528_v25  ;;  %v480_v14 = vadd.f32 1e-07, %v4531_v3  ;;  %2496 = vrcp.f32 %v475_v57  ;;  %v93_v57 = vld [vmem:[%s6491_s0 + $0x290] sm:$0xff] }
  0xdc   :  { %v2049_v6 = vadd.f32 %v2048_v49, %v1913_v51  ;;  %v1514_v32 = vmul.f32 %v1386_v59, %v4539_v13  ;;  %v1648_v50 = vadd.f32 %v1647_v35, %v1512_v43  ;;  %2498 = vrcp.f32 %v476_v62  ;;  %v91_v59 = vld [vmem:[%s6491_s0 + $0x280] sm:$0xff]  ;;  %v92_v43 = vld [vmem:[%s6491_s0 + $0x288] sm:$0xff] }
  0xdd   :  { %v481_v42 = vadd.f32 1e-07, %v4536_v48  ;;  %v482_v47 = vadd.f32 1e-07, %v4541_v2  ;;  %2500 = vrcp.f32 %v477_v60  ;;  %v4556_v16 = vmul.f32 %v219_v23, %v219_v23  ;;  %v227_v23 = vld [vmem:[%s6490_s1 + $0x2c0] sm:$0xff]  ;;  %v230_v60 = vld [vmem:[%s6490_s1 + $0x2d8] sm:$0xff] }
  0xde   :  { %v2050_v46 = vadd.f32 %v2049_v6, %v1914_v8  ;;  %v1649_v28 = vadd.f32 %v1648_v50, %v1513_v40  ;;  %2502 = vrcp.f32 %v478_v52  ;;  %v4560_v24 = vmul.f32 %v4483_v33, %v4483_v33  ;;  %v95_v62 = vld [vmem:[%s6491_s0 + $0x2a0] sm:$0xff]  ;;  %v233_v52 = vld [vmem:[%s6490_s1 + $0x2f0] sm:$0xff]  ;;  %v234_v8 = vld [vmem:[%s6490_s1 + $0x2f8] sm:$0xff] }
  0xdf   :  { %2504 = vrcp.f32 %v479_v21  ;;  %v4574_v1 = vmul.f32 %v221_v5, %v221_v5  ;;  %v4576_v33 = vmul.f32 %v222_v61, %v222_v61  ;;  %v4578_v11 = vmul.f32 %v223_v4, %v223_v4  ;;  %v229_v4 = vld [vmem:[%s6490_s1 + $0x2d0] sm:$0xff]  ;;  %v231_v51 = vld [vmem:[%s6490_s1 + $0x2e0] sm:$0xff]  ;;  %v98_v50 = vld [vmem:[%s6491_s0 + $0x2b8] sm:$0xff] }
  0xe0   :  { %2051 = vadd.xlane.f32.xlu1 %v2050_v46  ;;  %v1650_v49 = vadd.f32 %v1649_v28, %v1514_v32  ;;  %2506 = vrcp.f32 %v480_v14  ;;  %v4589_v5 = vmul.f32 %v224_v20, %v224_v20  ;;  %v4591_v61 = vmul.f32 %v225_v37, %v225_v37  ;;  %v232_v37 = vld [vmem:[%s6490_s1 + $0x2e8] sm:$0xff]  ;;  %v97_v32 = vld [vmem:[%s6491_s0 + $0x2b0] sm:$0xff] }
  0xe1   :  { %2508 = vrcp.f32 %v481_v42  ;;  %v4602_v40 = vmul.f32 %v226_v36, %v226_v36  ;;  %v4604_v35 = vmul.f32 %v91_v59, %v91_v59  ;;  %v4606_v20 = vmul.f32 %v92_v43, %v92_v43  ;;  %v96_v36 = vld [vmem:[%s6491_s0 + $0x2a8] sm:$0xff] }
  0xe2   :  { %1651 = vadd.xlane.f32.xlu0 %v1650_v49  ;;  %2510 = vrcp.f32 %v482_v47  ;;  %v4620_v21 = vmul.f32 %v93_v57, %v93_v57  ;;  %v4622_v14 = vmul.f32 %v94_v58, %v94_v58  ;;  %v4624_v6 = vmul.f32 %v95_v62, %v95_v62 }
  0xe3   :  { %v4632_v42 = vadd.f32 1.0, %v227_v23  ;;  %v4634_v47 = vadd.f32 1.0, %v228_v38  ;;  %v4636_v46 = vadd.f32 1.0, %v229_v4  ;;  %v4638_v28 = vadd.f32 1.0, %v230_v60 }
  0xe4   :  { %v4640_v59 = vadd.f32 1.0, %v231_v51  ;;  %v4642_v43 = vadd.f32 1.0, %v232_v37  ;;  %v4644_v57 = vadd.f32 1.0, %v233_v52  ;;  %v4646_v58 = vadd.f32 1.0, %v234_v8 }
  0xe5   :  { %v4648_v62 = vmul.f32 %v96_v36, %v96_v36  ;;  %v483_v49 = vadd.f32 1e-07, %v4632_v42  ;;  %v484_v19 = vadd.f32 1e-07, %v4634_v47  ;;  %v485_v41 = vadd.f32 1e-07, %v4636_v46 }
  0xe6   :  { %v4653_v53 = vmul.f32 %v97_v32, %v97_v32  ;;  %v4655_v9 = vmul.f32 %v98_v50, %v98_v50  ;;  %v486_v31 = vadd.f32 1e-07, %v4638_v28  ;;  %v4658_v13 = vmul.f32 %v227_v23, %v227_v23 }
  0xe7   :  { %v487_v27 = vadd.f32 1e-07, %v4640_v59  ;;  %v488_v29 = vadd.f32 1e-07, %v4642_v43  ;;  %2512 = vrcp.f32 %v483_v49  ;;  %v4662_v36 = vmul.f32 %v228_v38, %v228_v38  ;;  %v99_v38 = vld [vmem:[%s6491_s0 + $0x2c0] sm:$0xff] }
  0xe8   :  { %v2497_v45 = vpop.eup %2496  ;;  %v489_v0 = vadd.f32 1e-07, %v4644_v57  ;;  %v4666_v12 = vadd.f32 1e-07, %v4646_v58  ;;  %2514 = vrcp.f32 %v484_v19  ;;  %v4668_v32 = vmul.f32 %v229_v4, %v229_v4 }
  0xe9   :  { %v2499_v50 = vpop.eup %2498  ;;  %v684_v23 = vmul.f32 %v2497_v45, %v4503_v15  ;;  %2516 = vrcp.f32 %v485_v41  ;;  %v4671_v7 = vmul.f32 %v230_v60, %v230_v60  ;;  %v4673_v30 = vmul.f32 %v231_v51, %v231_v51  ;;  %v100_v45 = vld [vmem:[%s6491_s0 + $0x2c8] sm:$0xff] }
  0xea   :  { %v2501_v49 = vpop.eup %2500  ;;  %v686_v44 = vmul.f32 %v2499_v50, %v4506_v54  ;;  %2518 = vrcp.f32 %v486_v31  ;;  %v4679_v26 = vmul.f32 %v232_v37, %v232_v37  ;;  %v4681_v19 = vmul.f32 %v233_v52, %v233_v52 }
  0xeb   :  { %v2503_v41 = vpop.eup %2502  ;;  %v688_v15 = vmul.f32 %v2501_v49, %v4520_v34  ;;  %v4687_v4 = vmul.f32 %v684_v23, %v684_v23  ;;  %2520 = vrcp.f32 %v487_v27  ;;  %v4689_v60 = vmul.f32 %v234_v8, %v234_v8 }
  0xec   :  { %v2505_v51 = vpop.eup %2504  ;;  %v690_v54 = vmul.f32 %v2503_v41, %v4526_v55  ;;  %v4692_v31 = vmul.f32 %v686_v44, %v686_v44  ;;  %2522 = vrcp.f32 %v488_v29  ;;  %v4694_v37 = vmul.f32 %v99_v38, %v99_v38  ;;  %v101_v55 = vld [vmem:[%s6491_s0 + $0x2d0] sm:$0xff] }
  0xed   :  { %6677 = vst [vmem:[#allocation76_spill] sm:$0xff] %v4687_v4  ;;  %v2507_v52 = vpop.eup %2506  ;;  %v692_v50 = vmul.f32 %v2505_v51, %v4528_v25  ;;  %v4697_v56 = vmul.f32 %v688_v15, %v688_v15  ;;  %v1915_v34 = vmul.f32 %v4556_v16, %v4687_v4  ;;  %v4701_v23 = vmul.f32 %v100_v45, %v100_v45  ;;  %v102_v25 = vld [vmem:[%s6491_s0 + $0x2d8] sm:$0xff] }
  0xee   :  { %6678 = vst [vmem:[#allocation77_spill] sm:$0xff] %v4692_v31  ;;  %v2509_v27 = vpop.eup %2508  ;;  %v694_v8 = vmul.f32 %v2507_v52, %v4531_v3  ;;  %v4704_v49 = vmul.f32 %v690_v54, %v690_v54  ;;  %v1916_v29 = vmul.f32 %v4560_v24, %v4692_v31  ;;  %v1515_v44 = vmul.f32 %v4604_v35, %v4687_v4 }
  0xef   :  { %6679 = vst [vmem:[#allocation78_spill] sm:$0xff] %v4697_v56  ;;  %v2511_v16 = vpop.eup %2510  ;;  %v696_v38 = vmul.f32 %v2509_v27, %v4536_v48  ;;  %v4717_v3 = vmul.f32 %v692_v50, %v692_v50  ;;  %v1917_v45 = vmul.f32 %v4574_v1, %v4697_v56  ;;  %v1516_v24 = vmul.f32 %v4606_v20, %v4692_v31 }
  0xf0   :  { %6680 = vst [vmem:[#allocation79_spill] sm:$0xff] %v4704_v49  ;;  %v698_v35 = vmul.f32 %v2511_v16, %v4541_v2  ;;  %v4724_v41 = vmul.f32 %v694_v8, %v694_v8  ;;  %v1918_v15 = vmul.f32 %v4576_v33, %v4704_v49  ;;  %v2053_v51 = vadd.f32 %v1916_v29, %v1915_v34 }
  0xf1   :  { %6681 = vst [vmem:[#allocation80_spill] sm:$0xff] %v4717_v3  ;;  %v4728_v54 = vmul.f32 %v696_v38, %v696_v38  ;;  %v1517_v48 = vmul.f32 %v4620_v21, %v4697_v56  ;;  %v1397_v52 = vmul.f32 %v101_v55, %v101_v55  ;;  %v4732_v50 = vmul.f32 %v102_v25, %v102_v25  ;;  %v103_v21 = vld [vmem:[%s6491_s0 + $0x2e0] sm:$0xff] }
  0xf2   :  { %6682 = vst [vmem:[#allocation81_spill] sm:$0xff] %v4724_v41  ;;  %v4734_v1 = vmul.f32 %v698_v35, %v698_v35  ;;  %v1919_v20 = vmul.f32 %v4578_v11, %v4717_v3  ;;  %v2054_v2 = vadd.f32 %v2053_v51, %v1917_v45  ;;  %v1518_v27 = vmul.f32 %v4622_v14, %v4704_v49 }
  0xf3   :  { %6683 = vst [vmem:[#allocation82_spill] sm:$0xff] %v4728_v54  ;;  %v1920_v33 = vmul.f32 %v4589_v5, %v4724_v41  ;;  %v1519_v34 = vmul.f32 %v4624_v6, %v4717_v3  ;;  %v1653_v8 = vadd.f32 %v1516_v24, %v1515_v44  ;;  %2524 = vrcp.f32 %v489_v0  ;;  %v104_v5 = vld [vmem:[%s6491_s0 + $0x2e8] sm:$0xff] }
  0xf4   :  { %6684 = vst [vmem:[#allocation83_spill] sm:$0xff] %v4734_v1  ;;  %v2513_v29 = vpop.eup %2512  ;;  %v1921_v11 = vmul.f32 %v4591_v61, %v4728_v54  ;;  %v2055_v55 = vadd.f32 %v2054_v2, %v1918_v15  ;;  %v1520_v14 = vmul.f32 %v4648_v62, %v4724_v41  ;;  %2526 = vrcp.f32 %v4666_v12  ;;  %v105_v62 = vld [vmem:[%s6491_s0 + $0x2f0] sm:$0xff] }
  0xf5   :  { %v2515_v6 = vpop.eup %2514  ;;  %v1922_v0 = vmul.f32 %v4602_v40, %v4734_v1  ;;  %v1521_v44 = vmul.f32 %v4653_v53, %v4728_v54  ;;  %v1654_v25 = vadd.f32 %v1653_v8, %v1517_v48  ;;  %v700_v61 = vmul.f32 %v2513_v29, %v4632_v42 }
  0xf6   :  { %v2517_v16 = vpop.eup %2516  ;;  %v2056_v12 = vadd.f32 %v2055_v55, %v1919_v20  ;;  %v1522_v38 = vmul.f32 %v4655_v9, %v4734_v1  ;;  %v702_v45 = vmul.f32 %v2515_v6, %v4634_v47  ;;  %v1399_v24 = vmul.f32 %v103_v21, %v103_v21 }
  0xf7   :  { %v2519_v35 = vpop.eup %2518  ;;  %v1655_v40 = vadd.f32 %v1654_v25, %v1518_v27  ;;  %v704_v15 = vmul.f32 %v2517_v16, %v4636_v46  ;;  %v4767_v53 = vmul.f32 %v700_v61, %v700_v61  ;;  %v1400_v51 = vmul.f32 %v104_v5, %v104_v5 }
  0xf8   :  { %v2521_v42 = vpop.eup %2520  ;;  %v2057_v48 = vadd.f32 %v2056_v12, %v1920_v33  ;;  %v706_v2 = vmul.f32 %v2519_v35, %v4638_v28  ;;  %v4770_v8 = vmul.f32 %v702_v45, %v702_v45  ;;  %v4772_v20 = vmul.f32 %v105_v62, %v105_v62  ;;  %v106_v33 = vld [vmem:[%s6491_s0 + $0x2f8] sm:$0xff]  ;;  %v237_v12 = vld [vmem:[%s6490_s1 + $0x310] sm:$0xff] }
  0xf9   :  { %6685 = vst [vmem:[#allocation84_spill] sm:$0xff] %v4767_v53  ;;  %v2523_v29 = vpop.eup %2522  ;;  %v1656_v9 = vadd.f32 %v1655_v40, %v1519_v34  ;;  %v708_v47 = vmul.f32 %v2521_v42, %v4640_v59  ;;  %v4775_v21 = vmul.f32 %v704_v15, %v704_v15  ;;  %v1923_v46 = vmul.f32 %v4658_v13, %v4767_v53  ;;  %v240_v42 = vld [vmem:[%s6490_s1 + $0x328] sm:$0xff] }
  0xfa   :  { %6686 = vst [vmem:[#allocation85_spill] sm:$0xff] %v4770_v8  ;;  %v2058_v27 = vadd.f32 %v2057_v48, %v1921_v11  ;;  %v710_v55 = vmul.f32 %v2523_v29, %v4642_v43  ;;  %v4780_v5 = vmul.f32 %v706_v2, %v706_v2  ;;  %v1924_v28 = vmul.f32 %v4662_v36, %v4770_v8  ;;  %v235_v43 = vld [vmem:[%s6490_s1 + $0x300] sm:$0xff]  ;;  %v4799_v36 = vld [vmem:[%s6490_s1 + $0x308] sm:$0xff] }
  0xfb   :  { %6687 = vst [vmem:[#allocation86_spill] sm:$0xff] %v4775_v21  ;;  %v1657_v34 = vadd.f32 %v1656_v9, %v1520_v14  ;;  %v4787_v6 = vmul.f32 %v708_v47, %v708_v47  ;;  %v1925_v59 = vmul.f32 %v4668_v32, %v4775_v21  ;;  %v1523_v13 = vmul.f32 %v4694_v37, %v4767_v53 }
  0xfc   :  { %6688 = vst [vmem:[#allocation87_spill] sm:$0xff] %v4780_v5  ;;  %v2059_v11 = vadd.f32 %v2058_v27, %v1922_v0  ;;  %v4801_v25 = vmul.f32 %v710_v55, %v710_v55  ;;  %v1926_v14 = vmul.f32 %v4671_v7, %v4780_v5  ;;  %v2062_v61 = vadd.f32 %v1924_v28, %v1923_v46  ;;  %v238_v7 = vld [vmem:[%s6490_s1 + $0x318] sm:$0xff] }
  0xfd   :  { %6689 = vst [vmem:[#allocation88_spill] sm:$0xff] %v4787_v6  ;;  %v1658_v32 = vadd.f32 %v1657_v34, %v1521_v44  ;;  %v1402_v62 = vmul.f32 %v106_v33, %v106_v33  ;;  %v1524_v37 = vmul.f32 %v4701_v23, %v4770_v8  ;;  %v1525_v16 = vmul.f32 %v1397_v52, %v4775_v21  ;;  %v239_v44 = vld [vmem:[%s6490_s1 + $0x320] sm:$0xff]  ;;  %v242_v27 = vld [vmem:[%s6490_s1 + $0x338] sm:$0xff] }
  0xfe   :  { %6690 = vst [vmem:[#allocation89_spill] sm:$0xff] %v4801_v25  ;;  %2060 = vadd.xlane.f32.xlu1 %v2059_v11  ;;  %v1927_v0 = vmul.f32 %v4673_v30, %v4787_v6  ;;  %v2063_v45 = vadd.f32 %v2062_v61, %v1925_v59  ;;  %v4819_v23 = vadd.f32 1.0, %v235_v43  ;;  %v4822_v52 = vadd.f32 1.0, %v4799_v36 }
  0xff   :  { %v1659_v35 = vadd.f32 %v1658_v32, %v1522_v38  ;;  %v1928_v40 = vmul.f32 %v4679_v26, %v4801_v25  ;;  %v1526_v30 = vmul.f32 %v4732_v50, %v4780_v5  ;;  %v1662_v15 = vadd.f32 %v1524_v37, %v1523_v13  ;;  %v241_v38 = vld [vmem:[%s6490_s1 + $0x330] sm:$0xff] }
 0x100   :  { %v2525_v48 = vpop.eup %2524  ;;  %v2064_v2 = vadd.f32 %v2063_v45, %v1926_v14  ;;  %v1527_v29 = vmul.f32 %v1399_v24, %v4787_v6  ;;  %v1528_v9 = vmul.f32 %v1400_v51, %v4801_v25  ;;  %v4836_v47 = vadd.f32 1.0, %v237_v12 }
 0x101   :  { %v2527_v26 = vpop.eup %2526  ;;  %1660 = vadd.xlane.f32.xlu0 %v1659_v35  ;;  %v712_v50 = vmul.f32 %v2525_v48, %v4644_v57  ;;  %v1663_v46 = vadd.f32 %v1662_v15, %v1525_v16  ;;  %v4842_v55 = vadd.f32 1.0, %v238_v7  ;;  %v4844_v24 = vadd.f32 1.0, %v239_v44 }
 0x102   :  { %v714_v51 = vmul.f32 %v2527_v26, %v4646_v58  ;;  %v2065_v28 = vadd.f32 %v2064_v2, %v1927_v0  ;;  %v4847_v33 = vadd.f32 1.0, %v240_v42  ;;  %v491_v34 = vadd.f32 1e-07, %v4819_v23 }
 0x103   :  { %v4850_v59 = vmul.f32 %v712_v50, %v712_v50  ;;  %v1664_v13 = vadd.f32 %v1663_v46, %v1526_v30  ;;  %v4852_v57 = vadd.f32 1.0, %v241_v38  ;;  %v492_v11 = vadd.f32 1e-07, %v4822_v52  ;;  %v244_v46 = vld [vmem:[%s6490_s1 + $0x348] sm:$0xff] }
 0x104   :  { %v4855_v14 = vmul.f32 %v714_v51, %v714_v51  ;;  %v2066_v61 = vadd.f32 %v2065_v28, %v1928_v40  ;;  %v4857_v32 = vadd.f32 1.0, %v242_v27  ;;  %v493_v37 = vadd.f32 1e-07, %v4836_v47 }
 0x105   :  { %6691 = vst [vmem:[#allocation90_spill] sm:$0xff] %v4850_v59  ;;  %v1929_v58 = vmul.f32 %v4681_v19, %v4850_v59  ;;  %v1529_v16 = vmul.f32 %v4772_v20, %v4850_v59  ;;  %v1665_v0 = vadd.f32 %v1664_v13, %v1527_v29  ;;  %v494_v45 = vadd.f32 1e-07, %v4842_v55  ;;  %v110_v13 = vld [vmem:[%s6491_s0 + $0x318] sm:$0xff] }
 0x106   :  { %6692 = vst [vmem:[#allocation91_spill] sm:$0xff] %v4855_v14  ;;  %v1930_v35 = vmul.f32 %v4689_v60, %v4855_v14  ;;  %v495_v30 = vadd.f32 1e-07, %v4844_v24  ;;  %v496_v40 = vadd.f32 1e-07, %v4847_v33  ;;  %2528 = vrcp.f32 %v491_v34  ;;  %v109_v34 = vld [vmem:[%s6491_s0 + $0x310] sm:$0xff] }
 0x107   :  { %v2067_v15 = vadd.f32 %v2066_v61, %v1929_v58  ;;  %v1530_v48 = vmul.f32 %v1402_v62, %v4855_v14  ;;  %v1666_v2 = vadd.f32 %v1665_v0, %v1528_v9  ;;  %2530 = vrcp.f32 %v492_v11  ;;  %v107_v62 = vld [vmem:[%s6491_s0 + $0x300] sm:$0xff]  ;;  %v108_v9 = vld [vmem:[%s6491_s0 + $0x308] sm:$0xff] }
 0x108   :  { %v497_v19 = vadd.f32 1e-07, %v4852_v57  ;;  %v498_v20 = vadd.f32 1e-07, %v4857_v32  ;;  %2532 = vrcp.f32 %v493_v37  ;;  %v4872_v29 = vmul.f32 %v235_v43, %v235_v43  ;;  %v243_v43 = vld [vmem:[%s6490_s1 + $0x340] sm:$0xff]  ;;  %v246_v37 = vld [vmem:[%s6490_s1 + $0x358] sm:$0xff] }
 0x109   :  { %v2068_v26 = vadd.f32 %v2067_v15, %v1930_v35  ;;  %v1667_v50 = vadd.f32 %v1666_v2, %v1529_v16  ;;  %2534 = vrcp.f32 %v494_v45  ;;  %v4876_v60 = vmul.f32 %v4799_v36, %v4799_v36  ;;  %v111_v11 = vld [vmem:[%s6491_s0 + $0x320] sm:$0xff]  ;;  %v249_v45 = vld [vmem:[%s6490_s1 + $0x370] sm:$0xff]  ;;  %v250_v35 = vld [vmem:[%s6490_s1 + $0x378] sm:$0xff] }
 0x10a   :  { %2536 = vrcp.f32 %v495_v30  ;;  %v4890_v51 = vmul.f32 %v237_v12, %v237_v12  ;;  %v4892_v36 = vmul.f32 %v238_v7, %v238_v7  ;;  %v4894_v28 = vmul.f32 %v239_v44, %v239_v44  ;;  %v245_v44 = vld [vmem:[%s6490_s1 + $0x350] sm:$0xff]  ;;  %v247_v58 = vld [vmem:[%s6490_s1 + $0x360] sm:$0xff]  ;;  %v114_v2 = vld [vmem:[%s6491_s0 + $0x338] sm:$0xff] }
 0x10b   :  { %2069 = vadd.xlane.f32.xlu1 %v2068_v26  ;;  %v1668_v61 = vadd.f32 %v1667_v50, %v1530_v48  ;;  %2538 = vrcp.f32 %v496_v40  ;;  %v4905_v12 = vmul.f32 %v240_v42, %v240_v42  ;;  %v4907_v7 = vmul.f32 %v241_v38, %v241_v38  ;;  %v248_v38 = vld [vmem:[%s6490_s1 + $0x368] sm:$0xff]  ;;  %v113_v48 = vld [vmem:[%s6491_s0 + $0x330] sm:$0xff] }
 0x10c   :  { %2540 = vrcp.f32 %v497_v19  ;;  %v4918_v16 = vmul.f32 %v242_v27, %v242_v27  ;;  %v4920_v0 = vmul.f32 %v107_v62, %v107_v62  ;;  %v4922_v42 = vmul.f32 %v108_v9, %v108_v9  ;;  %v112_v27 = vld [vmem:[%s6491_s0 + $0x328] sm:$0xff] }
 0x10d   :  { %1669 = vadd.xlane.f32.xlu0 %v1668_v61  ;;  %2542 = vrcp.f32 %v498_v20  ;;  %v4936_v30 = vmul.f32 %v109_v34, %v109_v34  ;;  %v4938_v40 = vmul.f32 %v110_v13, %v110_v13  ;;  %v4940_v15 = vmul.f32 %v111_v11, %v111_v11 }
 0x10e   :  { %v4948_v19 = vadd.f32 1.0, %v243_v43  ;;  %v4950_v20 = vadd.f32 1.0, %v244_v46  ;;  %v4952_v26 = vadd.f32 1.0, %v245_v44  ;;  %v4954_v50 = vadd.f32 1.0, %v246_v37 }
 0x10f   :  { %v4956_v62 = vadd.f32 1.0, %v247_v58  ;;  %v4958_v9 = vadd.f32 1.0, %v248_v38  ;;  %v4960_v34 = vadd.f32 1.0, %v249_v45  ;;  %v4962_v13 = vadd.f32 1.0, %v250_v35 }
 0x110   :  { %v4964_v11 = vmul.f32 %v112_v27, %v112_v27  ;;  %v499_v61 = vadd.f32 1e-07, %v4948_v19  ;;  %v500_v1 = vadd.f32 1e-07, %v4950_v20  ;;  %v501_v54 = vadd.f32 1e-07, %v4952_v26 }
 0x111   :  { %v4969_v41 = vmul.f32 %v113_v48, %v113_v48  ;;  %v4971_v3 = vmul.f32 %v114_v2, %v114_v2  ;;  %v502_v49 = vadd.f32 1e-07, %v4954_v50  ;;  %v4974_v14 = vmul.f32 %v243_v43, %v243_v43 }
 0x112   :  { %v503_v59 = vadd.f32 1e-07, %v4956_v62  ;;  %v504_v56 = vadd.f32 1e-07, %v4958_v9  ;;  %2544 = vrcp.f32 %v499_v61  ;;  %v4978_v27 = vmul.f32 %v244_v46, %v244_v46  ;;  %v115_v46 = vld [vmem:[%s6491_s0 + $0x340] sm:$0xff] }
 0x113   :  { %v2529_v31 = vpop.eup %2528  ;;  %v505_v4 = vadd.f32 1e-07, %v4960_v34  ;;  %v4982_v25 = vadd.f32 1e-07, %v4962_v13  ;;  %2546 = vrcp.f32 %v500_v1  ;;  %v4984_v48 = vmul.f32 %v245_v44, %v245_v44 }
 0x114   :  { %v2531_v2 = vpop.eup %2530  ;;  %v716_v43 = vmul.f32 %v2529_v31, %v4819_v23  ;;  %2548 = vrcp.f32 %v501_v54  ;;  %v4987_v6 = vmul.f32 %v246_v37, %v246_v37  ;;  %v4989_v5 = vmul.f32 %v247_v58, %v247_v58  ;;  %v116_v31 = vld [vmem:[%s6491_s0 + $0x348] sm:$0xff] }
 0x115   :  { %v2533_v61 = vpop.eup %2532  ;;  %v718_v21 = vmul.f32 %v2531_v2, %v4822_v52  ;;  %2550 = vrcp.f32 %v502_v49  ;;  %v4995_v8 = vmul.f32 %v248_v38, %v248_v38  ;;  %v4997_v1 = vmul.f32 %v249_v45, %v249_v45 }
 0x116   :  { %v2535_v54 = vpop.eup %2534  ;;  %v720_v23 = vmul.f32 %v2533_v61, %v4836_v47  ;;  %v5003_v44 = vmul.f32 %v716_v43, %v716_v43  ;;  %2552 = vrcp.f32 %v503_v59  ;;  %v5005_v37 = vmul.f32 %v250_v35, %v250_v35 }
 0x117   :  { %v2537_v58 = vpop.eup %2536  ;;  %v722_v52 = vmul.f32 %v2535_v54, %v4842_v55  ;;  %v5008_v49 = vmul.f32 %v718_v21, %v718_v21  ;;  %2554 = vrcp.f32 %v504_v56  ;;  %v5010_v38 = vmul.f32 %v115_v46, %v115_v46  ;;  %v117_v55 = vld [vmem:[%s6491_s0 + $0x350] sm:$0xff] }
 0x118   :  { %6693 = vst [vmem:[#allocation92_spill] sm:$0xff] %v5003_v44  ;;  %v2539_v45 = vpop.eup %2538  ;;  %v724_v2 = vmul.f32 %v2537_v58, %v4844_v24  ;;  %v5013_v53 = vmul.f32 %v720_v23, %v720_v23  ;;  %v1931_v47 = vmul.f32 %v4872_v29, %v5003_v44  ;;  %v5017_v43 = vmul.f32 %v116_v31, %v116_v31  ;;  %v118_v24 = vld [vmem:[%s6491_s0 + $0x358] sm:$0xff] }
 0x119   :  { %6694 = vst [vmem:[#allocation93_spill] sm:$0xff] %v5008_v49  ;;  %v2541_v59 = vpop.eup %2540  ;;  %v726_v35 = vmul.f32 %v2539_v45, %v4847_v33  ;;  %v5020_v61 = vmul.f32 %v722_v52, %v722_v52  ;;  %v1932_v56 = vmul.f32 %v4876_v60, %v5008_v49  ;;  %v1531_v21 = vmul.f32 %v4920_v0, %v5003_v44 }
 0x11a   :  { %6695 = vst [vmem:[#allocation94_spill] sm:$0xff] %v5013_v53  ;;  %v2543_v29 = vpop.eup %2542  ;;  %v728_v46 = vmul.f32 %v2541_v59, %v4852_v57  ;;  %v5033_v33 = vmul.f32 %v724_v2, %v724_v2  ;;  %v1933_v31 = vmul.f32 %v4890_v51, %v5013_v53  ;;  %v1532_v60 = vmul.f32 %v4922_v42, %v5008_v49 }
 0x11b   :  { %6696 = vst [vmem:[#allocation95_spill] sm:$0xff] %v5020_v61  ;;  %v730_v0 = vmul.f32 %v2543_v29, %v4857_v32  ;;  %v5040_v54 = vmul.f32 %v726_v35, %v726_v35  ;;  %v1934_v23 = vmul.f32 %v4892_v36, %v5020_v61  ;;  %v2071_v58 = vadd.f32 %v1932_v56, %v1931_v47 }
 0x11c   :  { %6697 = vst [vmem:[#allocation96_spill] sm:$0xff] %v5033_v33  ;;  %v5044_v52 = vmul.f32 %v728_v46, %v728_v46  ;;  %v1533_v57 = vmul.f32 %v4936_v30, %v5013_v53  ;;  %v1413_v45 = vmul.f32 %v117_v55, %v117_v55  ;;  %v5048_v2 = vmul.f32 %v118_v24, %v118_v24  ;;  %v119_v30 = vld [vmem:[%s6491_s0 + $0x360] sm:$0xff] }
 0x11d   :  { %6698 = vst [vmem:[#allocation97_spill] sm:$0xff] %v5040_v54  ;;  %v5050_v51 = vmul.f32 %v730_v0, %v730_v0  ;;  %v1935_v42 = vmul.f32 %v4894_v28, %v5033_v33  ;;  %v2072_v32 = vadd.f32 %v2071_v58, %v1933_v31  ;;  %v1534_v59 = vmul.f32 %v4938_v40, %v5020_v61 }
 0x11e   :  { %6699 = vst [vmem:[#allocation98_spill] sm:$0xff] %v5044_v52  ;;  %v1936_v36 = vmul.f32 %v4905_v12, %v5040_v54  ;;  %v1535_v47 = vmul.f32 %v4940_v15, %v5033_v33  ;;  %v1671_v35 = vadd.f32 %v1532_v60, %v1531_v21  ;;  %2556 = vrcp.f32 %v505_v4  ;;  %v120_v12 = vld [vmem:[%s6491_s0 + $0x368] sm:$0xff] }
 0x11f   :  { %6700 = vst [vmem:[#allocation99_spill] sm:$0xff] %v5050_v51  ;;  %v2545_v56 = vpop.eup %2544  ;;  %v1937_v28 = vmul.f32 %v4907_v7, %v5044_v52  ;;  %v2073_v55 = vadd.f32 %v2072_v32, %v1934_v23  ;;  %v1536_v40 = vmul.f32 %v4964_v11, %v5040_v54  ;;  %2558 = vrcp.f32 %v4982_v25  ;;  %v121_v11 = vld [vmem:[%s6491_s0 + $0x370] sm:$0xff] }
 0x120   :  { %v2547_v15 = vpop.eup %2546  ;;  %v1938_v4 = vmul.f32 %v4918_v16, %v5050_v51  ;;  %v1537_v21 = vmul.f32 %v4969_v41, %v5044_v52  ;;  %v1672_v24 = vadd.f32 %v1671_v35, %v1533_v57  ;;  %v732_v7 = vmul.f32 %v2545_v56, %v4948_v19 }
 0x121   :  { %v2549_v29 = vpop.eup %2548  ;;  %v2074_v25 = vadd.f32 %v2073_v55, %v1935_v42  ;;  %v1538_v46 = vmul.f32 %v4971_v3, %v5050_v51  ;;  %v734_v31 = vmul.f32 %v2547_v15, %v4950_v20  ;;  %v1415_v60 = vmul.f32 %v119_v30, %v119_v30 }
 0x122   :  { %v2551_v0 = vpop.eup %2550  ;;  %v1673_v16 = vadd.f32 %v1672_v24, %v1534_v59  ;;  %v736_v23 = vmul.f32 %v2549_v29, %v4952_v26  ;;  %v5083_v41 = vmul.f32 %v732_v7, %v732_v7  ;;  %v1416_v58 = vmul.f32 %v120_v12, %v120_v12 }
 0x123   :  { %v2553_v19 = vpop.eup %2552  ;;  %v2075_v57 = vadd.f32 %v2074_v25, %v1936_v36  ;;  %v738_v32 = vmul.f32 %v2551_v0, %v4954_v50  ;;  %v5086_v35 = vmul.f32 %v734_v31, %v734_v31  ;;  %v5088_v42 = vmul.f32 %v121_v11, %v121_v11  ;;  %v122_v36 = vld [vmem:[%s6491_s0 + $0x378] sm:$0xff]  ;;  %v253_v25 = vld [vmem:[%s6490_s1 + $0x390] sm:$0xff] }
 0x124   :  { %v2555_v56 = vpop.eup %2554  ;;  %v1674_v3 = vadd.f32 %v1673_v16, %v1535_v47  ;;  %v740_v20 = vmul.f32 %v2553_v19, %v4956_v62  ;;  %v5091_v30 = vmul.f32 %v736_v23, %v736_v23  ;;  %v1939_v26 = vmul.f32 %v4974_v14, %v5083_v41  ;;  %v256_v19 = vld [vmem:[%s6490_s1 + $0x3a8] sm:$0xff] }
 0x125   :  { %6701 = vst [vmem:[#allocation100_spill] sm:$0xff] %v5086_v35  ;;  %v2076_v59 = vadd.f32 %v2075_v57, %v1937_v28  ;;  %v742_v55 = vmul.f32 %v2555_v56, %v4958_v9  ;;  %v5096_v12 = vmul.f32 %v738_v32, %v738_v32  ;;  %v1940_v50 = vmul.f32 %v4978_v27, %v5086_v35  ;;  %v5112_v9 = vld [vmem:[%s6490_s1 + $0x380] sm:$0xff]  ;;  %v5117_v27 = vld [vmem:[%s6490_s1 + $0x388] sm:$0xff] }
 0x126   :  { %6702 = vst [vmem:[#allocation101_spill] sm:$0xff] %v5091_v30  ;;  %v1675_v47 = vadd.f32 %v1674_v3, %v1536_v40  ;;  %v5103_v15 = vmul.f32 %v740_v20, %v740_v20  ;;  %v1941_v62 = vmul.f32 %v4984_v48, %v5091_v30  ;;  %v1539_v14 = vmul.f32 %v5010_v38, %v5083_v41 }
 0x127   :  { %6703 = vst [vmem:[#allocation102_spill] sm:$0xff] %v5096_v12  ;;  %v2077_v28 = vadd.f32 %v2076_v59, %v1938_v4  ;;  %v5119_v40 = vmul.f32 %v742_v55, %v742_v55  ;;  %v1942_v24 = vmul.f32 %v4987_v6, %v5096_v12  ;;  %v2080_v48 = vadd.f32 %v1940_v50, %v1939_v26  ;;  %v254_v6 = vld [vmem:[%s6490_s1 + $0x398] sm:$0xff] }
 0x128   :  { %6704 = vst [vmem:[#allocation103_spill] sm:$0xff] %v5103_v15  ;;  %v1676_v7 = vadd.f32 %v1675_v47, %v1537_v21  ;;  %v1418_v11 = vmul.f32 %v122_v36, %v122_v36  ;;  %v1540_v38 = vmul.f32 %v5017_v43, %v5086_v35  ;;  %v1541_v29 = vmul.f32 %v1413_v45, %v5091_v30  ;;  %v5137_v21 = vld [vmem:[%s6490_s1 + $0x3a0] sm:$0xff]  ;;  %v258_v59 = vld [vmem:[%s6490_s1 + $0x3b8] sm:$0xff] }
 0x129   :  { %6705 = vst [vmem:[#allocation104_spill] sm:$0xff] %v5119_v40  ;;  %2078 = vadd.xlane.f32.xlu1 %v2077_v28  ;;  %v1943_v4 = vmul.f32 %v4989_v5, %v5103_v15  ;;  %v2081_v31 = vadd.f32 %v2080_v48, %v1941_v62  ;;  %v5140_v43 = vadd.f32 1.0, %v5112_v9  ;;  %v5143_v45 = vadd.f32 1.0, %v5117_v27 }
 0x12a   :  { %v1677_v0 = vadd.f32 %v1676_v7, %v1538_v46  ;;  %v1944_v5 = vmul.f32 %v4995_v8, %v5119_v40  ;;  %v1542_v16 = vmul.f32 %v5048_v2, %v5096_v12  ;;  %v1680_v23 = vadd.f32 %v1540_v38, %v1539_v14  ;;  %v257_v46 = vld [vmem:[%s6490_s1 + $0x3b0] sm:$0xff] }
 0x12b   :  { %v2557_v57 = vpop.eup %2556  ;;  %v2082_v32 = vadd.f32 %v2081_v31, %v1942_v24  ;;  %v1543_v56 = vmul.f32 %v1415_v60, %v5103_v15  ;;  %v1544_v3 = vmul.f32 %v1416_v58, %v5119_v40  ;;  %v5157_v20 = vadd.f32 1.0, %v253_v25 }
 0x12c   :  { %v2559_v8 = vpop.eup %2558  ;;  %1678 = vadd.xlane.f32.xlu0 %v1677_v0  ;;  %v744_v2 = vmul.f32 %v2557_v57, %v4960_v34  ;;  %v1681_v26 = vadd.f32 %v1680_v23, %v1541_v29  ;;  %v5163_v55 = vadd.f32 1.0, %v254_v6  ;;  %v5166_v60 = vadd.f32 1.0, %v5137_v21 }
 0x12d   :  { %v746_v58 = vmul.f32 %v2559_v8, %v4962_v13  ;;  %v2083_v50 = vadd.f32 %v2082_v32, %v1943_v4  ;;  %v5169_v36 = vadd.f32 1.0, %v256_v19  ;;  %v507_v47 = vadd.f32 1e-07, %v5140_v43 }
 0x12e   :  { %v5172_v62 = vmul.f32 %v744_v2, %v744_v2  ;;  %v1682_v34 = vadd.f32 %v1681_v26, %v1542_v16  ;;  %v5174_v14 = vadd.f32 1.0, %v257_v46  ;;  %v508_v28 = vadd.f32 1e-07, %v5143_v45  ;;  %v123_v2 = vld [vmem:[%s6491_s0 + $0x380] sm:$0xff] }
 0x12f   :  { %v5177_v24 = vmul.f32 %v746_v58, %v746_v58  ;;  %v2084_v48 = vadd.f32 %v2083_v50, %v1944_v5  ;;  %v5179_v7 = vadd.f32 1.0, %v258_v59  ;;  %v509_v38 = vadd.f32 1e-07, %v5157_v20  ;;  %v124_v50 = vld [vmem:[%s6491_s0 + $0x388] sm:$0xff] }
 0x130   :  { %6706 = vst [vmem:[#allocation105_spill] sm:$0xff] %v5172_v62  ;;  %v1945_v13 = vmul.f32 %v4997_v1, %v5172_v62  ;;  %v1545_v29 = vmul.f32 %v5088_v42, %v5172_v62  ;;  %v1683_v4 = vadd.f32 %v1682_v34, %v1543_v56  ;;  %v510_v31 = vadd.f32 1e-07, %v5163_v55  ;;  %v126_v34 = vld [vmem:[%s6491_s0 + $0x398] sm:$0xff] }
 0x131   :  { %6707 = vst [vmem:[#allocation106_spill] sm:$0xff] %v5177_v24  ;;  %v1946_v0 = vmul.f32 %v5005_v37, %v5177_v24  ;;  %v511_v16 = vadd.f32 1e-07, %v5166_v60  ;;  %v512_v5 = vadd.f32 1e-07, %v5169_v36  ;;  %2560 = vrcp.f32 %v507_v47  ;;  %v125_v47 = vld [vmem:[%s6491_s0 + $0x390] sm:$0xff] }
 0x132   :  { %v2085_v23 = vadd.f32 %v2084_v48, %v1945_v13  ;;  %v1546_v57 = vmul.f32 %v1418_v11, %v5177_v24  ;;  %v1684_v32 = vadd.f32 %v1683_v4, %v1544_v3  ;;  %2562 = vrcp.f32 %v508_v28  ;;  %v259_v11 = vld [vmem:[%s6490_s1 + $0x3c0] sm:$0xff]  ;;  %v260_v3 = vld [vmem:[%s6490_s1 + $0x3c8] sm:$0xff]  ;;  %v5238_v48 = vld [vmem:[%s6490_s1 + $0x3d8] sm:$0xff] }
 0x133   :  { %v513_v1 = vadd.f32 1e-07, %v5174_v14  ;;  %v514_v42 = vadd.f32 1e-07, %v5179_v7  ;;  %2564 = vrcp.f32 %v509_v38  ;;  %v5196_v37 = vmul.f32 %v5112_v9, %v5112_v9  ;;  %6709 = vst [vmem:[#allocation108_spill] sm:$0xff] %v5238_v48  ;;  %v5243_v38 = vld [vmem:[%s6490_s1 + $0x3e0] sm:$0xff] }
 0x134   :  { %v2086_v56 = vadd.f32 %v2085_v23, %v1946_v0  ;;  %v1685_v8 = vadd.f32 %v1684_v32, %v1545_v29  ;;  %2566 = vrcp.f32 %v510_v31  ;;  %v5209_v26 = vmul.f32 %v5117_v27, %v5117_v27  ;;  %6710 = vst [vmem:[#allocation109_spill] sm:$0xff] %v5243_v38  ;;  %v264_v29 = vld [vmem:[%s6490_s1 + $0x3e8] sm:$0xff]  ;;  %v265_v4 = vld [vmem:[%s6490_s1 + $0x3f0] sm:$0xff]  ;;  %v266_v31 = vld [vmem:[%s6490_s1 + $0x3f8] sm:$0xff] }
 0x135   :  { %2568 = vrcp.f32 %v511_v16  ;;  %v5211_v58 = vmul.f32 %v253_v25, %v253_v25  ;;  %v5213_v9 = vmul.f32 %v254_v6, %v254_v6  ;;  %v5226_v27 = vmul.f32 %v5137_v21, %v5137_v21  ;;  %v5233_v6 = vld [vmem:[%s6490_s1 + $0x3d0] sm:$0xff] }
 0x136   :  { %2087 = vadd.xlane.f32.xlu1 %v2086_v56  ;;  %v1686_v28 = vadd.f32 %v1685_v8, %v1546_v57  ;;  %2570 = vrcp.f32 %v512_v5  ;;  %v5228_v25 = vmul.f32 %v256_v19, %v256_v19  ;;  %6708 = vst [vmem:[#allocation107_spill] sm:$0xff] %v5233_v6  ;;  %v5245_v21 = vmul.f32 %v257_v46, %v257_v46  ;;  %v127_v46 = vld [vmem:[%s6491_s0 + $0x3a0] sm:$0xff]  ;;  %v129_v23 = vld [vmem:[%s6491_s0 + $0x3b0] sm:$0xff]  ;;  %v130_v57 = vld [vmem:[%s6491_s0 + $0x3b8] sm:$0xff] }
 0x137   :  { %2572 = vrcp.f32 %v513_v1  ;;  %v5247_v19 = vmul.f32 %v258_v59, %v258_v59  ;;  %v5249_v13 = vmul.f32 %v123_v2, %v123_v2  ;;  %v128_v59 = vld [vmem:[%s6491_s0 + $0x3a8] sm:$0xff]  ;;  %v5266_v0 = vmul.f32 %v124_v50, %v124_v50 }
 0x138   :  { %1687 = vadd.xlane.f32.xlu0 %v1686_v28  ;;  %2574 = vrcp.f32 %v514_v42  ;;  %v5268_v16 = vmul.f32 %v125_v47, %v125_v47  ;;  %v5270_v5 = vmul.f32 %v126_v34, %v126_v34  ;;  %v5278_v32 = vadd.f32 1.0, %v259_v11 }
 0x139   :  { %v5280_v1 = vadd.f32 1.0, %v260_v3  ;;  %v5283_v42 = vadd.f32 1.0, %v5233_v6  ;;  %v5286_v56 = vadd.f32 1.0, %v5238_v48  ;;  %v5289_v8 = vadd.f32 1.0, %v5243_v38 }
 0x13a   :  { %v5291_v2 = vadd.f32 1.0, %v264_v29  ;;  %v5293_v50 = vadd.f32 1.0, %v265_v4  ;;  %v5295_v47 = vadd.f32 1.0, %v266_v31  ;;  %v5297_v34 = vmul.f32 %v127_v46, %v127_v46 }
 0x13b   :  { %v515_v28 = vadd.f32 1e-07, %v5278_v32  ;;  %v516_v51 = vadd.f32 1e-07, %v5280_v1  ;;  %v517_v52 = vadd.f32 1e-07, %v5283_v42  ;;  %v5302_v54 = vmul.f32 %v128_v59, %v128_v59 }
 0x13c   :  { %v5304_v33 = vmul.f32 %v129_v23, %v129_v23  ;;  %v5306_v61 = vmul.f32 %v130_v57, %v130_v57  ;;  %v518_v24 = vadd.f32 1e-07, %v5286_v56  ;;  %v519_v53 = vadd.f32 1e-07, %v5289_v8 }
 0x13d   :  { %v520_v49 = vadd.f32 1e-07, %v5291_v2  ;;  %2576 = vrcp.f32 %v515_v28  ;;  %v5311_v46 = vmul.f32 %v259_v11, %v259_v11  ;;  %v521_v62 = vadd.f32 1e-07, %v5293_v50 }
 0x13e   :  { %v2561_v44 = vpop.eup %2560  ;;  %v522_v40 = vadd.f32 1e-07, %v5295_v47  ;;  %2578 = vrcp.f32 %v516_v51  ;;  %v5315_v59 = vmul.f32 %v260_v3, %v260_v3  ;;  %v5320_v15 = vmul.f32 %v5233_v6, %v5233_v6 }
 0x13f   :  { %v2563_v23 = vpop.eup %2562  ;;  %v748_v57 = vmul.f32 %v2561_v44, %v5140_v43  ;;  %2580 = vrcp.f32 %v517_v52  ;;  %v5324_v11 = vmul.f32 %v5238_v48, %v5238_v48  ;;  %v5329_v51 = vmul.f32 %v5243_v38, %v5243_v38  ;;  %v5336_v44 = vld [vmem:[%s6491_s0 + $0x3c0] sm:$0xff] }
 0x140   :  { %v2565_v28 = vpop.eup %2564  ;;  %v750_v12 = vmul.f32 %v2563_v23, %v5143_v45  ;;  %2582 = vrcp.f32 %v518_v24  ;;  %v5331_v3 = vmul.f32 %v264_v29, %v264_v29  ;;  %v5341_v6 = vmul.f32 %v265_v4, %v265_v4 }
 0x141   :  { %v2567_v52 = vpop.eup %2566  ;;  %v752_v43 = vmul.f32 %v2565_v28, %v5157_v20  ;;  %v5339_v48 = vmul.f32 %v748_v57, %v748_v57  ;;  %2584 = vrcp.f32 %v519_v53  ;;  %v5346_v29 = vmul.f32 %v266_v31, %v266_v31  ;;  %v5367_v31 = vld [vmem:[%s6491_s0 + $0x3c8] sm:$0xff]  ;;  %v5384_v28 = vld [vmem:[%s6491_s0 + $0x3d8] sm:$0xff] }
 0x142   :  { %v2569_v45 = vpop.eup %2568  ;;  %v754_v24 = vmul.f32 %v2567_v52, %v5163_v55  ;;  %v5344_v23 = vmul.f32 %v750_v12, %v750_v12  ;;  %2586 = vrcp.f32 %v520_v49  ;;  %v5355_v53 = vmul.f32 %v5336_v44, %v5336_v44 }
 0x143   :  { %v2571_v38 = vpop.eup %2570  ;;  %v756_v30 = vmul.f32 %v2569_v45, %v5166_v60  ;;  %v5349_v35 = vmul.f32 %v752_v43, %v752_v43  ;;  %v1947_v20 = vmul.f32 %v5196_v37, %v5339_v48  ;;  %v1547_v60 = vmul.f32 %v5249_v13, %v5339_v48  ;;  %v5372_v37 = vld [vmem:[%s6491_s0 + $0x3d0] sm:$0xff] }
 0x144   :  { %v2573_v4 = vpop.eup %2572  ;;  %v758_v55 = vmul.f32 %v2571_v38, %v5169_v36  ;;  %v5358_v12 = vmul.f32 %v754_v24, %v754_v24  ;;  %v1948_v49 = vmul.f32 %v5209_v26, %v5344_v23  ;;  %v1548_v13 = vmul.f32 %v5266_v0, %v5344_v23 }
 0x145   :  { %v2575_v57 = vpop.eup %2574  ;;  %v760_v36 = vmul.f32 %v2573_v4, %v5174_v14  ;;  %v5375_v38 = vmul.f32 %v756_v30, %v756_v30  ;;  %v1949_v26 = vmul.f32 %v5211_v58, %v5349_v35  ;;  %v1549_v58 = vmul.f32 %v5268_v16, %v5349_v35 }
 0x146   :  { %v762_v52 = vmul.f32 %v2575_v57, %v5179_v7  ;;  %v5387_v43 = vmul.f32 %v758_v55, %v758_v55  ;;  %v1950_v14 = vmul.f32 %v5213_v9, %v5358_v12  ;;  %v2089_v30 = vadd.f32 %v1948_v49, %v1947_v20 }
 0x147   :  { %v5391_v45 = vmul.f32 %v760_v36, %v760_v36  ;;  %v1428_v0 = vmul.f32 %v5367_v31, %v5367_v31  ;;  %v1429_v24 = vmul.f32 %v5372_v37, %v5372_v37  ;;  %v1951_v7 = vmul.f32 %v5226_v27, %v5375_v38 }
 0x148   :  { %6711 = vst [vmem:[#allocation110_spill] sm:$0xff] %v5387_v43  ;;  %v5399_v4 = vmul.f32 %v762_v52, %v762_v52  ;;  %v2090_v55 = vadd.f32 %v2089_v30, %v1949_v26  ;;  %v5405_v9 = vmul.f32 %v5384_v28, %v5384_v28  ;;  %v1550_v20 = vmul.f32 %v5270_v5, %v5358_v12  ;;  %v5418_v26 = vld [vmem:[%s6491_s0 + $0x3e0] sm:$0xff] }
 0x149   :  { %6712 = vst [vmem:[#allocation111_spill] sm:$0xff] %v5391_v45  ;;  %v1551_v16 = vmul.f32 %v5297_v34, %v5375_v38  ;;  %v1689_v49 = vadd.f32 %v1548_v13, %v1547_v60  ;;  %2588 = vrcp.f32 %v521_v62  ;;  %v1952_v36 = vmul.f32 %v5228_v25, %v5387_v43 }
 0x14a   :  { %v2577_v57 = vpop.eup %2576  ;;  %v2091_v52 = vadd.f32 %v2090_v55, %v1950_v14  ;;  %v1552_v27 = vmul.f32 %v5302_v54, %v5387_v43  ;;  %2590 = vrcp.f32 %v522_v40  ;;  %v1953_v34 = vmul.f32 %v5245_v21, %v5391_v45  ;;  %v5428_v54 = vld [vmem:[%s6491_s0 + $0x3e8] sm:$0xff] }
 0x14b   :  { %v2579_v5 = vpop.eup %2578  ;;  %v1553_v62 = vmul.f32 %v5304_v33, %v5391_v45  ;;  %v1690_v60 = vadd.f32 %v1689_v49, %v1549_v58  ;;  %v764_v25 = vmul.f32 %v2577_v57, %v5278_v32  ;;  %v1954_v13 = vmul.f32 %v5247_v19, %v5399_v4 }
 0x14c   :  { %v2581_v40 = vpop.eup %2580  ;;  %v2092_v14 = vadd.f32 %v2091_v52, %v1951_v7  ;;  %v1554_v30 = vmul.f32 %v5306_v61, %v5399_v4  ;;  %v766_v21 = vmul.f32 %v2579_v5, %v5280_v1  ;;  %v1431_v49 = vmul.f32 %v5418_v26, %v5418_v26 }
 0x14d   :  { %v2583_v55 = vpop.eup %2582  ;;  %v1691_v33 = vadd.f32 %v1690_v60, %v1550_v20  ;;  %v768_v58 = vmul.f32 %v2581_v40, %v5283_v42  ;;  %v5436_v32 = vmul.f32 %v764_v25, %v764_v25  ;;  %v1432_v61 = vmul.f32 %v5428_v54, %v5428_v54  ;;  %v5458_v25 = vld [vmem:[%s6491_s0 + $0x3f0] sm:$0xff] }
 0x14e   :  { %v2585_v57 = vpop.eup %2584  ;;  %v2093_v45 = vadd.f32 %v2092_v14, %v1952_v36  ;;  %v770_v43 = vmul.f32 %v2583_v55, %v5286_v56  ;;  %v5441_v19 = vmul.f32 %v766_v21, %v766_v21  ;;  %v1433_v14 = vmul.f32 %v5458_v25, %v5458_v25 }
 0x14f   :  { %v2587_v7 = vpop.eup %2586  ;;  %v1692_v1 = vadd.f32 %v1691_v33, %v1551_v16  ;;  %v772_v20 = vmul.f32 %v2585_v57, %v5289_v8  ;;  %v5446_v52 = vmul.f32 %v768_v58, %v768_v58  ;;  %v1955_v42 = vmul.f32 %v5311_v46, %v5436_v32 }
 0x150   :  { %v2094_v5 = vadd.f32 %v2093_v45, %v1953_v34  ;;  %v774_v60 = vmul.f32 %v2587_v7, %v5291_v2  ;;  %v5451_v36 = vmul.f32 %v770_v43, %v770_v43  ;;  %v1956_v56 = vmul.f32 %v5315_v59, %v5441_v19  ;;  %v5473_v34 = vld [vmem:[%s6491_s0 + $0x3f8] sm:$0xff] }
 0x151   :  { %v1693_v16 = vadd.f32 %v1692_v1, %v1552_v27  ;;  %v5460_v8 = vmul.f32 %v772_v20, %v772_v20  ;;  %v1957_v40 = vmul.f32 %v5320_v15, %v5446_v52  ;;  %v1555_v46 = vmul.f32 %v5355_v53, %v5436_v32 }
 0x152   :  { %v2095_v2 = vadd.f32 %v2094_v5, %v1954_v13  ;;  %v5466_v43 = vmul.f32 %v774_v60, %v774_v60  ;;  %v1958_v59 = vmul.f32 %v5324_v11, %v5451_v36  ;;  %v2098_v45 = vadd.f32 %v1956_v56, %v1955_v42  ;;  %v2656_v11 = vld [vmem:[%s6490_s1 + $0x40] sm:$0xff]  ;;  %v2660_v60 = vld [vmem:[%s6490_s1 + $0x50] sm:$0xff] }
 0x153   :  { %v1694_v27 = vadd.f32 %v1693_v16, %v1553_v62  ;;  %v1556_v15 = vmul.f32 %v1428_v0, %v5441_v19  ;;  %v1557_v53 = vmul.f32 %v1429_v24, %v5446_v52  ;;  %v1959_v13 = vmul.f32 %v5329_v51, %v5460_v8  ;;  %v2657_v62 = vld [vmem:[%s6491_s0 + $0x40] sm:$0xff]  ;;  %v2658_v0 = vld [vmem:[%s6490_s1 + $0x48] sm:$0xff] }
 0x154   :  { %2096 = vadd.xlane.f32.xlu1 %v2095_v2  ;;  %v2099_v21 = vadd.f32 %v2098_v45, %v1957_v40  ;;  %v915_v55 = vmul.f32 %v2657_v62, %v2656_v11  ;;  %v2659_v24 = vld [vmem:[%s6491_s0 + $0x48] sm:$0xff]  ;;  %v1434_v58 = vmul.f32 %v5473_v34, %v5473_v34  ;;  %v1558_v57 = vmul.f32 %v5405_v9, %v5451_v36 }
 0x155   :  { %v916_v33 = vmul.f32 %v2659_v24, %v2658_v0  ;;  %v1695_v51 = vadd.f32 %v1694_v27, %v1554_v30  ;;  %v1698_v7 = vadd.f32 %v1556_v15, %v1555_v46  ;;  %v1960_v20 = vmul.f32 %v5331_v3, %v5466_v43  ;;  %v2661_v30 = vld [vmem:[%s6491_s0 + $0x50] sm:$0xff]  ;;  %v2662_v3 = vld [vmem:[%s6490_s1 + $0x58] sm:$0xff] }
 0x156   :  { %v2589_v1 = vpop.eup %2588  ;;  %v2100_v42 = vadd.f32 %v2099_v21, %v1958_v59  ;;  %v1559_v5 = vmul.f32 %v1431_v49, %v5460_v8  ;;  %v917_v56 = vmul.f32 %v2661_v30, %v2660_v60  ;;  %v1560_v40 = vmul.f32 %v1432_v61, %v5466_v43  ;;  %v2663_v49 = vld [vmem:[%s6491_s0 + $0x58] sm:$0xff]  ;;  %v2665_v21 = vld [vmem:[%s6491_s0 + $0x60] sm:$0xff]  ;;  %v2669_v0 = vld [vmem:[%s6491_s0 + $0x70] sm:$0xff] }
 0x157   :  { %v2591_v16 = vpop.eup %2590  ;;  %1696 = vadd.xlane.f32.xlu0 %v1695_v51  ;;  %v776_v9 = vmul.f32 %v2589_v1, %v5293_v50  ;;  %v1699_v46 = vadd.f32 %v1698_v7, %v1557_v53  ;;  %v918_v2 = vmul.f32 %v2663_v49, %v2662_v3  ;;  %v1043_v27 = vmul.f32 %v915_v55, %v3195_v18  ;;  %v2664_v53 = vld [vmem:[%s6490_s1 + $0x60] sm:$0xff]  ;;  %v2667_v18 = vld [vmem:[%s6491_s0 + $0x68] sm:$0xff]  ;;  %v2668_v55 = vld [vmem:[%s6490_s1 + $0x70] sm:$0xff] }
 0x158   :  { %v778_v59 = vmul.f32 %v2591_v16, %v5295_v47  ;;  %v2101_v45 = vadd.f32 %v2100_v42, %v1959_v13  ;;  %v1044_v15 = vmul.f32 %v916_v33, %v3200_v63  ;;  %v919_v11 = vmul.f32 %v2665_v21, %v2664_v53  ;;  %v2666_v47 = vld [vmem:[%s6490_s1 + $0x68] sm:$0xff]  ;;  %v2670_v1 = vld [vmem:[%s6490_s1 + $0x78] sm:$0xff]  ;;  %v2673_v16 = vld [vmem:[%s6491_s0] sm:$0xff] }
 0x159   :  { %v5517_v50 = vmul.f32 %v776_v9, %v776_v9  ;;  %v1700_v61 = vadd.f32 %v1699_v46, %v1558_v57  ;;  %v920_v63 = vmul.f32 %v2667_v18, %v2666_v47  ;;  %v921_v24 = vmul.f32 %v2669_v0, %v2668_v55  ;;  %v2676_v3 = vld [vmem:[%s6490_s1 + $0x10] sm:$0xff]  ;;  %v2680_v53 = vld [vmem:[%s6490_s1 + $0x20] sm:$0xff]  ;;  %v2682_v18 = vld [vmem:[%s6490_s1 + $0x28] sm:$0xff] }
 0x15a   :  { %v5531_v13 = vmul.f32 %v778_v59, %v778_v59  ;;  %v2102_v62 = vadd.f32 %v2101_v45, %v1960_v20  ;;  %v1045_v33 = vmul.f32 %v917_v56, %v3203_v22  ;;  %v2671_v20 = vld [vmem:[%s6491_s0 + $0x78] sm:$0xff]  ;;  %v1046_v30 = vmul.f32 %v918_v2, %v3208_v17  ;;  %v2675_v17 = vld [vmem:[%s6491_s0 + $0x8] sm:$0xff]  ;;  %v2677_v49 = vld [vmem:[%s6491_s0 + $0x10] sm:$0xff] }
 0x15b   :  { %v1961_v51 = vmul.f32 %v5341_v6, %v5517_v50  ;;  %v1561_v57 = vmul.f32 %v1433_v14, %v5517_v50  ;;  %v1701_v7 = vadd.f32 %v1700_v61, %v1559_v5  ;;  %v922_v42 = vmul.f32 %v2671_v20, %v2670_v1  ;;  %v2672_v5 = vld [vmem:[%s6490_s1] sm:$0xff]  ;;  %v2678_v59 = vld [vmem:[%s6490_s1 + $0x18] sm:$0xff]  ;;  %v6714_v0 = vld [vmem:[#allocation3_spill] sm:$0xff] }
 0x15c   :  { %v1962_v60 = vmul.f32 %v5346_v29, %v5531_v13  ;;  %v1562_v22 = vmul.f32 %v1434_v58, %v5531_v13  ;;  %v1172_v6 = vadd.f32 %v1044_v15, %v1043_v27  ;;  %v907_v9 = vmul.f32 %v2673_v16, %v2672_v5  ;;  %v2674_v29 = vld [vmem:[%s6490_s1 + $0x8] sm:$0xff]  ;;  %v2679_v45 = vld [vmem:[%s6491_s0 + $0x18] sm:$0xff]  ;;  %v2681_v21 = vld [vmem:[%s6491_s0 + $0x20] sm:$0xff] }
 0x15d   :  { %v2103_v56 = vadd.f32 %v2102_v62, %v1961_v51  ;;  %v1702_v14 = vadd.f32 %v1701_v7, %v1560_v40  ;;  %v908_v58 = vmul.f32 %v2675_v17, %v2674_v29  ;;  %v1047_v40 = vmul.f32 %v919_v11, %v3213_v39  ;;  %v2683_v62 = vld [vmem:[%s6491_s0 + $0x28] sm:$0xff]  ;;  %v6718_v16 = vld [vmem:[#allocation5_spill] sm:$0xff]  ;;  %v2688_v17 = vld [vmem:[%s6490_s1 + $0xc0] sm:$0xff] }
 0x15e   :  { %v1173_v46 = vadd.f32 %v1172_v6, %v1045_v33  ;;  %v909_v2 = vmul.f32 %v2677_v49, %v2676_v3  ;;  %v910_v27 = vmul.f32 %v2679_v45, %v2678_v59  ;;  %v1048_v61 = vmul.f32 %v920_v63, %v3223_v10  ;;  %v6713_v10 = vld [vmem:[#allocation2_spill] sm:$0xff]  ;;  %v6716_v1 = vld [vmem:[#allocation11_spill] sm:$0xff]  ;;  %v2693_v59 = vld [vmem:[%s6491_s0 + $0xd0] sm:$0xff] }
 0x15f   :  { %v2104_v39 = vadd.f32 %v2103_v56, %v1962_v60  ;;  %v1703_v15 = vadd.f32 %v1702_v14, %v1561_v57  ;;  %v911_v11 = vmul.f32 %v2681_v21, %v2680_v53  ;;  %v912_v55 = vmul.f32 %v2683_v62, %v2682_v18  ;;  %v6715_v57 = vld [vmem:[#allocation10_spill] sm:$0xff]  ;;  %v6717_v60 = vld [vmem:[#allocation4_spill] sm:$0xff]  ;;  %v2691_v3 = vld [vmem:[%s6491_s0 + $0xc8] sm:$0xff] }
 0x160   :  { %v1174_v47 = vadd.f32 %v1173_v46, %v1046_v30  ;;  %v1035_v63 = vmul.f32 %v907_v9, %v6713_v10  ;;  %v1036_v33 = vmul.f32 %v908_v58, %v6714_v0  ;;  %v1049_v7 = vmul.f32 %v921_v24, %v6715_v57  ;;  %v2684_v56 = vld [vmem:[%s6490_s1 + $0x30] sm:$0xff]  ;;  %v2687_v24 = vld [vmem:[%s6491_s0 + $0x38] sm:$0xff]  ;;  %v2689_v58 = vld [vmem:[%s6491_s0 + $0xc0] sm:$0xff] }
 0x161   :  { %2105 = vadd.xlane.f32.xlu1 %v2104_v39  ;;  %v1704_v51 = vadd.f32 %v1703_v15, %v1562_v22  ;;  %v1050_v20 = vmul.f32 %v922_v42, %v6716_v1  ;;  %v1037_v30 = vmul.f32 %v909_v2, %v6717_v60  ;;  %v2685_v14 = vld [vmem:[%s6491_s0 + $0x30] sm:$0xff]  ;;  %v2686_v22 = vld [vmem:[%s6490_s1 + $0x38] sm:$0xff]  ;;  %v1038_v9 = vmul.f32 %v910_v27, %v6718_v16  ;;  %v2690_v46 = vld [vmem:[%s6490_s1 + $0xc8] sm:$0xff] }
 0x162   :  { %v1175_v6 = vadd.f32 %v1174_v47, %v1047_v40  ;;  %v913_v5 = vmul.f32 %v2685_v14, %v2684_v56  ;;  %v914_v42 = vmul.f32 %v2687_v24, %v2686_v22  ;;  %v1163_v29 = vadd.f32 %v1036_v33, %v1035_v63  ;;  %v2692_v2 = vld [vmem:[%s6490_s1 + $0xd0] sm:$0xff]  ;;  %v6719_v39 = vld [vmem:[#allocation6_spill] sm:$0xff]  ;;  %v6720_v53 = vld [vmem:[#allocation7_spill] sm:$0xff] }
 0x163   :  { %1705 = vadd.xlane.f32.xlu0 %v1704_v51  ;;  %v931_v40 = vmul.f32 %v2689_v58, %v2688_v17  ;;  %v932_v49 = vmul.f32 %v2691_v3, %v2690_v46  ;;  %v933_v45 = vmul.f32 %v2693_v59, %v2692_v2  ;;  %v1039_v15 = vmul.f32 %v911_v11, %v6719_v39  ;;  %v2694_v47 = vld [vmem:[%s6490_s1 + $0xd8] sm:$0xff]  ;;  %v2696_v63 = vld [vmem:[%s6490_s1 + $0xe0] sm:$0xff]  ;;  %v2699_v0 = vld [vmem:[%s6491_s0 + $0xe8] sm:$0xff] }
 0x164   :  { %v1176_v27 = vadd.f32 %v1175_v6, %v1048_v61  ;;  %v1040_v21 = vmul.f32 %v912_v55, %v6720_v53  ;;  %v2695_v18 = vld [vmem:[%s6491_s0 + $0xd8] sm:$0xff]  ;;  %v1164_v10 = vadd.f32 %v1163_v29, %v1037_v30  ;;  %v2697_v61 = vld [vmem:[%s6491_s0 + $0xe0] sm:$0xff]  ;;  %v2698_v55 = vld [vmem:[%s6490_s1 + $0xe8] sm:$0xff]  ;;  %vm2300_vm10 = vcmask 786112  }
 0x165   :  { %v934_v62 = vmul.f32 %v2695_v18, %v2694_v47  ;;  %v935_v11 = vmul.f32 %v2697_v61, %v2696_v63  ;;  %v936_v33 = vmul.f32 %v2699_v0, %v2698_v55  ;;  %v6721_v51 = vld [vmem:[#allocation20_spill] sm:$0xff]  ;;  %v6722_v56 = vld [vmem:[#allocation21_spill] sm:$0xff]  ;;  %v6723_v22 = vld [vmem:[#allocation22_spill] sm:$0xff]  ;;  %vm2307_vm11 = vcmask 851712  }
 0x166   :  { %v1059_v57 = vmul.f32 %v931_v40, %v6721_v51  ;;  %v1177_v1 = vadd.f32 %v1176_v27, %v1049_v7  ;;  %v2700_v60 = vld [vmem:[%s6490_s1 + $0xf0] sm:$0xff]  ;;  %v1060_v14 = vmul.f32 %v932_v49, %v6722_v56  ;;  %v1061_v24 = vmul.f32 %v933_v45, %v6723_v22  ;;  %v6725_v17 = vld [vmem:[#allocation9_spill] sm:$0xff]  ;;  %v6726_v59 = vld [vmem:[#allocation23_spill] sm:$0xff] }
 0x167   :  { %v2701_v30 = vld [vmem:[%s6491_s0 + $0xf0] sm:$0xff]  ;;  %v1042_v58 = vmul.f32 %v914_v42, %v6725_v17  ;;  %v1165_v46 = vadd.f32 %v1164_v10, %v1038_v9  ;;  %v2702_v7 = vld [vmem:[%s6490_s1 + $0xf8] sm:$0xff]  ;;  %v1062_v27 = vmul.f32 %v934_v62, %v6726_v59  ;;  %v2705_v42 = vld [vmem:[%s6491_s0 + $0x80] sm:$0xff]  ;;  %vm2314_vm12 = vcmask 917312  }
 0x168   :  { %v937_v6 = vmul.f32 %v2701_v30, %v2700_v60  ;;  %v6724_v16 = vld [vmem:[#allocation8_spill] sm:$0xff]  ;;  %v2703_v40 = vld [vmem:[%s6491_s0 + $0xf8] sm:$0xff]  ;;  %v1178_v2 = vadd.f32 %v1177_v1, %v1050_v20  ;;  %v1190_v49 = vadd.f32 %v1060_v14, %v1059_v57  ;;  %v2706_v39 = vld [vmem:[%s6490_s1 + $0x88] sm:$0xff]  ;;  %vm2321_vm13 = vcmask 982912  }
 0x169   :  { %v1041_v29 = vmul.f32 %v913_v5, %v6724_v16  ;;  %v938_v3 = vmul.f32 %v2703_v40, %v2702_v7  ;;  %v2704_v5 = vld [vmem:[%s6490_s1 + $0x80] sm:$0xff]  ;;  %v1166_v45 = vadd.f32 %v1165_v46, %v1039_v15  ;;  %v2707_v20 = vld [vmem:[%s6491_s0 + $0x88] sm:$0xff]  ;;  %v2708_v47 = vld [vmem:[%s6490_s1 + $0x90] sm:$0xff]  ;;  %vm2328_vm14 = vcmask 1048512  }
 0x16a   :  { %v923_v9 = vmul.f32 %v2705_v42, %v2704_v5  ;;  %v924_v53 = vmul.f32 %v2707_v20, %v2706_v39  ;;  %v2709_v18 = vld [vmem:[%s6491_s0 + $0x90] sm:$0xff]  ;;  %v2710_v15 = vld [vmem:[%s6490_s1 + $0x98] sm:$0xff]  ;;  %1179 = vadd.xlane.f32.xlu1 %v1178_v2  ;;  %v6729_v57 = vld [vmem:[#allocation26_spill] sm:$0xff]  ;;  %v1191_v60 = vadd.f32 %v1190_v49, %v1061_v24 }
 0x16b   :  { %v925_v62 = vmul.f32 %v2709_v18, %v2708_v47  ;;  %v2711_v10 = vld [vmem:[%s6491_s0 + $0x98] sm:$0xff]  ;;  %v6727_v61 = vld [vmem:[#allocation24_spill] sm:$0xff]  ;;  %v1065_v1 = vmul.f32 %v937_v6, %v6729_v57  ;;  %v1167_v30 = vadd.f32 %v1166_v45, %v1040_v21  ;;  %v2712_v56 = vld [vmem:[%s6490_s1 + $0xa0] sm:$0xff] }
 0x16c   :  { %v926_v63 = vmul.f32 %v2711_v10, %v2710_v15  ;;  %v1063_v55 = vmul.f32 %v935_v11, %v6727_v61  ;;  %v6728_v0 = vld [vmem:[#allocation25_spill] sm:$0xff]  ;;  %v2713_v14 = vld [vmem:[%s6491_s0 + $0xa0] sm:$0xff]  ;;  %v6730_v16 = vld [vmem:[#allocation12_spill] sm:$0xff]  ;;  %v1192_v11 = vadd.f32 %v1191_v60, %v1062_v27 }
 0x16d   :  { %v1064_v51 = vmul.f32 %v936_v33, %v6728_v0  ;;  %v927_v22 = vmul.f32 %v2713_v14, %v2712_v56  ;;  %v1051_v17 = vmul.f32 %v923_v9, %v6730_v16  ;;  %v6731_v46 = vld [vmem:[#allocation13_spill] sm:$0xff]  ;;  %v2714_v33 = vld [vmem:[%s6490_s1 + $0xa8] sm:$0xff]  ;;  %v2716_v24 = vld [vmem:[%s6490_s1 + $0xb0] sm:$0xff]  ;;  %v1168_v49 = vadd.f32 %v1167_v30, %v1041_v29 }
 0x16e   :  { %v1052_v7 = vmul.f32 %v924_v53, %v6731_v46  ;;  %v2715_v21 = vld [vmem:[%s6491_s0 + $0xa8] sm:$0xff]  ;;  %v2717_v40 = vld [vmem:[%s6491_s0 + $0xb0] sm:$0xff]  ;;  %v6732_v59 = vld [vmem:[#allocation14_spill] sm:$0xff]  ;;  %v1193_v47 = vadd.f32 %v1192_v11, %v1063_v55 }
 0x16f   :  { %v928_v6 = vmul.f32 %v2715_v21, %v2714_v33  ;;  %v929_v2 = vmul.f32 %v2717_v40, %v2716_v24  ;;  %v1053_v27 = vmul.f32 %v925_v62, %v6732_v59  ;;  %v6733_v5 = vld [vmem:[#allocation27_spill] sm:$0xff]  ;;  %v2718_v9 = vld [vmem:[%s6490_s1 + $0xb8] sm:$0xff]  ;;  %v2720_v62 = vld [vmem:[%s6490_s1 + $0x140] sm:$0xff]  ;;  %v1169_v61 = vadd.f32 %v1168_v49, %v1042_v58 }
 0x170   :  { %v1066_v42 = vmul.f32 %v938_v3, %v6733_v5  ;;  %v2719_v45 = vld [vmem:[%s6491_s0 + $0xb8] sm:$0xff]  ;;  %v6734_v20 = vld [vmem:[#allocation15_spill] sm:$0xff]  ;;  %v1181_v18 = vadd.f32 %v1052_v7, %v1051_v17  ;;  %v2721_v29 = vld [vmem:[%s6491_s0 + $0x140] sm:$0xff]  ;;  %v1194_v16 = vadd.f32 %v1193_v47, %v1064_v51 }
 0x171   :  { %v930_v39 = vmul.f32 %v2719_v45, %v2718_v9  ;;  %v1054_v53 = vmul.f32 %v926_v63, %v6734_v20  ;;  %v947_v3 = vmul.f32 %v2721_v29, %v2720_v62  ;;  %v2722_v15 = vld [vmem:[%s6490_s1 + $0x148] sm:$0xff]  ;;  %v6735_v55 = vld [vmem:[#allocation16_spill] sm:$0xff]  ;;  %v2726_v56 = vld [vmem:[%s6490_s1 + $0x158] sm:$0xff]  ;;  %1170 = vadd.xlane.f32.xlu0 %v1169_v61 }
 0x172   :  { %v2723_v10 = vld [vmem:[%s6491_s0 + $0x148] sm:$0xff]  ;;  %v1055_v0 = vmul.f32 %v927_v22, %v6735_v55  ;;  %v2724_v57 = vld [vmem:[%s6490_s1 + $0x150] sm:$0xff]  ;;  %v2727_v14 = vld [vmem:[%s6491_s0 + $0x158] sm:$0xff]  ;;  %v1182_v11 = vadd.f32 %v1181_v18, %v1053_v27 }
 0x173   :  { %v948_v63 = vmul.f32 %v2723_v10, %v2722_v15  ;;  %v2725_v60 = vld [vmem:[%s6491_s0 + $0x150] sm:$0xff]  ;;  %v950_v58 = vmul.f32 %v2727_v14, %v2726_v56  ;;  %v6736_v22 = vld [vmem:[#allocation17_spill] sm:$0xff]  ;;  %v6737_v46 = vld [vmem:[#allocation18_spill] sm:$0xff] }
 0x174   :  { %v949_v30 = vmul.f32 %v2725_v60, %v2724_v57  ;;  %v1056_v17 = vmul.f32 %v928_v6, %v6736_v22  ;;  %v1057_v7 = vmul.f32 %v929_v2, %v6737_v46  ;;  %v2728_v33 = vld [vmem:[%s6490_s1 + $0x160] sm:$0xff]  ;;  %v6738_v40 = vld [vmem:[#allocation36_spill] sm:$0xff]  ;;  %v6739_v49 = vld [vmem:[#allocation37_spill] sm:$0xff]  ;;  %v1195_v6 = vadd.f32 %v1194_v16, %v1065_v1 }
 0x175   :  { %v2729_v21 = vld [vmem:[%s6491_s0 + $0x160] sm:$0xff]  ;;  %v1075_v59 = vmul.f32 %v947_v3, %v6738_v40  ;;  %v1076_v5 = vmul.f32 %v948_v63, %v6739_v49  ;;  %v1183_v45 = vadd.f32 %v1182_v11, %v1054_v53  ;;  %v2730_v2 = vld [vmem:[%s6490_s1 + $0x168] sm:$0xff]  ;;  %v2732_v47 = vld [vmem:[%s6490_s1 + $0x170] sm:$0xff] }
 0x176   :  { %v951_v24 = vmul.f32 %v2729_v21, %v2728_v33  ;;  %v6740_v51 = vld [vmem:[#allocation38_spill] sm:$0xff]  ;;  %v2731_v27 = vld [vmem:[%s6491_s0 + $0x168] sm:$0xff]  ;;  %v2733_v18 = vld [vmem:[%s6491_s0 + $0x170] sm:$0xff]  ;;  %v1196_v55 = vadd.f32 %v1195_v6, %v1066_v42 }
 0x177   :  { %v1077_v9 = vmul.f32 %v949_v30, %v6740_v51  ;;  %v952_v20 = vmul.f32 %v2731_v27, %v2730_v2  ;;  %v953_v62 = vmul.f32 %v2733_v18, %v2732_v47  ;;  %v6741_v1 = vld [vmem:[#allocation19_spill] sm:$0xff]  ;;  %v2734_v29 = vld [vmem:[%s6490_s1 + $0x178] sm:$0xff]  ;;  %v1208_v61 = vadd.f32 %v1076_v5, %v1075_v59  ;;  %v2736_v60 = vld [vmem:[%s6490_s1 + $0x100] sm:$0xff] }
 0x178   :  { %v1058_v53 = vmul.f32 %v930_v39, %v6741_v1  ;;  %v2735_v3 = vld [vmem:[%s6491_s0 + $0x178] sm:$0xff]  ;;  %v6742_v10 = vld [vmem:[#allocation39_spill] sm:$0xff]  ;;  %v1184_v57 = vadd.f32 %v1183_v45, %v1055_v0  ;;  %v2737_v39 = vld [vmem:[%s6491_s0 + $0x100] sm:$0xff]  ;;  %1197 = vadd.xlane.f32.xlu1 %v1196_v55 }
 0x179   :  { %v954_v15 = vmul.f32 %v2735_v3, %v2734_v29  ;;  %v1078_v63 = vmul.f32 %v950_v58, %v6742_v10  ;;  %v939_v30 = vmul.f32 %v2737_v39, %v2736_v60  ;;  %v2738_v56 = vld [vmem:[%s6490_s1 + $0x108] sm:$0xff]  ;;  %v6743_v42 = vld [vmem:[#allocation40_spill] sm:$0xff]  ;;  %v1209_v16 = vadd.f32 %v1208_v61, %v1077_v9  ;;  %v2742_v33 = vld [vmem:[%s6490_s1 + $0x118] sm:$0xff] }
 0x17a   :  { %v2739_v14 = vld [vmem:[%s6491_s0 + $0x108] sm:$0xff]  ;;  %v1079_v0 = vmul.f32 %v951_v24, %v6743_v42  ;;  %v2740_v22 = vld [vmem:[%s6490_s1 + $0x110] sm:$0xff]  ;;  %v2743_v21 = vld [vmem:[%s6491_s0 + $0x118] sm:$0xff]  ;;  %v1185_v24 = vadd.f32 %v1184_v57, %v1056_v17 }
 0x17b   :  { %v940_v58 = vmul.f32 %v2739_v14, %v2738_v56  ;;  %v2741_v46 = vld [vmem:[%s6491_s0 + $0x110] sm:$0xff]  ;;  %v942_v40 = vmul.f32 %v2743_v21, %v2742_v33  ;;  %v6744_v59 = vld [vmem:[#allocation41_spill] sm:$0xff]  ;;  %v6745_v5 = vld [vmem:[#allocation42_spill] sm:$0xff]  ;;  %v1210_v2 = vadd.f32 %v1209_v16, %v1078_v63 }
 0x17c   :  { %v941_v11 = vmul.f32 %v2741_v46, %v2740_v22  ;;  %v1080_v49 = vmul.f32 %v952_v20, %v6744_v59  ;;  %v1081_v51 = vmul.f32 %v953_v62, %v6745_v5  ;;  %v2744_v9 = vld [vmem:[%s6490_s1 + $0x120] sm:$0xff]  ;;  %v6746_v27 = vld [vmem:[#allocation28_spill] sm:$0xff]  ;;  %v6747_v18 = vld [vmem:[#allocation29_spill] sm:$0xff]  ;;  %v1186_v3 = vadd.f32 %v1185_v24, %v1057_v7 }
 0x17d   :  { %v2745_v6 = vld [vmem:[%s6491_s0 + $0x120] sm:$0xff]  ;;  %v1067_v47 = vmul.f32 %v939_v30, %v6746_v27  ;;  %v1068_v1 = vmul.f32 %v940_v58, %v6747_v18  ;;  %v6749_v20 = vld [vmem:[#allocation43_spill] sm:$0xff]  ;;  %v2748_v63 = vld [vmem:[%s6490_s1 + $0x130] sm:$0xff]  ;;  %v1211_v60 = vadd.f32 %v1210_v2, %v1079_v0 }
 0x17e   :  { %v943_v45 = vmul.f32 %v2745_v6, %v2744_v9  ;;  %v6748_v29 = vld [vmem:[#allocation30_spill] sm:$0xff]  ;;  %v1082_v10 = vmul.f32 %v954_v15, %v6749_v20  ;;  %v2746_v62 = vld [vmem:[%s6490_s1 + $0x128] sm:$0xff]  ;;  %v2749_v57 = vld [vmem:[%s6491_s0 + $0x130] sm:$0xff]  ;;  %v1187_v42 = vadd.f32 %v1186_v3, %v1058_v53 }
 0x17f   :  { %v1069_v17 = vmul.f32 %v941_v11, %v6748_v29  ;;  %v2747_v61 = vld [vmem:[%s6491_s0 + $0x128] sm:$0xff]  ;;  %v945_v7 = vmul.f32 %v2749_v57, %v2748_v63  ;;  %v2750_v15 = vld [vmem:[%s6490_s1 + $0x138] sm:$0xff]  ;;  %v1199_v58 = vadd.f32 %v1068_v1, %v1067_v47  ;;  %v2752_v16 = vld [vmem:[%s6490_s1 + $0x1c0] sm:$0xff]  ;;  %v1212_v24 = vadd.f32 %v1211_v60, %v1080_v49 }
 0x180   :  { %v944_v55 = vmul.f32 %v2747_v61, %v2746_v62  ;;  %v2751_v39 = vld [vmem:[%s6491_s0 + $0x138] sm:$0xff]  ;;  %v6750_v56 = vld [vmem:[#allocation31_spill] sm:$0xff]  ;;  %v2753_v0 = vld [vmem:[%s6491_s0 + $0x1c0] sm:$0xff]  ;;  %1188 = vadd.xlane.f32.xlu0 %v1187_v42 }
 0x181   :  { %v946_v30 = vmul.f32 %v2751_v39, %v2750_v15  ;;  %v1070_v14 = vmul.f32 %v942_v40, %v6750_v56  ;;  %v963_v22 = vmul.f32 %v2753_v0, %v2752_v16  ;;  %v2754_v46 = vld [vmem:[%s6490_s1 + $0x1c8] sm:$0xff]  ;;  %v2756_v53 = vld [vmem:[%s6490_s1 + $0x1d0] sm:$0xff]  ;;  %v1200_v9 = vadd.f32 %v1199_v58, %v1069_v17  ;;  %v2758_v6 = vld [vmem:[%s6490_s1 + $0x1d8] sm:$0xff] }
 0x182   :  { %v2755_v11 = vld [vmem:[%s6491_s0 + $0x1c8] sm:$0xff]  ;;  %v2757_v21 = vld [vmem:[%s6491_s0 + $0x1d0] sm:$0xff]  ;;  %v2759_v2 = vld [vmem:[%s6491_s0 + $0x1d8] sm:$0xff]  ;;  %v1213_v61 = vadd.f32 %v1212_v24, %v1081_v51 }
 0x183   :  { %v964_v33 = vmul.f32 %v2755_v11, %v2754_v46  ;;  %v965_v40 = vmul.f32 %v2757_v21, %v2756_v53  ;;  %v6751_v59 = vld [vmem:[#allocation32_spill] sm:$0xff]  ;;  %v966_v27 = vmul.f32 %v2759_v2, %v2758_v6  ;;  %v6752_v47 = vld [vmem:[#allocation33_spill] sm:$0xff]  ;;  %v2760_v1 = vld [vmem:[%s6490_s1 + $0x1e0] sm:$0xff] }
 0x184   :  { %v1071_v5 = vmul.f32 %v943_v45, %v6751_v59  ;;  %v1072_v18 = vmul.f32 %v944_v55, %v6752_v47  ;;  %v2761_v49 = vld [vmem:[%s6491_s0 + $0x1e0] sm:$0xff]  ;;  %v2762_v29 = vld [vmem:[%s6490_s1 + $0x1e8] sm:$0xff]  ;;  %v6753_v20 = vld [vmem:[#allocation52_spill] sm:$0xff]  ;;  %v1201_v55 = vadd.f32 %v1200_v9, %v1070_v14 }
 0x185   :  { %v967_v45 = vmul.f32 %v2761_v49, %v2760_v1  ;;  %v2763_v17 = vld [vmem:[%s6491_s0 + $0x1e8] sm:$0xff]  ;;  %v1091_v62 = vmul.f32 %v963_v22, %v6753_v20  ;;  %v6754_v63 = vld [vmem:[#allocation53_spill] sm:$0xff]  ;;  %v6755_v60 = vld [vmem:[#allocation54_spill] sm:$0xff]  ;;  %v1214_v22 = vadd.f32 %v1213_v61, %v1082_v10 }
 0x186   :  { %v968_v3 = vmul.f32 %v2763_v17, %v2762_v29  ;;  %v1092_v57 = vmul.f32 %v964_v33, %v6754_v63  ;;  %v1093_v15 = vmul.f32 %v965_v40, %v6755_v60  ;;  %v6756_v39 = vld [vmem:[#allocation34_spill] sm:$0xff]  ;;  %v6757_v58 = vld [vmem:[#allocation35_spill] sm:$0xff]  ;;  %v2764_v16 = vld [vmem:[%s6490_s1 + $0x1f0] sm:$0xff] }
 0x187   :  { %v1073_v56 = vmul.f32 %v945_v7, %v6756_v39  ;;  %v1074_v42 = vmul.f32 %v946_v30, %v6757_v58  ;;  %v2765_v0 = vld [vmem:[%s6491_s0 + $0x1f0] sm:$0xff]  ;;  %v2766_v51 = vld [vmem:[%s6490_s1 + $0x1f8] sm:$0xff]  ;;  %v1202_v30 = vadd.f32 %v1201_v55, %v1071_v5  ;;  %v6758_v11 = vld [vmem:[#allocation55_spill] sm:$0xff]  ;;  %1215 = vadd.xlane.f32.xlu1 %v1214_v22 }
 0x188   :  { %v969_v46 = vmul.f32 %v2765_v0, %v2764_v16  ;;  %v2767_v14 = vld [vmem:[%s6491_s0 + $0x1f8] sm:$0xff]  ;;  %v1094_v33 = vmul.f32 %v966_v27, %v6758_v11  ;;  %v1226_v53 = vadd.f32 %v1092_v57, %v1091_v62  ;;  %v2768_v21 = vld [vmem:[%s6490_s1 + $0x180] sm:$0xff]  ;;  %v2770_v59 = vld [vmem:[%s6490_s1 + $0x188] sm:$0xff] }
 0x189   :  { %v970_v7 = vmul.f32 %v2767_v14, %v2766_v51  ;;  %v2769_v40 = vld [vmem:[%s6491_s0 + $0x180] sm:$0xff]  ;;  %v2771_v10 = vld [vmem:[%s6491_s0 + $0x188] sm:$0xff]  ;;  %v2772_v9 = vld [vmem:[%s6490_s1 + $0x190] sm:$0xff]  ;;  %v1203_v49 = vadd.f32 %v1202_v30, %v1072_v18 }
 0x18a   :  { %v955_v24 = vmul.f32 %v2769_v40, %v2768_v21  ;;  %v956_v5 = vmul.f32 %v2771_v10, %v2770_v59  ;;  %v2773_v6 = vld [vmem:[%s6491_s0 + $0x190] sm:$0xff]  ;;  %v2774_v27 = vld [vmem:[%s6490_s1 + $0x198] sm:$0xff]  ;;  %v1227_v61 = vadd.f32 %v1226_v53, %v1093_v15  ;;  %v2776_v55 = vld [vmem:[%s6490_s1 + $0x1a0] sm:$0xff] }
 0x18b   :  { %v957_v2 = vmul.f32 %v2773_v6, %v2772_v9  ;;  %v2775_v47 = vld [vmem:[%s6491_s0 + $0x198] sm:$0xff]  ;;  %v6759_v29 = vld [vmem:[#allocation56_spill] sm:$0xff]  ;;  %v2777_v63 = vld [vmem:[%s6491_s0 + $0x1a0] sm:$0xff]  ;;  %v1204_v16 = vadd.f32 %v1203_v49, %v1073_v56 }
 0x18c   :  { %v958_v1 = vmul.f32 %v2775_v47, %v2774_v27  ;;  %v1095_v17 = vmul.f32 %v967_v45, %v6759_v29  ;;  %v6760_v20 = vld [vmem:[#allocation57_spill] sm:$0xff]  ;;  %v959_v57 = vmul.f32 %v2777_v63, %v2776_v55  ;;  %v2778_v60 = vld [vmem:[%s6490_s1 + $0x1a8] sm:$0xff]  ;;  %v1228_v0 = vadd.f32 %v1227_v61, %v1094_v33  ;;  %v2780_v51 = vld [vmem:[%s6490_s1 + $0x1b0] sm:$0xff] }
 0x18d   :  { %v1096_v62 = vmul.f32 %v968_v3, %v6760_v20  ;;  %v2779_v18 = vld [vmem:[%s6491_s0 + $0x1a8] sm:$0xff]  ;;  %v6761_v3 = vld [vmem:[#allocation44_spill] sm:$0xff]  ;;  %v6762_v39 = vld [vmem:[#allocation45_spill] sm:$0xff]  ;;  %v1205_v9 = vadd.f32 %v1204_v16, %v1074_v42 }
 0x18e   :  { %v960_v45 = vmul.f32 %v2779_v18, %v2778_v60  ;;  %v1083_v15 = vmul.f32 %v955_v24, %v6761_v3  ;;  %v1084_v58 = vmul.f32 %v956_v5, %v6762_v39  ;;  %v2781_v14 = vld [vmem:[%s6491_s0 + $0x1b0] sm:$0xff]  ;;  %v6763_v30 = vld [vmem:[#allocation46_spill] sm:$0xff]  ;;  %v6765_v40 = vld [vmem:[#allocation59_spill] sm:$0xff]  ;;  %v1229_v6 = vadd.f32 %v1228_v0, %v1095_v17 }
 0x18f   :  { %v961_v22 = vmul.f32 %v2781_v14, %v2780_v51  ;;  %v1085_v11 = vmul.f32 %v957_v2, %v6763_v30  ;;  %v6764_v53 = vld [vmem:[#allocation58_spill] sm:$0xff]  ;;  %v1098_v59 = vmul.f32 %v970_v7, %v6765_v40  ;;  %v2782_v56 = vld [vmem:[%s6490_s1 + $0x1b8] sm:$0xff]  ;;  %v6766_v10 = vld [vmem:[#allocation47_spill] sm:$0xff]  ;;  %1206 = vadd.xlane.f32.xlu0 %v1205_v9 }
 0x190   :  { %v1097_v21 = vmul.f32 %v969_v46, %v6764_v53  ;;  %v2783_v33 = vld [vmem:[%s6491_s0 + $0x1b8] sm:$0xff]  ;;  %v1086_v5 = vmul.f32 %v958_v1, %v6766_v10  ;;  %v1217_v27 = vadd.f32 %v1084_v58, %v1083_v15  ;;  %v2784_v46 = vld [vmem:[%s6490_s1 + $0x240] sm:$0xff]  ;;  %v6767_v47 = vld [vmem:[#allocation48_spill] sm:$0xff]  ;;  %v1230_v60 = vadd.f32 %v1229_v6, %v1096_v62 }
 0x191   :  { %v962_v24 = vmul.f32 %v2783_v33, %v2782_v56  ;;  %v2785_v7 = vld [vmem:[%s6491_s0 + $0x240] sm:$0xff]  ;;  %v1087_v49 = vmul.f32 %v959_v57, %v6767_v47  ;;  %v2786_v29 = vld [vmem:[%s6490_s1 + $0x248] sm:$0xff]  ;;  %v2788_v17 = vld [vmem:[%s6490_s1 + $0x250] sm:$0xff] }
 0x192   :  { %v979_v2 = vmul.f32 %v2785_v7, %v2784_v46  ;;  %v2787_v42 = vld [vmem:[%s6491_s0 + $0x248] sm:$0xff]  ;;  %v2789_v20 = vld [vmem:[%s6491_s0 + $0x250] sm:$0xff]  ;;  %v2790_v55 = vld [vmem:[%s6490_s1 + $0x258] sm:$0xff]  ;;  %v1218_v58 = vadd.f32 %v1217_v27, %v1085_v11  ;;  %v1231_v33 = vadd.f32 %v1230_v60, %v1097_v21 }
 0x193   :  { %v980_v1 = vmul.f32 %v2787_v42, %v2786_v29  ;;  %v981_v61 = vmul.f32 %v2789_v20, %v2788_v17  ;;  %v2791_v63 = vld [vmem:[%s6491_s0 + $0x258] sm:$0xff]  ;;  %v6769_v15 = vld [vmem:[#allocation50_spill] sm:$0xff]  ;;  %v6770_v14 = vld [vmem:[#allocation68_spill] sm:$0xff] }
 0x194   :  { %v982_v57 = vmul.f32 %v2791_v63, %v2790_v55  ;;  %v6768_v18 = vld [vmem:[#allocation49_spill] sm:$0xff]  ;;  %v1089_v39 = vmul.f32 %v961_v22, %v6769_v15  ;;  %v2792_v16 = vld [vmem:[%s6490_s1 + $0x260] sm:$0xff]  ;;  %v1107_v30 = vmul.f32 %v979_v2, %v6770_v14  ;;  %v2794_v22 = vld [vmem:[%s6490_s1 + $0x268] sm:$0xff] }
 0x195   :  { %v1088_v3 = vmul.f32 %v960_v45, %v6768_v18  ;;  %v2793_v0 = vld [vmem:[%s6491_s0 + $0x260] sm:$0xff]  ;;  %v6771_v53 = vld [vmem:[#allocation69_spill] sm:$0xff]  ;;  %v1219_v45 = vadd.f32 %v1218_v58, %v1086_v5  ;;  %v2795_v11 = vld [vmem:[%s6491_s0 + $0x268] sm:$0xff] }
 0x196   :  { %v983_v51 = vmul.f32 %v2793_v0, %v2792_v16  ;;  %v1108_v40 = vmul.f32 %v980_v1, %v6771_v53  ;;  %v6772_v56 = vld [vmem:[#allocation70_spill] sm:$0xff]  ;;  %v984_v10 = vmul.f32 %v2795_v11, %v2794_v22  ;;  %v2796_v9 = vld [vmem:[%s6490_s1 + $0x270] sm:$0xff]  ;;  %v6773_v21 = vld [vmem:[#allocation51_spill] sm:$0xff]  ;;  %v1232_v1 = vadd.f32 %v1231_v33, %v1098_v59 }
 0x197   :  { %v1109_v62 = vmul.f32 %v981_v61, %v6772_v56  ;;  %v2797_v6 = vld [vmem:[%s6491_s0 + $0x270] sm:$0xff]  ;;  %v1090_v5 = vmul.f32 %v962_v24, %v6773_v21  ;;  %v2798_v46 = vld [vmem:[%s6490_s1 + $0x278] sm:$0xff]  ;;  %v6774_v47 = vld [vmem:[#allocation71_spill] sm:$0xff]  ;;  %v1220_v17 = vadd.f32 %v1219_v45, %v1087_v49 }
 0x198   :  { %v985_v27 = vmul.f32 %v2797_v6, %v2796_v9  ;;  %v2799_v7 = vld [vmem:[%s6491_s0 + $0x278] sm:$0xff]  ;;  %v1110_v29 = vmul.f32 %v982_v57, %v6774_v47  ;;  %v1244_v42 = vadd.f32 %v1108_v40, %v1107_v30  ;;  %v2800_v20 = vld [vmem:[%s6490_s1 + $0x200] sm:$0xff]  ;;  %v2802_v55 = vld [vmem:[%s6490_s1 + $0x208] sm:$0xff]  ;;  %1233 = vadd.xlane.f32.xlu1 %v1232_v1 }
 0x199   :  { %v986_v2 = vmul.f32 %v2799_v7, %v2798_v46  ;;  %v2801_v24 = vld [vmem:[%s6491_s0 + $0x200] sm:$0xff]  ;;  %v2803_v63 = vld [vmem:[%s6491_s0 + $0x208] sm:$0xff]  ;;  %v6775_v59 = vld [vmem:[#allocation72_spill] sm:$0xff] }
 0x19a   :  { %v971_v61 = vmul.f32 %v2801_v24, %v2800_v20  ;;  %v972_v57 = vmul.f32 %v2803_v63, %v2802_v55  ;;  %v1111_v49 = vmul.f32 %v983_v51, %v6775_v59  ;;  %v1245_v60 = vadd.f32 %v1244_v42, %v1109_v62  ;;  %v2804_v18 = vld [vmem:[%s6490_s1 + $0x210] sm:$0xff]  ;;  %v2806_v16 = vld [vmem:[%s6490_s1 + $0x218] sm:$0xff]  ;;  %v6777_v40 = vld [vmem:[#allocation74_spill] sm:$0xff] }
 0x19b   :  { %v2805_v15 = vld [vmem:[%s6491_s0 + $0x210] sm:$0xff]  ;;  %v2807_v0 = vld [vmem:[%s6491_s0 + $0x218] sm:$0xff]  ;;  %v1221_v51 = vadd.f32 %v1220_v17, %v1088_v3  ;;  %v1113_v56 = vmul.f32 %v985_v27, %v6777_v40  ;;  %v2808_v62 = vld [vmem:[%s6490_s1 + $0x220] sm:$0xff] }
 0x19c   :  { %v973_v58 = vmul.f32 %v2805_v15, %v2804_v18  ;;  %v974_v14 = vmul.f32 %v2807_v0, %v2806_v16  ;;  %v6776_v30 = vld [vmem:[#allocation73_spill] sm:$0xff]  ;;  %v2809_v33 = vld [vmem:[%s6491_s0 + $0x220] sm:$0xff]  ;;  %v1246_v22 = vadd.f32 %v1245_v60, %v1110_v29  ;;  %v6778_v11 = vld [vmem:[#allocation60_spill] sm:$0xff] }
 0x19d   :  { %v1112_v53 = vmul.f32 %v984_v10, %v6776_v30  ;;  %v975_v45 = vmul.f32 %v2809_v33, %v2808_v62  ;;  %v1099_v9 = vmul.f32 %v971_v61, %v6778_v11  ;;  %v6779_v6 = vld [vmem:[#allocation61_spill] sm:$0xff]  ;;  %v6780_v46 = vld [vmem:[#allocation62_spill] sm:$0xff]  ;;  %v1222_v7 = vadd.f32 %v1221_v51, %v1089_v39  ;;  %v6781_v10 = vld [vmem:[#allocation75_spill] sm:$0xff] }
 0x19e   :  { %v1100_v21 = vmul.f32 %v972_v57, %v6779_v6  ;;  %v1101_v3 = vmul.f32 %v973_v58, %v6780_v46  ;;  %v1114_v47 = vmul.f32 %v986_v2, %v6781_v10  ;;  %v2810_v27 = vld [vmem:[%s6490_s1 + $0x228] sm:$0xff]  ;;  %v2812_v29 = vld [vmem:[%s6490_s1 + $0x230] sm:$0xff]  ;;  %v1247_v20 = vadd.f32 %v1246_v22, %v1111_v49  ;;  %v2814_v2 = vld [vmem:[%s6490_s1 + $0x238] sm:$0xff] }
 0x19f   :  { %v2811_v42 = vld [vmem:[%s6491_s0 + $0x228] sm:$0xff]  ;;  %v2813_v17 = vld [vmem:[%s6491_s0 + $0x230] sm:$0xff]  ;;  %v2815_v24 = vld [vmem:[%s6491_s0 + $0x238] sm:$0xff]  ;;  %v1223_v59 = vadd.f32 %v1222_v7, %v1090_v5 }
 0x1a0   :  { %v976_v1 = vmul.f32 %v2811_v42, %v2810_v27  ;;  %v977_v39 = vmul.f32 %v2813_v17, %v2812_v29  ;;  %v978_v61 = vmul.f32 %v2815_v24, %v2814_v2  ;;  %v6782_v55 = vld [vmem:[#allocation63_spill] sm:$0xff]  ;;  %v1235_v57 = vadd.f32 %v1100_v21, %v1099_v9  ;;  %v2816_v60 = vld [vmem:[%s6490_s1 + $0x2c0] sm:$0xff]  ;;  %v2820_v5 = vld [vmem:[%s6490_s1 + $0x2d0] sm:$0xff] }
 0x1a1   :  { %v1102_v63 = vmul.f32 %v974_v14, %v6782_v55  ;;  %v2817_v49 = vld [vmem:[%s6491_s0 + $0x2c0] sm:$0xff]  ;;  %v2818_v15 = vld [vmem:[%s6490_s1 + $0x2c8] sm:$0xff]  ;;  %v2821_v0 = vld [vmem:[%s6491_s0 + $0x2d0] sm:$0xff]  ;;  %v1248_v51 = vadd.f32 %v1247_v20, %v1112_v53  ;;  %1224 = vadd.xlane.f32.xlu0 %v1223_v59 }
 0x1a2   :  { %v995_v18 = vmul.f32 %v2817_v49, %v2816_v60  ;;  %v2819_v58 = vld [vmem:[%s6491_s0 + $0x2c8] sm:$0xff]  ;;  %v997_v14 = vmul.f32 %v2821_v0, %v2820_v5  ;;  %v6783_v30 = vld [vmem:[#allocation64_spill] sm:$0xff]  ;;  %v1236_v62 = vadd.f32 %v1235_v57, %v1101_v3  ;;  %v2822_v33 = vld [vmem:[%s6490_s1 + $0x2d8] sm:$0xff] }
 0x1a3   :  { %v996_v16 = vmul.f32 %v2819_v58, %v2818_v15  ;;  %v1103_v40 = vmul.f32 %v975_v45, %v6783_v30  ;;  %v2823_v22 = vld [vmem:[%s6491_s0 + $0x2d8] sm:$0xff]  ;;  %v2824_v21 = vld [vmem:[%s6490_s1 + $0x2e0] sm:$0xff]  ;;  %v2826_v46 = vld [vmem:[%s6490_s1 + $0x2e8] sm:$0xff]  ;;  %v1249_v42 = vadd.f32 %v1248_v51, %v1113_v56 }
 0x1a4   :  { %v998_v11 = vmul.f32 %v2823_v22, %v2822_v33  ;;  %v6784_v9 = vld [vmem:[#allocation65_spill] sm:$0xff]  ;;  %v2825_v53 = vld [vmem:[%s6491_s0 + $0x2e0] sm:$0xff]  ;;  %v2827_v3 = vld [vmem:[%s6491_s0 + $0x2e8] sm:$0xff] }
 0x1a5   :  { %v1104_v6 = vmul.f32 %v976_v1, %v6784_v9  ;;  %v999_v45 = vmul.f32 %v2825_v53, %v2824_v21  ;;  %v1000_v7 = vmul.f32 %v2827_v3, %v2826_v46  ;;  %v6785_v10 = vld [vmem:[#allocation84_spill] sm:$0xff]  ;;  %v1237_v1 = vadd.f32 %v1236_v62, %v1102_v63  ;;  %v6786_v29 = vld [vmem:[#allocation85_spill] sm:$0xff]  ;;  %v6787_v20 = vld [vmem:[#allocation86_spill] sm:$0xff] }
 0x1a6   :  { %v1123_v27 = vmul.f32 %v995_v18, %v6785_v10  ;;  %v1124_v17 = vmul.f32 %v996_v16, %v6786_v29  ;;  %v1125_v2 = vmul.f32 %v997_v14, %v6787_v20  ;;  %v6788_v24 = vld [vmem:[#allocation66_spill] sm:$0xff]  ;;  %v6789_v57 = vld [vmem:[#allocation67_spill] sm:$0xff]  ;;  %v2828_v60 = vld [vmem:[%s6490_s1 + $0x2f0] sm:$0xff]  ;;  %v1250_v18 = vadd.f32 %v1249_v42, %v1114_v47 }
 0x1a7   :  { %v1105_v55 = vmul.f32 %v977_v39, %v6788_v24  ;;  %v1106_v59 = vmul.f32 %v978_v61, %v6789_v57  ;;  %v2829_v49 = vld [vmem:[%s6491_s0 + $0x2f0] sm:$0xff]  ;;  %v2830_v56 = vld [vmem:[%s6490_s1 + $0x2f8] sm:$0xff]  ;;  %v1238_v61 = vadd.f32 %v1237_v1, %v1103_v40  ;;  %v6790_v58 = vld [vmem:[#allocation87_spill] sm:$0xff] }
 0x1a8   :  { %v1001_v15 = vmul.f32 %v2829_v49, %v2828_v60  ;;  %v2831_v63 = vld [vmem:[%s6491_s0 + $0x2f8] sm:$0xff]  ;;  %v1126_v16 = vmul.f32 %v998_v11, %v6790_v58  ;;  %v1262_v5 = vadd.f32 %v1124_v17, %v1123_v27  ;;  %v2832_v0 = vld [vmem:[%s6490_s1 + $0x280] sm:$0xff]  ;;  %v2834_v30 = vld [vmem:[%s6490_s1 + $0x288] sm:$0xff]  ;;  %1251 = vadd.xlane.f32.xlu1 %v1250_v18 }
 0x1a9   :  { %v1002_v39 = vmul.f32 %v2831_v63, %v2830_v56  ;;  %v2833_v14 = vld [vmem:[%s6491_s0 + $0x280] sm:$0xff]  ;;  %v2835_v47 = vld [vmem:[%s6491_s0 + $0x288] sm:$0xff]  ;;  %v2836_v62 = vld [vmem:[%s6490_s1 + $0x290] sm:$0xff]  ;;  %v1239_v53 = vadd.f32 %v1238_v61, %v1104_v6 }
 0x1aa   :  { %v987_v51 = vmul.f32 %v2833_v14, %v2832_v0  ;;  %v988_v40 = vmul.f32 %v2835_v47, %v2834_v30  ;;  %v2837_v33 = vld [vmem:[%s6491_s0 + $0x290] sm:$0xff]  ;;  %v2838_v11 = vld [vmem:[%s6490_s1 + $0x298] sm:$0xff]  ;;  %v1263_v42 = vadd.f32 %v1262_v5, %v1125_v2  ;;  %v2840_v1 = vld [vmem:[%s6490_s1 + $0x2a0] sm:$0xff] }
 0x1ab   :  { %v989_v22 = vmul.f32 %v2837_v33, %v2836_v62  ;;  %v2839_v9 = vld [vmem:[%s6491_s0 + $0x298] sm:$0xff]  ;;  %v6791_v46 = vld [vmem:[#allocation88_spill] sm:$0xff]  ;;  %v2841_v29 = vld [vmem:[%s6491_s0 + $0x2a0] sm:$0xff]  ;;  %v1240_v60 = vadd.f32 %v1239_v53, %v1105_v55 }
 0x1ac   :  { %v990_v21 = vmul.f32 %v2839_v9, %v2838_v11  ;;  %v1127_v3 = vmul.f32 %v999_v45, %v6791_v46  ;;  %v6792_v10 = vld [vmem:[#allocation89_spill] sm:$0xff]  ;;  %v991_v17 = vmul.f32 %v2841_v29, %v2840_v1  ;;  %v2842_v20 = vld [vmem:[%s6490_s1 + $0x2a8] sm:$0xff]  ;;  %v1264_v49 = vadd.f32 %v1263_v42, %v1126_v16  ;;  %v2844_v56 = vld [vmem:[%s6490_s1 + $0x2b0] sm:$0xff] }
 0x1ad   :  { %v1128_v27 = vmul.f32 %v1000_v7, %v6792_v10  ;;  %v2843_v6 = vld [vmem:[%s6491_s0 + $0x2a8] sm:$0xff]  ;;  %v6793_v7 = vld [vmem:[#allocation76_spill] sm:$0xff]  ;;  %v6794_v24 = vld [vmem:[#allocation77_spill] sm:$0xff]  ;;  %v1241_v62 = vadd.f32 %v1240_v60, %v1106_v59 }
 0x1ae   :  { %v992_v45 = vmul.f32 %v2843_v6, %v2842_v20  ;;  %v1115_v2 = vmul.f32 %v987_v51, %v6793_v7  ;;  %v1116_v57 = vmul.f32 %v988_v40, %v6794_v24  ;;  %v2845_v63 = vld [vmem:[%s6491_s0 + $0x2b0] sm:$0xff]  ;;  %v6795_v61 = vld [vmem:[#allocation78_spill] sm:$0xff]  ;;  %v6797_v14 = vld [vmem:[#allocation91_spill] sm:$0xff]  ;;  %v1265_v33 = vadd.f32 %v1264_v49, %v1127_v3 }
 0x1af   :  { %v993_v18 = vmul.f32 %v2845_v63, %v2844_v56  ;;  %v1117_v58 = vmul.f32 %v989_v22, %v6795_v61  ;;  %v6796_v5 = vld [vmem:[#allocation90_spill] sm:$0xff]  ;;  %v1130_v30 = vmul.f32 %v1002_v39, %v6797_v14  ;;  %v2846_v55 = vld [vmem:[%s6490_s1 + $0x2b8] sm:$0xff]  ;;  %v6798_v47 = vld [vmem:[#allocation79_spill] sm:$0xff]  ;;  %1242 = vadd.xlane.f32.xlu0 %v1241_v62 }
 0x1b0   :  { %v1129_v0 = vmul.f32 %v1001_v15, %v6796_v5  ;;  %v2847_v16 = vld [vmem:[%s6491_s0 + $0x2b8] sm:$0xff]  ;;  %v1118_v40 = vmul.f32 %v990_v21, %v6798_v47  ;;  %v1253_v11 = vadd.f32 %v1116_v57, %v1115_v2  ;;  %v2848_v15 = vld [vmem:[%s6490_s1 + $0x340] sm:$0xff]  ;;  %v6799_v9 = vld [vmem:[#allocation80_spill] sm:$0xff]  ;;  %v1266_v20 = vadd.f32 %v1265_v33, %v1128_v27 }
 0x1b1   :  { %v994_v51 = vmul.f32 %v2847_v16, %v2846_v55  ;;  %v2849_v39 = vld [vmem:[%s6491_s0 + $0x340] sm:$0xff]  ;;  %v1119_v53 = vmul.f32 %v991_v17, %v6799_v9  ;;  %v2850_v46 = vld [vmem:[%s6490_s1 + $0x348] sm:$0xff]  ;;  %v2852_v3 = vld [vmem:[%s6490_s1 + $0x350] sm:$0xff] }
 0x1b2   :  { %v1011_v22 = vmul.f32 %v2849_v39, %v2848_v15  ;;  %v2851_v59 = vld [vmem:[%s6491_s0 + $0x348] sm:$0xff]  ;;  %v2853_v10 = vld [vmem:[%s6491_s0 + $0x350] sm:$0xff]  ;;  %v2854_v1 = vld [vmem:[%s6490_s1 + $0x358] sm:$0xff]  ;;  %v1254_v57 = vadd.f32 %v1253_v11, %v1117_v58  ;;  %v1267_v55 = vadd.f32 %v1266_v20, %v1129_v0 }
 0x1b3   :  { %v1012_v21 = vmul.f32 %v2851_v59, %v2850_v46  ;;  %v1013_v42 = vmul.f32 %v2853_v10, %v2852_v3  ;;  %v2855_v29 = vld [vmem:[%s6491_s0 + $0x358] sm:$0xff]  ;;  %v6801_v2 = vld [vmem:[#allocation82_spill] sm:$0xff]  ;;  %v6802_v61 = vld [vmem:[#allocation100_spill] sm:$0xff] }
 0x1b4   :  { %v1014_v17 = vmul.f32 %v2855_v29, %v2854_v1  ;;  %v6800_v6 = vld [vmem:[#allocation81_spill] sm:$0xff]  ;;  %v1121_v24 = vmul.f32 %v993_v18, %v6801_v2  ;;  %v2856_v60 = vld [vmem:[%s6490_s1 + $0x360] sm:$0xff]  ;;  %v1139_v63 = vmul.f32 %v1011_v22, %v5083_v41  ;;  %v2858_v18 = vld [vmem:[%s6490_s1 + $0x368] sm:$0xff]  ;;  %v1268_v46 = vadd.f32 %v1267_v55, %v1130_v30 }
 0x1b5   :  { %v1120_v7 = vmul.f32 %v992_v45, %v6800_v6  ;;  %v2857_v49 = vld [vmem:[%s6491_s0 + $0x360] sm:$0xff]  ;;  %v1140_v5 = vmul.f32 %v1012_v21, %v6802_v61  ;;  %v6803_v14 = vld [vmem:[#allocation101_spill] sm:$0xff]  ;;  %v1255_v45 = vadd.f32 %v1254_v57, %v1118_v40  ;;  %v2859_v58 = vld [vmem:[%s6491_s0 + $0x368] sm:$0xff] }
 0x1b6   :  { %v1015_v56 = vmul.f32 %v2857_v49, %v2856_v60  ;;  %v1141_v27 = vmul.f32 %v1013_v42, %v6803_v14  ;;  %v1016_v16 = vmul.f32 %v2859_v58, %v2858_v18  ;;  %v2860_v47 = vld [vmem:[%s6490_s1 + $0x370] sm:$0xff]  ;;  %v6804_v0 = vld [vmem:[#allocation83_spill] sm:$0xff]  ;;  %v2862_v33 = vld [vmem:[%s6490_s1 + $0x378] sm:$0xff]  ;;  %1269 = vadd.xlane.f32.xlu1 %v1268_v46 }
 0x1b7   :  { %v2861_v41 = vld [vmem:[%s6491_s0 + $0x370] sm:$0xff]  ;;  %v1122_v40 = vmul.f32 %v994_v51, %v6804_v0  ;;  %v2863_v11 = vld [vmem:[%s6491_s0 + $0x378] sm:$0xff]  ;;  %v6805_v39 = vld [vmem:[#allocation102_spill] sm:$0xff]  ;;  %v1280_v9 = vadd.f32 %v1140_v5, %v1139_v63  ;;  %v1256_v59 = vadd.f32 %v1255_v45, %v1119_v53 }
 0x1b8   :  { %v1017_v62 = vmul.f32 %v2861_v41, %v2860_v47  ;;  %v1018_v15 = vmul.f32 %v2863_v11, %v2862_v33  ;;  %v1142_v22 = vmul.f32 %v1014_v17, %v6805_v39  ;;  %v2864_v21 = vld [vmem:[%s6490_s1 + $0x300] sm:$0xff]  ;;  %v2866_v10 = vld [vmem:[%s6490_s1 + $0x308] sm:$0xff]  ;;  %v2868_v17 = vld [vmem:[%s6490_s1 + $0x310] sm:$0xff] }
 0x1b9   :  { %v2865_v51 = vld [vmem:[%s6491_s0 + $0x300] sm:$0xff]  ;;  %v2867_v42 = vld [vmem:[%s6491_s0 + $0x308] sm:$0xff]  ;;  %v1281_v29 = vadd.f32 %v1280_v9, %v1141_v27  ;;  %v2869_v20 = vld [vmem:[%s6491_s0 + $0x310] sm:$0xff]  ;;  %v1257_v49 = vadd.f32 %v1256_v59, %v1120_v7 }
 0x1ba   :  { %v1003_v3 = vmul.f32 %v2865_v51, %v2864_v21  ;;  %v1004_v1 = vmul.f32 %v2867_v42, %v2866_v10  ;;  %v6806_v30 = vld [vmem:[#allocation103_spill] sm:$0xff]  ;;  %v1005_v6 = vmul.f32 %v2869_v20, %v2868_v17  ;;  %v2870_v2 = vld [vmem:[%s6490_s1 + $0x318] sm:$0xff]  ;;  %v2872_v14 = vld [vmem:[%s6490_s1 + $0x320] sm:$0xff] }
 0x1bb   :  { %v1143_v53 = vmul.f32 %v1015_v56, %v6806_v30  ;;  %v2871_v57 = vld [vmem:[%s6491_s0 + $0x318] sm:$0xff]  ;;  %v6807_v56 = vld [vmem:[#allocation104_spill] sm:$0xff]  ;;  %v2873_v27 = vld [vmem:[%s6491_s0 + $0x320] sm:$0xff]  ;;  %v1282_v45 = vadd.f32 %v1281_v29, %v1142_v22  ;;  %v1258_v33 = vadd.f32 %v1257_v49, %v1121_v24 }
 0x1bc   :  { %v1006_v60 = vmul.f32 %v2871_v57, %v2870_v2  ;;  %v1144_v63 = vmul.f32 %v1016_v16, %v6807_v56  ;;  %v6808_v61 = vld [vmem:[#allocation105_spill] sm:$0xff]  ;;  %v1007_v55 = vmul.f32 %v2873_v27, %v2872_v14  ;;  %v6809_v18 = vld [vmem:[#allocation92_spill] sm:$0xff]  ;;  %v6811_v0 = vld [vmem:[#allocation94_spill] sm:$0xff] }
 0x1bd   :  { %v1145_v5 = vmul.f32 %v1017_v62, %v6808_v61  ;;  %v1131_v58 = vmul.f32 %v1003_v3, %v6809_v18  ;;  %v6810_v47 = vld [vmem:[#allocation93_spill] sm:$0xff]  ;;  %v1133_v7 = vmul.f32 %v1005_v6, %v6811_v0  ;;  %v6812_v16 = vld [vmem:[#allocation106_spill] sm:$0xff]  ;;  %v2874_v62 = vld [vmem:[%s6490_s1 + $0x328] sm:$0xff]  ;;  %v1283_v59 = vadd.f32 %v1282_v45, %v1143_v53 }
 0x1be   :  { %v1132_v41 = vmul.f32 %v1004_v1, %v6810_v47  ;;  %v1146_v11 = vmul.f32 %v1018_v15, %v6812_v16  ;;  %v2875_v39 = vld [vmem:[%s6491_s0 + $0x328] sm:$0xff]  ;;  %v2876_v22 = vld [vmem:[%s6490_s1 + $0x330] sm:$0xff]  ;;  %v2878_v15 = vld [vmem:[%s6490_s1 + $0x338] sm:$0xff]  ;;  %v1259_v1 = vadd.f32 %v1258_v33, %v1122_v40 }
 0x1bf   :  { %v1008_v9 = vmul.f32 %v2875_v39, %v2874_v62  ;;  %v2877_v46 = vld [vmem:[%s6491_s0 + $0x330] sm:$0xff]  ;;  %v2879_v21 = vld [vmem:[%s6491_s0 + $0x338] sm:$0xff]  ;;  %v6813_v3 = vld [vmem:[#allocation95_spill] sm:$0xff]  ;;  %v1284_v2 = vadd.f32 %v1283_v59, %v1144_v63 }
 0x1c0   :  { %v1009_v24 = vmul.f32 %v2877_v46, %v2876_v22  ;;  %v1010_v51 = vmul.f32 %v2879_v21, %v2878_v15  ;;  %v1134_v10 = vmul.f32 %v1006_v60, %v6813_v3  ;;  %v1271_v42 = vadd.f32 %v1132_v41, %v1131_v58  ;;  %v2880_v30 = vld [vmem:[%s6490_s1 + $0x3c0] sm:$0xff]  ;;  %v2881_v53 = vld [vmem:[%s6490_s1 + $0x3c8] sm:$0xff]  ;;  %v6815_v57 = vld [vmem:[#allocation96_spill] sm:$0xff]  ;;  %1260 = vadd.xlane.f32.xlu0 %v1259_v1 }
 0x1c1   :  { %v1027_v29 = vmul.f32 %v2880_v30, %v5336_v44  ;;  %v1028_v17 = vmul.f32 %v2881_v53, %v5367_v31  ;;  %v6814_v20 = vld [vmem:[#allocation107_spill] sm:$0xff]  ;;  %v1135_v60 = vmul.f32 %v1007_v55, %v6815_v57  ;;  %v6816_v40 = vld [vmem:[#allocation108_spill] sm:$0xff]  ;;  %v6817_v61 = vld [vmem:[#allocation97_spill] sm:$0xff]  ;;  %v1285_v18 = vadd.f32 %v1284_v2, %v1145_v5 }
 0x1c2   :  { %v1029_v6 = vmul.f32 %v6814_v20, %v5372_v37  ;;  %v1272_v49 = vadd.f32 %v1271_v42, %v1133_v7  ;;  %v1030_v56 = vmul.f32 %v6816_v40, %v5384_v28  ;;  %v1136_v14 = vmul.f32 %v1008_v9, %v6817_v61  ;;  %v6818_v44 = vld [vmem:[#allocation109_spill] sm:$0xff]  ;;  %v6819_v63 = vld [vmem:[#allocation98_spill] sm:$0xff]  ;;  %v6820_v47 = vld [vmem:[#allocation99_spill] sm:$0xff] }
 0x1c3   :  { %v1031_v27 = vmul.f32 %v6818_v44, %v5418_v26  ;;  %v1155_v45 = vmul.f32 %v1027_v29, %v5436_v32  ;;  %v1156_v58 = vmul.f32 %v1028_v17, %v5441_v19  ;;  %v1137_v55 = vmul.f32 %v1009_v24, %v6819_v63  ;;  %v2882_v28 = vld [vmem:[%s6490_s1 + $0x3e8] sm:$0xff]  ;;  %v2883_v19 = vld [vmem:[%s6490_s1 + $0x3f0] sm:$0xff]  ;;  %v2884_v33 = vld [vmem:[%s6490_s1 + $0x380] sm:$0xff] }
 0x1c4   :  { %v1273_v31 = vadd.f32 %v1272_v49, %v1134_v10  ;;  %v1157_v37 = vmul.f32 %v1029_v6, %v5446_v52  ;;  %v1138_v41 = vmul.f32 %v1010_v51, %v6820_v47  ;;  %v1032_v0 = vmul.f32 %v2882_v28, %v5428_v54  ;;  %v2885_v16 = vld [vmem:[%s6491_s0 + $0x380] sm:$0xff]  ;;  %v2889_v39 = vld [vmem:[%s6491_s0 + $0x390] sm:$0xff]  ;;  %v2890_v59 = vld [vmem:[%s6490_s1 + $0x398] sm:$0xff]  ;;  %v1571_v28 = vpop.xlane.xlu0 %1570 }
 0x1c5   :  { %v1286_v7 = vadd.f32 %v1285_v18, %v1146_v11  ;;  %v1158_v32 = vmul.f32 %v1030_v56, %v5451_v36  ;;  %v1298_v5 = vadd.f32 %v1156_v58, %v1155_v45  ;;  %v1033_v52 = vmul.f32 %v2883_v19, %v5458_v25  ;;  %v2886_v36 = vld [vmem:[%s6490_s1 + $0x388] sm:$0xff]  ;;  %v2888_v25 = vld [vmem:[%s6490_s1 + $0x390] sm:$0xff]  ;;  %v2891_v15 = vld [vmem:[%s6491_s0 + $0x398] sm:$0xff] }
 0x1c6   :  { %v1274_v26 = vadd.f32 %v1273_v31, %v1135_v60  ;;  %v1019_v54 = vmul.f32 %v2885_v16, %v2884_v33  ;;  %v2887_v11 = vld [vmem:[%s6491_s0 + $0x388] sm:$0xff]  ;;  %v1021_v9 = vmul.f32 %v2889_v39, %v2888_v25  ;;  %v1159_v46 = vmul.f32 %v1031_v27, %v5460_v8  ;;  %v2892_v51 = vld [vmem:[%s6490_s1 + $0x3f8] sm:$0xff]  ;;  %v2893_v29 = vld [vmem:[%s6490_s1 + $0x3a0] sm:$0xff] }
 0x1c7   :  { %v1020_v62 = vmul.f32 %v2887_v11, %v2886_v36  ;;  %1287 = vadd.xlane.f32.xlu1 %v1286_v7  ;;  %v1299_v24 = vadd.f32 %v1298_v5, %v1157_v37  ;;  %v1022_v21 = vmul.f32 %v2891_v15, %v2890_v59  ;;  %v1034_v3 = vmul.f32 %v2892_v51, %v5473_v34  ;;  %v2894_v53 = vld [vmem:[%s6491_s0 + $0x3a0] sm:$0xff]  ;;  %v2898_v40 = vld [vmem:[%s6491_s0 + $0x3b0] sm:$0xff]  ;;  %v6822_v37 = vld [vmem:[#allocation111_spill] sm:$0xff] }
 0x1c8   :  { %v1275_v22 = vadd.f32 %v1274_v26, %v1136_v14  ;;  %v1160_v10 = vmul.f32 %v1032_v0, %v5466_v43  ;;  %v1147_v8 = vmul.f32 %v1019_v54, %v5339_v48  ;;  %v1023_v17 = vmul.f32 %v2894_v53, %v2893_v29  ;;  %v2895_v48 = vld [vmem:[%s6490_s1 + $0x3a8] sm:$0xff]  ;;  %v6821_v45 = vld [vmem:[#allocation110_spill] sm:$0xff] }
 0x1c9   :  { %v1148_v42 = vmul.f32 %v1020_v62, %v5344_v23  ;;  %v1300_v30 = vadd.f32 %v1299_v24, %v1158_v32  ;;  %v1149_v20 = vmul.f32 %v1021_v9, %v5349_v35  ;;  %v1161_v34 = vmul.f32 %v1033_v52, %v5517_v50  ;;  %v2896_v23 = vld [vmem:[%s6491_s0 + $0x3a8] sm:$0xff]  ;;  %v2897_v50 = vld [vmem:[%s6490_s1 + $0x3b0] sm:$0xff]  ;;  %v1580_v32 = vpop.xlane.xlu0 %1579 }
 0x1ca   :  { %v1276_v1 = vadd.f32 %v1275_v22, %v1137_v55  ;;  %v1024_v43 = vmul.f32 %v2896_v23, %v2895_v48  ;;  %v1150_v57 = vmul.f32 %v1022_v21, %v5358_v12  ;;  %v1162_v49 = vmul.f32 %v1034_v3, %v5531_v13  ;;  %v2899_v12 = vld [vmem:[%s6490_s1 + $0x3b8] sm:$0xff] }
 0x1cb   :  { %v1301_v2 = vadd.f32 %v1300_v30, %v1159_v46  ;;  %v1289_v60 = vadd.f32 %v1148_v42, %v1147_v8  ;;  %v1025_v56 = vmul.f32 %v2898_v40, %v2897_v50  ;;  %v1151_v61 = vmul.f32 %v1023_v17, %v5375_v38  ;;  %v2900_v13 = vld [vmem:[%s6491_s0 + $0x3b8] sm:$0xff] }
 0x1cc   :  { %v1277_v6 = vadd.f32 %v1276_v1, %v1138_v41  ;;  %v1026_v27 = vmul.f32 %v2900_v13, %v2899_v12  ;;  %v1152_v18 = vmul.f32 %v1024_v43, %v6821_v45  ;;  %v1971_v41 = vpop.xlane.xlu1 %1970  ;;  %v2107_v53 = vmax.f32 %v1571_v28, 1e-07 }
 0x1cd   :  { %v1302_v35 = vadd.f32 %v1301_v2, %v1160_v10  ;;  %v1290_v14 = vadd.f32 %v1289_v60, %v1149_v20  ;;  %v1153_v63 = vmul.f32 %v1025_v56, %v6822_v37  ;;  %v1589_v19 = vpop.xlane.xlu0 %1588  ;;  %v2139_v29 = vmax.f32 %v1971_v41, 1e-07 }
 0x1ce   :  { %1278 = vadd.xlane.f32.xlu0 %v1277_v6  ;;  %v1154_v38 = vmul.f32 %v1026_v27, %v5399_v4  ;;  %v2108_v48 = vmax.f32 %v1580_v32, 1e-07  ;;  %v2109_v43 = vmax.f32 %v1589_v19, 1e-07 }
 0x1cf   :  { %v1303_v44 = vadd.f32 %v1302_v35, %v1161_v34  ;;  %v1291_v31 = vadd.f32 %v1290_v14, %v1150_v57  ;;  %2592 = vrsqrt.f32 %v2139_v29  ;;  %v2219_v14 = vlaneseq }
 0x1d0   :  { %v1980_v26 = vpop.xlane.xlu1 %1979  ;;  %2594 = vrsqrt.f32 %v2107_v53 }
 0x1d1   :  { %v1304_v58 = vadd.f32 %v1303_v44, %v1162_v49  ;;  %v1292_v55 = vadd.f32 %v1291_v31, %v1151_v61  ;;  %v1598_v33 = vpop.xlane.xlu0 %1597  ;;  %v2140_v20 = vmax.f32 %v1980_v26, 1e-07 }
 0x1d2   :  { %v2110_v2 = vmax.f32 %v1598_v33, 1e-07 }
 0x1d3   :  { %1305 = vadd.xlane.f32.xlu1 %v1304_v58  ;;  %v1293_v47 = vadd.f32 %v1292_v55, %v1152_v18  ;;  %2596 = vrsqrt.f32 %v2140_v20  ;;  %v6415_v58 = vand.u32 127, %v2219_v14 }
 0x1d4   :  { %v1989_v5 = vpop.xlane.xlu1 %1988  ;;  %2598 = vrsqrt.f32 %v2108_v48 }
 0x1d5   :  { %v1294_v0 = vadd.f32 %v1293_v47, %v1153_v63  ;;  %v1607_v54 = vpop.xlane.xlu0 %1606  ;;  %v2141_v23 = vmax.f32 %v1989_v5, 1e-07  ;;  %v6419_v47 = vshrl.u32 %v2219_v14, 7  ;;  %v2225_v33 = vadd.s32 4294967288, %v6415_v58 }
 0x1d6   :  { %v2111_v35 = vmax.f32 %v1607_v54, 1e-07 }
 0x1d7   :  { %v1295_v7 = vadd.f32 %v1294_v0, %v1154_v38  ;;  %2600 = vrsqrt.f32 %v2141_v23  ;;  %v2246_v23 = vadd.s32 4294967264, %v6415_v58 }
 0x1d8   :  { %v1998_v52 = vpop.xlane.xlu1 %1997  ;;  %2602 = vrsqrt.f32 %v2109_v43 }
 0x1d9   :  { %1296 = vadd.xlane.f32.xlu0 %v1295_v7  ;;  %v1616_v11 = vpop.xlane.xlu0 %1615  ;;  %v2142_v6 = vmax.f32 %v1998_v52, 1e-07 }
 0x1da   :  { %v2112_v40 = vmax.f32 %v1616_v11, 1e-07  ;;  %v6432_v11 = vadd.s32 4294967272, %v6415_v58 }
 0x1db   :  { %2604 = vrsqrt.f32 %v2142_v6 }
 0x1dc   :  { %v2007_v16 = vpop.xlane.xlu1 %2006  ;;  %2606 = vrsqrt.f32 %v2110_v2  ;;  %v2593_v18 = vpop.eup %2592  ;;  %v2242_v29 = vsub.s32 %v6432_v11, %v6419_v47  ;;  %v2281_v11 = vadd.s32 4294967224, %v6415_v58 }
 0x1dd   :  { %v1625_v25 = vpop.xlane.xlu0 %1624  ;;  %v2143_v60 = vmax.f32 %v2007_v16, 1e-07  ;;  %v2595_v37 = vpop.eup %2594 }
 0x1de   :  { %v2113_v61 = vmax.f32 %v1625_v25, 1e-07  ;;  %v2223_v25 = vsub.s32 %v6415_v58, %v6419_v47 }
 0x1df   :  { %2608 = vrsqrt.f32 %v2143_v60 }
 0x1e0   :  { %v2016_v36 = vpop.xlane.xlu1 %2015  ;;  %2610 = vrsqrt.f32 %v2111_v35  ;;  %v2597_v55 = vpop.eup %2596  ;;  %v2260_v35 = vadd.s32 4294967248, %v6415_v58 }
 0x1e1   :  { %v1634_v4 = vpop.xlane.xlu0 %1633  ;;  %v2144_v50 = vmax.f32 %v2016_v36, 1e-07  ;;  %v2599_v28 = vpop.eup %2598 }
 0x1e2   :  { %v2114_v27 = vmax.f32 %v1634_v4, 1e-07 }
 0x1e3   :  { %2612 = vrsqrt.f32 %v2144_v50 }
 0x1e4   :  { %v2025_v62 = vpop.xlane.xlu1 %2024  ;;  %2614 = vrsqrt.f32 %v2112_v40  ;;  %v2601_v5 = vpop.eup %2600 }
 0x1e5   :  { %v6377_v22 = vpop.xlane.xlu0 %1642  ;;  %v2145_v56 = vmax.f32 %v2025_v62, 1e-07  ;;  %v2603_v16 = vpop.eup %2602 }
 0x1e6   :  { %v2115_v31 = vmax.f32 %v6377_v22, 1e-07  ;;  %v2171_v22 = vmul.f32 %v2595_v37, %v2593_v18 }
 0x1e7   :  { %2616 = vrsqrt.f32 %v2145_v56 }
 0x1e8   :  { %v2034_v39 = vpop.xlane.xlu1 %2033  ;;  %2618 = vrsqrt.f32 %v2113_v61  ;;  %v2605_v62 = vpop.eup %2604 }
 0x1e9   :  { %v6381_v24 = vpop.xlane.xlu0 %1651  ;;  %v2146_v12 = vmax.f32 %v2034_v39, 1e-07  ;;  %v2232_v39 = vadd.s32 4294967280, %v6415_v58  ;;  %v2607_v4 = vpop.eup %2606 }
 0x1ea   :  { %v2116_v38 = vmax.f32 %v6381_v24, 1e-07  ;;  %v2174_v6 = vmul.f32 %v2607_v4, %v2605_v62 }
 0x1eb   :  { %2620 = vrsqrt.f32 %v2146_v12  ;;  %v2235_v48 = vsub.s32 %v2232_v39, %v6419_v47 }
 0x1ec   :  { %v6375_v9 = vpop.xlane.xlu1 %2042  ;;  %2622 = vrsqrt.f32 %v2114_v27  ;;  %v2609_v24 = vpop.eup %2608  ;;  %v2249_v27 = vsub.s32 %v2246_v23, %v6419_v47 }
 0x1ed   :  { %v6385_v15 = vpop.xlane.xlu0 %1660  ;;  %v2147_v45 = vmax.f32 %v6375_v9, 1e-07  ;;  %v2172_v9 = vmul.f32 %v2599_v28, %v2597_v55  ;;  %v2263_v28 = vsub.s32 %v2260_v35, %v6419_v47  ;;  %v2302_v35 = vadd.s32 4294967200, %v6415_v58 }
 0x1ee   :  { %v2117_v7 = vmax.f32 %v6385_v15, 1e-07  ;;  %v2228_v15 = vsub.s32 %v2225_v33, %v6419_v47  ;;  %v2274_v33 = vadd.s32 4294967232, %v6415_v58 }
 0x1ef   :  { %2624 = vrsqrt.f32 %v2147_v45 }
 0x1f0   :  { %v6379_v46 = vpop.xlane.xlu1 %2051  ;;  %2626 = vrsqrt.f32 %v2115_v31 }
 0x1f1   :  { %v6389_v51 = vpop.xlane.xlu0 %1669  ;;  %v2148_v63 = vmax.f32 %v6379_v46, 1e-07  ;;  %v6438_v46 = vadd.s32 4294967256, %v6415_v58 }
 0x1f2   :  { %v2118_v19 = vmax.f32 %v6389_v51, 1e-07 }
 0x1f3   :  { %2628 = vrsqrt.f32 %v2148_v63  ;;  %v2256_v2 = vsub.s32 %v6438_v46, %v6419_v47  ;;  %v2267_v63 = vadd.s32 4294967240, %v6415_v58 }
 0x1f4   :  { %v6383_v59 = vpop.xlane.xlu1 %2060  ;;  %2630 = vrsqrt.f32 %v2116_v38 }
 0x1f5   :  { %v6393_v10 = vpop.xlane.xlu0 %1678  ;;  %v2149_v0 = vmax.f32 %v6383_v59, 1e-07 }
 0x1f6   :  { %v2119_v54 = vmax.f32 %v6393_v10, 1e-07 }
 0x1f7   :  { %2632 = vrsqrt.f32 %v2149_v0 }
 0x1f8   :  { %v6387_v21 = vpop.xlane.xlu1 %2069  ;;  %2634 = vrsqrt.f32 %v2117_v7 }
 0x1f9   :  { %v6397_v42 = vpop.xlane.xlu0 %1687  ;;  %v2150_v26 = vmax.f32 %v6387_v21, 1e-07  ;;  %v2173_v21 = vmul.f32 %v2603_v16, %v2601_v5 }
 0x1fa   :  { %v2120_v59 = vmax.f32 %v6397_v42, 1e-07 }
 0x1fb   :  { %2636 = vrsqrt.f32 %v2150_v26 }
 0x1fc   :  { %v6391_v3 = vpop.xlane.xlu1 %2078  ;;  %2638 = vrsqrt.f32 %v2118_v19 }
 0x1fd   :  { %v6401_v30 = vpop.xlane.xlu0 %1696  ;;  %v2151_v52 = vmax.f32 %v6391_v3, 1e-07  ;;  %v2611_v3 = vpop.eup %2610 }
 0x1fe   :  { %v2613_v20 = vpop.eup %2612  ;;  %v2121_v38 = vmax.f32 %v6401_v30, 1e-07 }
 0x1ff   :  { %v2615_v43 = vpop.eup %2614  ;;  %2640 = vrsqrt.f32 %v2151_v52 }
 0x200   :  { %v6395_v8 = vpop.xlane.xlu1 %2087  ;;  %2642 = vrsqrt.f32 %v2119_v54  ;;  %v2176_v37 = vmul.f32 %v2615_v43, %v2613_v20  ;;  %v2295_v20 = vadd.s32 4294967208, %v6415_v58 }
 0x201   :  { %v6405_v34 = vpop.xlane.xlu0 %1705  ;;  %v2152_v36 = vmax.f32 %v6395_v8, 1e-07 }
 0x202   :  { %v2122_v40 = vmax.f32 %v6405_v34, 1e-07 }
 0x203   :  { %2644 = vrsqrt.f32 %v2152_v36  ;;  %v2270_v36 = vsub.s32 %v2267_v63, %v6419_v47 }
 0x204   :  { %v6399_v1 = vpop.xlane.xlu1 %2096  ;;  %2646 = vrsqrt.f32 %v2120_v59 }
 0x205   :  { %v6409_v49 = vpop.xlane.xlu0 %1170 }
 0x206   :  { %v2187_v8 = vmul.f32 %v2171_v22, %v6409_v49  ;;  %v2175_v49 = vmul.f32 %v2611_v3, %v2609_v24  ;;  %v2288_v22 = vadd.s32 4294967216, %v6415_v58 }
 0x208   :  { %v6403_v17 = vpop.xlane.xlu1 %2105  ;;  %v2224_v61 = vrot.slane %v2187_v8, %v2223_v25 }
 0x209   :  { %v1189_v13 = vpop.xlane.xlu0 %1188  ;;  %v2154_v60 = vmax.f32 %v6403_v17, 1e-07  ;;  %v2153_v17 = vmax.f32 %v6399_v1, 1e-07 }
 0x20a   :  { %v2189_v42 = vmul.f32 %v2173_v21, %v1189_v13  ;;  %v2277_v21 = vsub.s32 %v2274_v33, %v6419_v47 }
 0x20c   :  { %v6407_v57 = vpop.xlane.xlu1 %1179  ;;  %v2236_v13 = vrot.slane %v2189_v42, %v2235_v48 }
 0x20d   :  { %v2188_v10 = vmul.f32 %v2172_v9, %v6407_v57  ;;  %v2617_v57 = vpop.eup %2616  ;;  %2648 = vrsqrt.f32 %v2154_v60 }
 0x20e   :  { %v2619_v50 = vpop.eup %2618  ;;  %2650 = vrsqrt.f32 %v2122_v40 }
 0x20f   :  { %v2229_v56 = vrot.slane %v2188_v10, %v2228_v15  ;;  %v2621_v12 = vpop.eup %2620  ;;  %2652 = vrsqrt.f32 %v2153_v17 }
 0x210   :  { %v6411_v44 = vpop.xlane.xlu1 %1197  ;;  %v2623_v31 = vpop.eup %2622  ;;  %2654 = vrsqrt.f32 %v2121_v38 }
 0x211   :  { %v2190_v14 = vmul.f32 %v2174_v6, %v6411_v44  ;;  %v2625_v34 = vpop.eup %2624  ;;  %v2177_v44 = vmul.f32 %v2619_v50, %v2617_v57  ;;  %v2231_v7 = vsel %vm2230_vm0, %v2229_v56, %v2224_v61  ;;  %v2178_v30 = vmul.f32 %v2623_v31, %v2621_v12 }
 0x212   :  { %v2627_v0 = vpop.eup %2626  ;;  %v2238_v1 = vsel %vm2237_vm1, %v2236_v13, %v2231_v7  ;;  %v2291_v6 = vsub.s32 %v2288_v22, %v6419_v47 }
 0x213   :  { %v2243_v26 = vrot.slane %v2190_v14, %v2242_v29  ;;  %v2629_v5 = vpop.eup %2628  ;;  %v2179_v62 = vmul.f32 %v2627_v0, %v2625_v34  ;;  %v2309_v14 = vadd.s32 4294967192, %v6415_v58 }
 0x214   :  { %v6421_v41 = vpop.xlane.xlu1 %1215  ;;  %v2631_v16 = vpop.eup %2630 }
 0x215   :  { %v2633_v54 = vpop.eup %2632  ;;  %v2245_v4 = vsel %vm2244_vm2, %v2243_v26, %v2238_v1  ;;  %v2180_v8 = vmul.f32 %v2631_v16, %v2629_v5  ;;  %v2312_v0 = vsub.s32 %v2309_v14, %v6419_v47  ;;  %v2316_v26 = vadd.s32 4294967184, %v6415_v58 }
 0x216   :  { %v2635_v25 = vpop.eup %2634 }
 0x217   :  { %v2637_v24 = vpop.eup %2636 }
 0x218   :  { %v1207_v32 = vpop.xlane.xlu0 %1206  ;;  %v2639_v10 = vpop.eup %2638 }
 0x219   :  { %v2191_v45 = vmul.f32 %v2175_v49, %v1207_v32  ;;  %v2192_v32 = vmul.f32 %v2176_v37, %v6421_v41  ;;  %v2641_v29 = vpop.eup %2640  ;;  %v2182_v40 = vmul.f32 %v2639_v10, %v2637_v24 }
 0x21a   :  { %v2643_v48 = vpop.eup %2642 }
 0x21b   :  { %v2250_v19 = vrot.slane %v2191_v45, %v2249_v27  ;;  %v2257_v39 = vrot.slane %v2192_v32, %v2256_v2  ;;  %v2645_v50 = vpop.eup %2644  ;;  %v2183_v12 = vmul.f32 %v2643_v48, %v2641_v29 }
 0x21c   :  { %v2647_v61 = vpop.eup %2646 }
 0x21d   :  { %v2252_v59 = vsel %vm2251_vm3, %v2250_v19, %v2245_v4  ;;  %v2649_v13 = vpop.eup %2648  ;;  %v2184_v38 = vmul.f32 %v2647_v61, %v2645_v50 }
 0x21e   :  { %v2259_v23 = vsel %vm2258_vm4, %v2257_v39, %v2252_v59  ;;  %v2651_v17 = vpop.eup %2650 }
 0x221   :  { %v6442_v51 = vpop.xlane.xlu1 %1233 }
 0x222   :  { %v2194_v9 = vmul.f32 %v2178_v30, %v6442_v51  ;;  %v2181_v51 = vmul.f32 %v2635_v25, %v2633_v54 }
 0x224   :  { %v2271_v42 = vrot.slane %v2194_v9, %v2270_v36 }
 0x22a   :  { %v1225_v53 = vpop.xlane.xlu0 %1224 }
 0x22b   :  { %v2193_v52 = vmul.f32 %v2177_v44, %v1225_v53  ;;  %v2284_v53 = vsub.s32 %v2281_v11, %v6419_v47  ;;  %v2323_v44 = vadd.s32 4294967176, %v6415_v58  ;;  %v2319_v11 = vsub.s32 %v2316_v26, %v6419_v47 }
 0x22d   :  { %v2264_v15 = vrot.slane %v2193_v52, %v2263_v28  ;;  %v2653_v28 = vpop.eup %2652  ;;  %v2186_v52 = vmul.f32 %v2651_v17, %v2649_v13  ;;  %v2326_v30 = vsub.s32 %v2323_v44, %v6419_v47 }
 0x22e   :  { %v2655_v32 = vpop.eup %2654 }
 0x22f   :  { %v2266_v2 = vsel %vm2265_vm5, %v2264_v15, %v2259_v23  ;;  %v2185_v36 = vmul.f32 %v2655_v32, %v2653_v28 }
 0x230   :  { %v2273_v45 = vsel %vm2272_vm6, %v2271_v42, %v2266_v2 }
 0x231   :  { %v1252_v18 = vpop.xlane.xlu1 %1251 }
 0x232   :  { %v2196_v43 = vmul.f32 %v2180_v8, %v1252_v18  ;;  %v2298_v18 = vsub.s32 %v2295_v20, %v6419_v47 }
 0x234   :  { %v2285_v27 = vrot.slane %v2196_v43, %v2284_v53 }
 0x238   :  { %v1243_v55 = vpop.xlane.xlu0 %1242 }
 0x239   :  { %v2195_v3 = vmul.f32 %v2179_v62, %v1243_v55  ;;  %v2305_v55 = vsub.s32 %v2302_v35, %v6419_v47 }
 0x23b   :  { %v2278_v57 = vrot.slane %v2195_v3, %v2277_v21 }
 0x23d   :  { %v2280_v37 = vsel %vm2279_vm7, %v2278_v57, %v2273_v45 }
 0x23e   :  { %v2287_v1 = vsel %vm2286_vm8, %v2285_v27, %v2280_v37 }
 0x23f   :  { %v1270_v41 = vpop.xlane.xlu1 %1269 }
 0x240   :  { %v2198_v31 = vmul.f32 %v2182_v40, %v1270_v41 }
 0x242   :  { %v2299_v5 = vrot.slane %v2198_v31, %v2298_v18 }
 0x249   :  { %v1261_v46 = vpop.xlane.xlu0 %1260 }
 0x24a   :  { %v2197_v60 = vmul.f32 %v2181_v51, %v1261_v46 }
 0x24c   :  { %v2292_v63 = vrot.slane %v2197_v60, %v2291_v6 }
 0x24e   :  { %v2294_v33 = vsel %vm2293_vm9, %v2292_v63, %v2287_v1 }
 0x24f   :  { %v2301_v41 = vsel %vm2300_vm10, %v2299_v5, %v2294_v33 }
 0x250   :  { %v1288_v49 = vpop.xlane.xlu1 %1287 }
 0x251   :  { %v2200_v19 = vmul.f32 %v2184_v38, %v1288_v49 }
 0x253   :  { %v2313_v62 = vrot.slane %v2200_v19, %v2312_v0 }
 0x257   :  { %v1279_v56 = vpop.xlane.xlu0 %1278 }
 0x258   :  { %v2199_v34 = vmul.f32 %v2183_v12, %v1279_v56 }
 0x25a   :  { %v2306_v16 = vrot.slane %v2199_v34, %v2305_v55 }
 0x25c   :  { %v1306_v7 = vpop.xlane.xlu1 %1305  ;;  %v2308_v58 = vsel %vm2307_vm11, %v2306_v16, %v2301_v41 }
 0x25d   :  { %v2202_v54 = vmul.f32 %v2186_v52, %v1306_v7  ;;  %v2315_v22 = vsel %vm2314_vm12, %v2313_v62, %v2308_v58 }
 0x25f   :  { %v2327_v4 = vrot.slane %v2202_v54, %v2326_v30 }
 0x262   :  { %v1297_v25 = vpop.xlane.xlu0 %1296 }
 0x263   :  { %v2201_v39 = vmul.f32 %v2185_v36, %v1297_v25 }
 0x265   :  { %v2320_v9 = vrot.slane %v2201_v39, %v2319_v11 }
 0x267   :  { %v2322_v46 = vsel %vm2321_vm13, %v2320_v9, %v2315_v22 }
 0x268   :  { %v2329_v24 = vsel %vm2328_vm14, %v2327_v4, %v2322_v46 }
 0x269   :  { %2331 = vst [vmem:[%s6492_s2] sm:$0x1] %v2329_v24 }

</bundles_post_ra>
